<compile_context>
chip_gen: v7x
topology: tpu7x:2x2x1
jax: 0.10.0
libtpu: 0.0.40
codegen_flags: <defaults>
</compile_context>

<pallas_src>
import functools

import numpy as np
import jax
import jax.numpy as jnp
from jax import lax
from jax.experimental import pallas as pl
from jax.experimental.pallas import tpu as pltpu


# ----------------------------------------------------------------------------
# Pallas kernel: fused 3x3 conv (im2col + single GEMM) + BN affine + LeakyReLU.
# ----------------------------------------------------------------------------
def _conv_bn_lrelu_kernel(x_ref, wk_ref, scale_ref, shift_ref, o_ref, im2col_ref, *,
                          H, W, neg_slope):
    """One grid step = NB whole images.

    x_ref      : (NB, H+2, W+2, Cin)  bf16 zero-padded channels-last input block
    wk_ref     : (Cout, 9*Cin)        bf16 folded conv taps, K index = (kh*3+kw)*Cin + c
    scale_ref  : (Cout, 1)            f32 fused BN scale  = gamma / sqrt(var + eps)
    shift_ref  : (Cout, 1)            f32 fused BN shift  = (b_conv - mean)*scale + beta
    o_ref      : (NB, Cout, H*W)      f32 channels-first output block (lane-dense stores)
    im2col_ref : (NB*H*W, 9*Cin)      bf16 VMEM scratch, built once per grid step
    """
    NB = x_ref.shape[0]
    Cin = x_ref.shape[-1]
    HW = H * W
    rows = NB * HW

    # ---- build the im2col scratch once per step: K = 9*Cin on the lane dim -----
    for kh in range(3):
        for kw in range(3):
            t = kh * 3 + kw
            patch = x_ref[:, kh:kh + H, kw:kw + W, :]           # (NB, H, W, Cin)
            im2col_ref[:, t * Cin:(t + 1) * Cin] = patch.reshape(rows, Cin)

    # ---- one deep-K GEMM: (Cout, 9*Cin) x (rows, 9*Cin)^T -> (Cout, rows) -------
    y = lax.dot_general(
        wk_ref[...], im2col_ref[...],
        dimension_numbers=(((1,), (1,)), ((), ())),
        preferred_element_type=jnp.float32)                      # f32 accumulate

    # ---- conv bias + BatchNorm folded affine (sublane bcast) + LeakyReLU, f32 ---
    y = y * scale_ref[...] + shift_ref[...]
    y = jnp.where(y >= 0.0, y, y * neg_slope)

    # ---- lane-aligned (Cout, H*W) slab per image; no transposes -----------------
    for n in range(NB):
        o_ref[n] = y[:, n * HW:(n + 1) * HW]


# ----------------------------------------------------------------------------
# Tiling helpers (generation-aware VMEM budget).
# ----------------------------------------------------------------------------
def _vmem_capacity_bytes():
    try:
        info = pltpu.get_tpu_info()
        cap = getattr(info, "vmem_capacity_bytes", None)
        if cap:
            return int(cap)
    except Exception:
        pass
    return 64 << 20  # conservative: v7x per-TensorCore physical VMEM


def _per_step_vmem_bytes(nb, H, W, Cin, Cout):
    in_b = nb * (H + 2) * (W + 2) * Cin * 2 * 2          # bf16 input, double-buffered
    out_b = nb * Cout * H * W * 4 * 2                    # f32 output, double-buffered
    wgt_b = (Cout * 9 * Cin * 2 + 2 * Cout * 4) * 2      # taps + scale/shift (dbl-buf)
    scr_b = nb * H * W * 9 * Cin * 2                     # im2col scratch (bf16)
    gemm_b = nb * Cout * H * W * 4                       # f32 GEMM result intermediate
    return in_b + out_b + wgt_b + scr_b + gemm_b


def _pick_images_per_step(N, H, W, Cin, Cout, budget):
    fits = [nb for nb in range(N, 0, -1)
            if N % nb == 0 and _per_step_vmem_bytes(nb, H, W, Cin, Cout) <= budget]
    if not fits:
        return 1
    # Prefer >=2 grid steps so both v7x TensorCores get work (near-free on 1-TC chips).
    multi = [nb for nb in fits if N // nb >= 2]
    return multi[0] if multi else fits[0]


# ----------------------------------------------------------------------------
# Wrapper.
# ----------------------------------------------------------------------------
def conv_dropout_norm_nonlin(x, params, *, negative_slope=0.01, eps=1e-5):
    """Forward pass of ConvDropoutNormNonlin (inference semantics).

    x: (N, Cin, H, W) float32 in PyTorch NCHW layout.
    Returns: (N, Cout, H, W) float32.
    """
    N, Cin, H, W = x.shape
    w = params["conv_w"]                                  # (Cout, Cin, 3, 3)
    Cout = w.shape[0]

    # ---- one-time host-side parameter folds ---------------------------------
    # Taps -> (Cout, 9*Cin) with K ordering (kh, kw, c) matching the im2col build.
    wk = jnp.transpose(w, (0, 2, 3, 1)).reshape(Cout, 9 * Cin).astype(jnp.bfloat16)
    gamma = params["bn_gamma"].astype(jnp.float32)
    inv = 1.0 / jnp.sqrt(params["bn_var"].astype(jnp.float32) + eps)
    scale = (gamma * inv).reshape(Cout, 1)
    shift = ((params["conv_b"].astype(jnp.float32)
              - params["bn_mean"].astype(jnp.float32)) * gamma * inv
             + params["bn_beta"].astype(jnp.float32)).reshape(Cout, 1)

    # ---- layout plumbing: NCHW -> zero-padded bf16 NHWC (small input tensor) --
    xh = jnp.transpose(x, (0, 2, 3, 1)).astype(jnp.bfloat16)
    xh = jnp.pad(xh, ((0, 0), (1, 1), (1, 1), (0, 0)))

    # TODO(synk): Dropout2d(p=0.5) *training* mode (per-channel random zeroing with
    # 1/(1-p) scaling) and BatchNorm2d batch-statistics mode are not wired in; this
    # kernel implements the deterministic eval-mode forward.

    cap = _vmem_capacity_bytes()
    budget = min(int(cap * 0.4), 48 << 20)                # ~25 MiB on v7x, 48 MiB v5e/v6e
    nb = _pick_images_per_step(N, H, W, Cin, Cout, budget)
    grid = (N // nb,)
    ws = _per_step_vmem_bytes(nb, H, W, Cin, Cout)
    vmem_limit = int(min(int(cap * 0.75), max(2 * ws, 32 << 20)))

    kernel = functools.partial(_conv_bn_lrelu_kernel, H=H, W=W,
                               neg_slope=negative_slope)

    flops = int(2 * N * H * W * Cout * 9 * Cin + 4 * N * H * W * Cout)
    bytes_accessed = int(2 * xh.size + 2 * wk.size
                         + 4 * (scale.size + shift.size)
                         + 4 * N * Cout * H * W)

    out = pl.pallas_call(
        kernel,
        out_shape=jax.ShapeDtypeStruct((N, Cout, H * W), jnp.float32),
        grid_spec=pltpu.PrefetchScalarGridSpec(
            num_scalar_prefetch=0,
            grid=grid,
            in_specs=[
                pl.BlockSpec((nb, H + 2, W + 2, Cin), lambda b: (b, 0, 0, 0)),  # x
                pl.BlockSpec((Cout, 9 * Cin), lambda b: (0, 0)),                # taps
                pl.BlockSpec((Cout, 1), lambda b: (0, 0)),                      # scale
                pl.BlockSpec((Cout, 1), lambda b: (0, 0)),                      # shift
            ],
            out_specs=pl.BlockSpec((nb, Cout, H * W), lambda b: (b, 0, 0)),
            scratch_shapes=[pltpu.VMEM((nb * H * W, 9 * Cin), jnp.bfloat16)],
        ),
        compiler_params=pltpu.CompilerParams(
            dimension_semantics=("parallel",),
            vmem_limit_bytes=vmem_limit),
        cost_estimate=pl.CostEstimate(
            flops=flops, transcendentals=0, bytes_accessed=bytes_accessed),
    )(xh, wk, scale, shift)

    return out.reshape(N, Cout, H, W)


# ----------------------------------------------------------------------------
# Pure-JAX reference (direct transcription of the PyTorch forward, eval mode).
# ----------------------------------------------------------------------------
def reference_forward(x, params, *, negative_slope=0.01, eps=1e-5):
    y = lax.conv_general_dilated(
        x, params["conv_w"], window_strides=(1, 1), padding=((1, 1), (1, 1)),
        dimension_numbers=("NCHW", "OIHW", "NCHW"))
    y = y + params["conv_b"][None, :, None, None]
    # Dropout2d: identity in eval mode.
    mean = params["bn_mean"][None, :, None, None]
    var = params["bn_var"][None, :, None, None]
    gamma = params["bn_gamma"][None, :, None, None]
    beta = params["bn_beta"][None, :, None, None]
    y = (y - mean) / jnp.sqrt(var + eps) * gamma + beta
    return jnp.where(y >= 0.0, y, negative_slope * y)


# ----------------------------------------------------------------------------
if __name__ == "__main__":
    N, Cin, H, W = 2, 4, 16, 16
    Cout = 32

    key = jax.random.PRNGKey(0)
    kx, kw, kb, kg, kbt, km, kv = jax.random.split(key, 7)

    params = {
        "conv_w":   0.10 * jax.random.normal(kw, (Cout, Cin, 3, 3), jnp.float32),
        "conv_b":   0.05 * jax.random.normal(kb, (Cout,), jnp.float32),
        "bn_gamma": 1.0 + 0.10 * jax.random.normal(kg, (Cout,), jnp.float32),
        "bn_beta":  0.10 * jax.random.normal(kbt, (Cout,), jnp.float32),
        "bn_mean":  0.05 * jax.random.normal(km, (Cout,), jnp.float32),
        "bn_var":   1.0 + 0.10 * jax.nn.softplus(
            jax.random.normal(kv, (Cout,), jnp.float32)),
    }

    x = jax.random.normal(kx, (N, Cin, H, W), jnp.float32)

    out = jax.block_until_ready(conv_dropout_norm_nonlin(x, params))
    ref = jax.block_until_ready(reference_forward(x, params))

    assert out.shape == (N, Cout, H, W), out.shape
    # bf16 MXU operands vs f32 reference -> loosened tolerance (still catches any
    # tap-ordering / BN-folding bug, which would produce O(0.1..1) errors).
    if not np.allclose(np.asarray(out), np.asarray(ref), atol=3e-2, rtol=3e-2):
        max_err = float(np.max(np.abs(np.asarray(out) - np.asarray(ref))))
        raise AssertionError(f"Pallas kernel mismatch vs reference, max|err|={max_err}")
    print("KERNEL_OK")
</pallas_src>

<mosaic_0001>
module attributes {stable_mosaic.version = 11 : i64} {
  func.func @_conv_bn_lrelu_kernel(%arg0: i32, %arg1: memref<1x18x18x4xbf16, #tpu.memory_space<vmem>>, %arg2: memref<32x36xbf16, #tpu.memory_space<vmem>>, %arg3: memref<32x1xf32, #tpu.memory_space<vmem>>, %arg4: memref<32x1xf32, #tpu.memory_space<vmem>>, %arg5: memref<1x32x256xf32, #tpu.memory_space<vmem>>, %arg6: memref<256x36xbf16, #tpu.memory_space<vmem>>) attributes {dimension_semantics = [#tpu.dimension_semantics<parallel>], iteration_bounds = array<i64: 2>, scalar_prefetch = 0 : i64, scratch_operands = 1 : i64, tpu.core_type = #tpu.core_type<tc>, window_params = [{transform_indices = @transform_0, window_bounds = array<i64: 1, 18, 18, 4>}, {pipeline_mode = #tpu.pipeline_mode<synchronous>, transform_indices = @transform_1, window_bounds = array<i64: 32, 36>}, {pipeline_mode = #tpu.pipeline_mode<synchronous>, transform_indices = @transform_2, window_bounds = array<i64: 32, 1>}, {pipeline_mode = #tpu.pipeline_mode<synchronous>, transform_indices = @transform_3, window_bounds = array<i64: 32, 1>}, {transform_indices = @transform_4, window_bounds = array<i64: 1, 32, 256>}]} {
    %c0 = arith.constant 0 : index
    %c0_0 = arith.constant 0 : index
    %c0_1 = arith.constant 0 : index
    %c0_2 = arith.constant 0 : index
    %0 = vector.load %arg1[%c0, %c0_0, %c0_1, %c0_2] : memref<1x18x18x4xbf16, #tpu.memory_space<vmem>>, vector<1x16x16x4xbf16>
    %1 = vector.shape_cast %0 : vector<1x16x16x4xbf16> to vector<256x4xbf16>
    %c0_3 = arith.constant 0 : index
    %c0_4 = arith.constant 0 : index
    %2 = vector.load %arg6[%c0_3, %c0_4] : memref<256x36xbf16, #tpu.memory_space<vmem>>, vector<256x4xbf16>
    tpu.vector_store %arg6[%c0_3, %c0_4], %1 {strides = array<i32>} : memref<256x36xbf16, #tpu.memory_space<vmem>>, vector<256x4xbf16>,
    %c0_5 = arith.constant 0 : index
    %c0_6 = arith.constant 0 : index
    %c1 = arith.constant 1 : index
    %c0_7 = arith.constant 0 : index
    %3 = vector.load %arg1[%c0_5, %c0_6, %c1, %c0_7] : memref<1x18x18x4xbf16, #tpu.memory_space<vmem>>, vector<1x16x16x4xbf16>
    %4 = vector.shape_cast %3 : vector<1x16x16x4xbf16> to vector<256x4xbf16>
    %c0_8 = arith.constant 0 : index
    %c4 = arith.constant 4 : index
    %5 = vector.load %arg6[%c0_8, %c4] : memref<256x36xbf16, #tpu.memory_space<vmem>>, vector<256x4xbf16>
    tpu.vector_store %arg6[%c0_8, %c4], %4 {strides = array<i32>} : memref<256x36xbf16, #tpu.memory_space<vmem>>, vector<256x4xbf16>,
    %c0_9 = arith.constant 0 : index
    %c0_10 = arith.constant 0 : index
    %c2 = arith.constant 2 : index
    %c0_11 = arith.constant 0 : index
    %6 = vector.load %arg1[%c0_9, %c0_10, %c2, %c0_11] : memref<1x18x18x4xbf16, #tpu.memory_space<vmem>>, vector<1x16x16x4xbf16>
    %7 = vector.shape_cast %6 : vector<1x16x16x4xbf16> to vector<256x4xbf16>
    %c0_12 = arith.constant 0 : index
    %c8 = arith.constant 8 : index
    %8 = vector.load %arg6[%c0_12, %c8] : memref<256x36xbf16, #tpu.memory_space<vmem>>, vector<256x4xbf16>
    tpu.vector_store %arg6[%c0_12, %c8], %7 {strides = array<i32>} : memref<256x36xbf16, #tpu.memory_space<vmem>>, vector<256x4xbf16>,
    %c0_13 = arith.constant 0 : index
    %c1_14 = arith.constant 1 : index
    %c0_15 = arith.constant 0 : index
    %c0_16 = arith.constant 0 : index
    %9 = vector.load %arg1[%c0_13, %c1_14, %c0_15, %c0_16] : memref<1x18x18x4xbf16, #tpu.memory_space<vmem>>, vector<1x16x16x4xbf16>
    %10 = vector.shape_cast %9 : vector<1x16x16x4xbf16> to vector<256x4xbf16>
    %c0_17 = arith.constant 0 : index
    %c12 = arith.constant 12 : index
    %11 = vector.load %arg6[%c0_17, %c12] : memref<256x36xbf16, #tpu.memory_space<vmem>>, vector<256x4xbf16>
    tpu.vector_store %arg6[%c0_17, %c12], %10 {strides = array<i32>} : memref<256x36xbf16, #tpu.memory_space<vmem>>, vector<256x4xbf16>,
    %c0_18 = arith.constant 0 : index
    %c1_19 = arith.constant 1 : index
    %c1_20 = arith.constant 1 : index
    %c0_21 = arith.constant 0 : index
    %12 = vector.load %arg1[%c0_18, %c1_19, %c1_20, %c0_21] : memref<1x18x18x4xbf16, #tpu.memory_space<vmem>>, vector<1x16x16x4xbf16>
    %13 = vector.shape_cast %12 : vector<1x16x16x4xbf16> to vector<256x4xbf16>
    %c0_22 = arith.constant 0 : index
    %c16 = arith.constant 16 : index
    %14 = vector.load %arg6[%c0_22, %c16] : memref<256x36xbf16, #tpu.memory_space<vmem>>, vector<256x4xbf16>
    tpu.vector_store %arg6[%c0_22, %c16], %13 {strides = array<i32>} : memref<256x36xbf16, #tpu.memory_space<vmem>>, vector<256x4xbf16>,
    %c0_23 = arith.constant 0 : index
    %c1_24 = arith.constant 1 : index
    %c2_25 = arith.constant 2 : index
    %c0_26 = arith.constant 0 : index
    %15 = vector.load %arg1[%c0_23, %c1_24, %c2_25, %c0_26] : memref<1x18x18x4xbf16, #tpu.memory_space<vmem>>, vector<1x16x16x4xbf16>
    %16 = vector.shape_cast %15 : vector<1x16x16x4xbf16> to vector<256x4xbf16>
    %c0_27 = arith.constant 0 : index
    %c20 = arith.constant 20 : index
    %17 = vector.load %arg6[%c0_27, %c20] : memref<256x36xbf16, #tpu.memory_space<vmem>>, vector<256x4xbf16>
    tpu.vector_store %arg6[%c0_27, %c20], %16 {strides = array<i32>} : memref<256x36xbf16, #tpu.memory_space<vmem>>, vector<256x4xbf16>,
    %c0_28 = arith.constant 0 : index
    %c2_29 = arith.constant 2 : index
    %c0_30 = arith.constant 0 : index
    %c0_31 = arith.constant 0 : index
    %18 = vector.load %arg1[%c0_28, %c2_29, %c0_30, %c0_31] : memref<1x18x18x4xbf16, #tpu.memory_space<vmem>>, vector<1x16x16x4xbf16>
    %19 = vector.shape_cast %18 : vector<1x16x16x4xbf16> to vector<256x4xbf16>
    %c0_32 = arith.constant 0 : index
    %c24 = arith.constant 24 : index
    %20 = vector.load %arg6[%c0_32, %c24] : memref<256x36xbf16, #tpu.memory_space<vmem>>, vector<256x4xbf16>
    tpu.vector_store %arg6[%c0_32, %c24], %19 {strides = array<i32>} : memref<256x36xbf16, #tpu.memory_space<vmem>>, vector<256x4xbf16>,
    %c0_33 = arith.constant 0 : index
    %c2_34 = arith.constant 2 : index
    %c1_35 = arith.constant 1 : index
    %c0_36 = arith.constant 0 : index
    %21 = vector.load %arg1[%c0_33, %c2_34, %c1_35, %c0_36] : memref<1x18x18x4xbf16, #tpu.memory_space<vmem>>, vector<1x16x16x4xbf16>
    %22 = vector.shape_cast %21 : vector<1x16x16x4xbf16> to vector<256x4xbf16>
    %c0_37 = arith.constant 0 : index
    %c28 = arith.constant 28 : index
    %23 = vector.load %arg6[%c0_37, %c28] : memref<256x36xbf16, #tpu.memory_space<vmem>>, vector<256x4xbf16>
    tpu.vector_store %arg6[%c0_37, %c28], %22 {strides = array<i32>} : memref<256x36xbf16, #tpu.memory_space<vmem>>, vector<256x4xbf16>,
    %c0_38 = arith.constant 0 : index
    %c2_39 = arith.constant 2 : index
    %c2_40 = arith.constant 2 : index
    %c0_41 = arith.constant 0 : index
    %24 = vector.load %arg1[%c0_38, %c2_39, %c2_40, %c0_41] : memref<1x18x18x4xbf16, #tpu.memory_space<vmem>>, vector<1x16x16x4xbf16>
    %25 = vector.shape_cast %24 : vector<1x16x16x4xbf16> to vector<256x4xbf16>
    %c0_42 = arith.constant 0 : index
    %c32 = arith.constant 32 : index
    %26 = vector.load %arg6[%c0_42, %c32] : memref<256x36xbf16, #tpu.memory_space<vmem>>, vector<256x4xbf16>
    tpu.vector_store %arg6[%c0_42, %c32], %25 {strides = array<i32>} : memref<256x36xbf16, #tpu.memory_space<vmem>>, vector<256x4xbf16>,
    %c0_43 = arith.constant 0 : index
    %c0_44 = arith.constant 0 : index
    %27 = vector.load %arg2[%c0_43, %c0_44] : memref<32x36xbf16, #tpu.memory_space<vmem>>, vector<32x36xbf16>
    %c0_45 = arith.constant 0 : index
    %c0_46 = arith.constant 0 : index
    %28 = vector.load %arg6[%c0_45, %c0_46] : memref<256x36xbf16, #tpu.memory_space<vmem>>, vector<256x36xbf16>
    %cst = arith.constant dense<0.000000e+00> : vector<32x256xf32>
    %29 = tpu.matmul %27, %28, %cst {dimension_numbers = #tpu.dot_dimension_numbers<[1], [1], [0], [0], [0, 0, 1, 0], [], []>} : vector<32x36xbf16>, vector<256x36xbf16>, vector<32x256xf32> -> vector<32x256xf32>
    %c0_47 = arith.constant 0 : index
    %c0_48 = arith.constant 0 : index
    %30 = vector.load %arg3[%c0_47, %c0_48] : memref<32x1xf32, #tpu.memory_space<vmem>>, vector<32x1xf32>
    %31 = vector.broadcast %30 : vector<32x1xf32> to vector<32x256xf32>
    %32 = arith.mulf %29, %31 : vector<32x256xf32>
    %c0_49 = arith.constant 0 : index
    %c0_50 = arith.constant 0 : index
    %33 = vector.load %arg4[%c0_49, %c0_50] : memref<32x1xf32, #tpu.memory_space<vmem>>, vector<32x1xf32>
    %34 = vector.broadcast %33 : vector<32x1xf32> to vector<32x256xf32>
    %35 = arith.addf %32, %34 : vector<32x256xf32>
    %cst_51 = arith.constant 0.000000e+00 : f32
    %36 = vector.broadcast %cst_51 : f32 to vector<32x256xf32>
    %37 = arith.cmpf oge, %35, %36 : vector<32x256xf32>
    %cst_52 = arith.constant 0.00999999977 : f32
    %38 = vector.broadcast %cst_52 : f32 to vector<32x256xf32>
    %39 = arith.mulf %35, %38 : vector<32x256xf32>
    %40 = arith.select %37, %35, %39 : vector<32x256xi1>, vector<32x256xf32>
    %c0_53 = arith.constant 0 : index
    %c0_54 = arith.constant 0 : index
    %c0_55 = arith.constant 0 : index
    %41 = vector.load %arg5[%c0_53, %c0_54, %c0_55] : memref<1x32x256xf32, #tpu.memory_space<vmem>>, vector<1x32x256xf32>
    %42 = vector.shape_cast %41 : vector<1x32x256xf32> to vector<32x256xf32>
    %43 = vector.shape_cast %40 : vector<32x256xf32> to vector<1x32x256xf32>
    tpu.vector_store %arg5[%c0_53, %c0_54, %c0_55], %43 {strides = array<i32>} : memref<1x32x256xf32, #tpu.memory_space<vmem>>, vector<1x32x256xf32>,
    return
  }
  func.func @transform_0(%arg0: i32) -> (i32, i32, i32, i32) {
    %c0_i32 = arith.constant 0 : i32
    %c0_i32_0 = arith.constant 0 : i32
    %c0_i32_1 = arith.constant 0 : i32
    %c0_i32_2 = arith.constant 0 : i32
    return %arg0, %c0_i32, %c0_i32_0, %c0_i32_1 : i32, i32, i32, i32
  }
  func.func @transform_1(%arg0: i32) -> (i32, i32) {
    %c0_i32 = arith.constant 0 : i32
    %c0_i32_0 = arith.constant 0 : i32
    %c0_i32_1 = arith.constant 0 : i32
    return %c0_i32, %c0_i32_0 : i32, i32
  }
  func.func @transform_2(%arg0: i32) -> (i32, i32) {
    %c0_i32 = arith.constant 0 : i32
    %c0_i32_0 = arith.constant 0 : i32
    %c0_i32_1 = arith.constant 0 : i32
    return %c0_i32, %c0_i32_0 : i32, i32
  }
  func.func @transform_3(%arg0: i32) -> (i32, i32) {
    %c0_i32 = arith.constant 0 : i32
    %c0_i32_0 = arith.constant 0 : i32
    %c0_i32_1 = arith.constant 0 : i32
    return %c0_i32, %c0_i32_0 : i32, i32
  }
  func.func @transform_4(%arg0: i32) -> (i32, i32, i32) {
    %c0_i32 = arith.constant 0 : i32
    %c0_i32_0 = arith.constant 0 : i32
    %c0_i32_1 = arith.constant 0 : i32
    return %arg0, %c0_i32, %c0_i32_0 : i32, i32, i32
  }
}

</mosaic_0001>

<bundles_post_ra>
// kernel: tpu_custom_call.1
= control target key start
LH: loop header
LB: loop body
LE: loop exit
PB: predicated region body
PF: predicated region fallthrough
CT: control target
= control target key end

     0   :  { %9 = vsyncpa [#allocation4], 0  ;;  %s5548_s0 = inlined_call_operand.vmem [shape: bf16[2,18,18,4], index: 0, kind: input, shape index: {}]   ;;  %s5549_s1 = inlined_call_operand.vmem [shape: bf16[32,36], index: 1, kind: input, shape index: {}]   ;;  %s5550_s2 = inlined_call_operand.vmem [shape: f32[32,1], index: 2, kind: input, shape index: {}]   ;;  %s5551_s3 = inlined_call_operand.vmem [shape: f32[32,1], index: 3, kind: input, shape index: {}]   ;;  %s5552_s4 = inlined_call_operand.hbm [shape: f32[2,32,256], index: 4, kind: output, shape index: {}]  }
   0x1   :  { %11 = vsyncpa [#allocation4 + $0x1], 0  ;;  %s4330_s15 = smov 0   ;;  %s4332_s16 = smov 0  }
   0x2   :  { %s4334_s17 = smov 0   ;;  %s4336_s18 = smov 0  }
   0x3 LB: > { %s4351_s19 = sadd.s32 4294967295, %s4292_s18   ;;  %s3612_s20 = sadd.s32 4294967294, %s4292_s18   ;;  %s4292_s18 = sphi %s4336_s18, %s5562_s18   ;;  %s4288_s17 = sphi %s4334_s17, %s5561_s17   ;;  %s4284_s16 = sphi %s4332_s16, %s5560_s16   ;;  %s4280_s15 = sphi %s4330_s15, %s5559_s15  }
   0x4   : > { %s4355_s21 = sadd.s32 1, %s4292_s18   ;;  %s113_s22 = sadd.s32 1, %s4288_s17 }
   0x5   : > { %s110_s23 = ssub.s32 %s4292_s18, %s4355_s21  ;;  %p123_p0 = scmp.ne.s32.totalorder %s4288_s17, %s4284_s16 }
   0x6   : > { %p111_p1 = scmp.eq.s32.totalorder %s110_s23, 0  ;;  %p124_p2 = scmp.eq.s32.totalorder %s4351_s19, 1 }
   0x7   : > { %p129_p3 = scmp.ne.s32.totalorder %s4284_s16, %s4280_s15  ;;  %p130_p4 = scmp.eq.s32.totalorder %s3612_s20, 1 }
   0x8   : > { %s4366_s24 = scalar_select %p111_p1, %s4288_s17, %s113_s22  }
   0x9   : > { %p4368_p5 = por %p124_p2, %p123_p0  ;;  %p4372_p6 = por %p130_p4, %p129_p3 }
   0xa   : > { %p3615_p7 = scmp.ge.s32.totalorder %s4292_s18, 1  ;;  %p165_p8 = scmp.lt.s32.totalorder %s4292_s18, 3 }
   0xc   : > { %p166_p9 = pnand %p3615_p7, %p165_p8 }
   0xd   : > { %p191_p10 = scmp.lt.s32.totalorder (!%p166_p9), %s4351_s19, 1  ;;  %vm986_vm0 = vcmask (!%p166_p9), 1042432   ;;  %vm987_vm1 = vcmask (!%p166_p9), 1046532   ;;  %s4294_s6 = smov (!%p166_p9), 12   ;;  %vm390_vm3 = vsmask.f32 (!%p166_p9), 3328 }
   0xe   : > { %169 = sbr.rel (%p166_p9) target bundleno = 695 (0x2b7), region = 36  ;;  %vm4385_vm2 = vmor (!%p166_p9), %vm986_vm0, %vm987_vm1  ;;  %vm391_vm4 = vsmask.f32 (!%p166_p9), 7440  ;;  %s4295_s7 = smov (!%p166_p9), 20   ;;  %vm325_vm6 = vcmask (!%p166_p9), 31744   ;;  %vm873_vm7 = vcmask (!%p166_p9), 64544  }
   0xf   : > { %s4296_s8 = smov (!%p166_p9), 8   ;;  %vm4426_vm5 = vmor (!%p166_p9), %vm390_vm3, %vm391_vm4  ;;  %s4297_s9 = smov (!%p166_p9), 4   ;;  %vm1197_vm8 = vcmask (!%p166_p9), 97344   ;;  %vm1375_vm9 = vcmask (!%p166_p9), 130144   ;;  %vm1920_vm10 = vcmask (!%p166_p9), 162944   ;;  %vm2241_vm11 = vcmask (!%p166_p9), 195744  }
  0x10   : > { %s4298_s10 = smov (!%p166_p9), 16   ;;  %s4299_s11 = smov (!%p166_p9), 24   ;;  %vm2419_vm12 = vcmask (!%p166_p9), 228544   ;;  %vm2964_vm13 = vcmask (!%p166_p9), 261344   ;;  %vm3285_vm14 = vcmask (!%p166_p9), 294144   ;;  %vm3332_vm15 = vcmask (!%p166_p9), 293888  }
  0x11   : > { %s4300_s12 = smov (!%p166_p9), 28   ;;  %s4301_s13 = smov (!%p166_p9), 32   ;;  %v5384_v53 = vld [vmem:[%s5549_s1] sm:$0xff] (!%p166_p9)  }
  0x12   : > { %4092 = vmatprep.mubr.msk.bf16.mxu0 (!%p166_p9), %vm3332_vm15, %v5384_v53  ;;  %s4075_s29 = sshll.u32 (!%p166_p9), %s4351_s19, 10 }
  0x15   : > { %s192_s27 = scalar_select %p191_p10, %s4351_s19, 1 }
  0x17   : > { %s4128_s28 = smul.u32 216, %s192_s27  ;;  %s188_s27 = sand.u32 1, %s4284_s16  }
  0x19   : > { %s4383_s5 = scalar_lea.vmem %s5548_s0, %s4128_s28  ;;  %s5493_s28 = sshll.u32 %s188_s27, 6 }
  0x1a   : > { %v4180_v1 = vld [vmem:[%s4383_s5 + $0x6c] sm:$0xff]   ;;  %v3796_v5 = vld [vmem:[%s4383_s5 + $0x14] sm:$0x1]  ;;  %v890_v9 = vld [vmem:[%s4383_s5] sm:$0xe]  ;;  %s190_s30 = scalar_lea.vmem [#allocation3], %s5493_s28 }
  0x1b   : > { %v4181_v2 = vld [vmem:[%s4383_s5 + $0xc] sm:$0xff]   ;;  %1343 = vrot.lane.b32.xlu1 %v4180_v1, %s4294_s6  ;;  %v2038_v8 = vrot.slane %v3796_v5, 5  ;;  %v891_v10 = vld [vmem:[%s4383_s5 + $0x4] sm:$0xf]  ;;  %v892_v11 = vld [vmem:[%s4383_s5 + $0x8] sm:$0x1] }
  0x1c   : > { %v3794_v3 = vld [vmem:[%s4383_s5 + $0xc] sm:$0xe]  ;;  %v3795_v4 = vld [vmem:[%s4383_s5 + $0x10] sm:$0xf]  ;;  %1327 = vrot.lane.b32.xlu0 %v4181_v2, %s4294_s6  ;;  %v3650_v12 = vrot.slane %v890_v9, 9  ;;  %v991_v15 = vrot.slane %v891_v10, 5 }
  0x1d   : > { %v3842_v6 = vrot.slane %v3794_v3, 9  ;;  %v2035_v7 = vrot.slane %v3795_v4, 5  ;;  %v994_v16 = vrot.slane %v892_v11, 5  ;;  %v914_v17 = vld [vmem:[%s4383_s5 + $0x60] sm:$0xe] }
  0x1e   : > { %v915_v18 = vld [vmem:[%s4383_s5 + $0x64] sm:$0xf]  ;;  %v916_v19 = vld [vmem:[%s4383_s5 + $0x68] sm:$0x1]  ;;  %v3658_v20 = vrot.slane %v914_v17, 9  ;;  %v992_v22 = vsel %vm4385_vm2, %v3650_v12, %v991_v15  ;;  %v993_v23 = vrot.slane %v991_v15, 4 }
  0x1f   : > { %v2036_v13 = vsel %vm4385_vm2, %v3842_v6, %v2035_v7  ;;  %v2037_v14 = vrot.slane %v2035_v7, 4  ;;  %v1047_v24 = vrot.slane %v915_v18, 5  ;;  %v342_v25 = vld [vmem:[%s4383_s5] sm:$0xf]  ;;  %v343_v26 = vld [vmem:[%s4383_s5 + $0x4] sm:$0xf] }
  0x20   : > { %v1050_v28 = vrot.slane %v916_v19, 5  ;;  %v344_v29 = vld [vmem:[%s4383_s5 + $0x8] sm:$0x1]  ;;  %v394_v30 = vshrl.u32 %v342_v25, 16  ;;  %v397_v31 = vshll.u32 %v342_v25, 16  ;;  %v995_v32 = vsel %vm4385_vm2, %v993_v23, %v994_v16 }
  0x21   : > { %v2039_v21 = vsel %vm4385_vm2, %v2037_v14, %v2038_v8  ;;  %v1048_v33 = vsel %vm4385_vm2, %v3658_v20, %v1047_v24  ;;  %v1049_v34 = vrot.slane %v1047_v24, 4  ;;  %v403_v35 = vshll.u32 %v343_v26, 16  ;;  %v3818_v36 = vld [vmem:[%s4383_s5 + $0x6c] sm:$0xe]  ;;  %v3819_v37 = vld [vmem:[%s4383_s5 + $0x70] sm:$0xf] }
  0x22   : > { %v3858_v27 = vcombine.low %v2036_v13, %v2039_v21  ;;  %v3666_v38 = vcombine.low %v992_v22, %v995_v32  ;;  %v396_v39 = vrot.slane %v394_v30, 4  ;;  %v399_v40 = vrot.slane %v397_v31, 5  ;;  %v3820_v42 = vld [vmem:[%s4383_s5 + $0x74] sm:$0x1]  ;;  %v366_v47 = vld [vmem:[%s4383_s5 + $0x60] sm:$0xf] }
  0x23   : > { %v407_v41 = vshrl.u32 %v343_v26, 16  ;;  %v1051_v43 = vsel %vm4385_vm2, %v1049_v34, %v1050_v28  ;;  %v405_v44 = vrot.slane %v403_v35, 5  ;;  %v413_v45 = vshll.u32 %v344_v29, 16  ;;  %v367_v52 = vld [vmem:[%s4383_s5 + $0x64] sm:$0xf] }
  0x24   : > { %2193 = vrot.lane.b32.xlu0 %v3858_v27, %s4295_s7  ;;  %v3850_v46 = vrot.slane %v3818_v36, 9  ;;  %1149 = vrot.lane.b32.xlu1 %v3666_v38, %s4296_s8  ;;  %v3674_v48 = vcombine.low %v1048_v33, %v1051_v43  ;;  %v400_v49 = vor.u32 %v399_v40, %v396_v39  ;;  %v2091_v51 = vrot.slane %v3819_v37, 5  ;;  %v368_v56 = vld [vmem:[%s4383_s5 + $0x68] sm:$0x1]  ;;  %v3754_v63 = vld [vmem:[%s4383_s5 + $0x6c] sm:$0xf] }
  0x25   : > { %v409_v50 = vrot.slane %v407_v41, 4  ;;  %v415_v54 = vrot.slane %v413_v45, 5  ;;  %v2094_v55 = vrot.slane %v3820_v42, 5  ;;  %v586_v57 = vshrl.u32 %v366_v47, 16  ;;  %v3755_v5 = vld [vmem:[%s4383_s5 + $0x70] sm:$0xf] }
  0x26   : > { %v589_v58 = vshll.u32 %v366_v47, 16  ;;  %v401_v59 = vrot.slane %v400_v49, 4  ;;  %v2092_v61 = vsel %vm4385_vm2, %v3850_v46, %v2091_v51  ;;  %v2093_v62 = vrot.slane %v2091_v51, 4  ;;  %v3756_v10 = vld [vmem:[%s4383_s5 + $0x74] sm:$0x1] }
  0x27   : > { %v410_v60 = vor.u32 %v409_v50, %v405_v44  ;;  %v588_v1 = vrot.slane %v586_v57, 4  ;;  %v595_v3 = vshll.u32 %v367_v52, 16  ;;  %v599_v4 = vshrl.u32 %v367_v52, 16  ;;  %v3730_v11 = vld [vmem:[%s4383_s5 + $0xc] sm:$0xf] }
  0x28   : > { %v591_v2 = vrot.slane %v589_v58, 5  ;;  %1165 = vrot.lane.b32.xlu1 %v3674_v48, %s4296_s8  ;;  %v406_v6 = vsel %vm4426_vm5, %v401_v59, %v405_v44  ;;  %v2095_v8 = vsel %vm4385_vm2, %v2093_v62, %v2094_v55  ;;  %v605_v9 = vshll.u32 %v368_v56, 16  ;;  %v3731_v28 = vld [vmem:[%s4383_s5 + $0x10] sm:$0xf]  ;;  %v3732_v32 = vld [vmem:[%s4383_s5 + $0x14] sm:$0x1] }
  0x29   : > { %v411_v7 = vrot.slane %v410_v60, 4  ;;  %v3866_v12 = vcombine.low %v2092_v61, %v2095_v8  ;;  %v597_v14 = vrot.slane %v595_v3, 5  ;;  %v601_v15 = vrot.slane %v599_v4, 4  ;;  %v3946_v38 = vld [vmem:[%s4383_s5 + $0x78] sm:$0xf] }
  0x2a   : > { %v592_v13 = vor.u32 %v591_v2, %v588_v1  ;;  %v607_v17 = vrot.slane %v605_v9, 5  ;;  %v1633_v18 = vshrl.u32 %v3754_v63, 16  ;;  %v1636_v19 = vshll.u32 %v3754_v63, 16  ;;  %v3947_v47 = vld [vmem:[%s4383_s5 + $0x7c] sm:$0xf] }
  0x2b   : > { %v416_v16 = vsel %vm4426_vm5, %v411_v7, %v415_v54  ;;  %v602_v22 = vor.u32 %v601_v15, %v597_v14  ;;  %v1642_v23 = vshll.u32 %v3755_v5, 16  ;;  %v1646_v26 = vshrl.u32 %v3755_v5, 16  ;;  %v3948_v56 = vld [vmem:[%s4383_s5 + $0x80] sm:$0x1]  ;;  %v3922_v62 = vld [vmem:[%s4383_s5 + $0x18] sm:$0xf] }
  0x2c   : > { %v3634_v20 = vcombine.low %v406_v6, %v416_v16  ;;  %v593_v21 = vrot.slane %v592_v13, 4  ;;  %2209 = vrot.lane.b32.xlu1 %v3866_v12, %s4295_s7  ;;  %v1635_v24 = vrot.slane %v1633_v18, 4  ;;  %v1638_v25 = vrot.slane %v1636_v19, 5  ;;  %v3923_v4 = vld [vmem:[%s4383_s5 + $0x1c] sm:$0xf] }
  0x2d   : > { %v1652_v27 = vshll.u32 %v3756_v10, 16  ;;  %v603_v30 = vrot.slane %v602_v22, 4  ;;  %v1644_v31 = vrot.slane %v1642_v23, 5  ;;  %v1441_v33 = vshrl.u32 %v3730_v11, 16  ;;  %v3924_v12 = vld [vmem:[%s4383_s5 + $0x20] sm:$0x1] }
  0x2e   : > { %825 = vrot.lane.b32.xlu0 %v3634_v20, %s4297_s9  ;;  %v598_v29 = vsel %vm4426_vm5, %v593_v21, %v597_v14  ;;  %v1639_v34 = vor.u32 %v1638_v25, %v1635_v24  ;;  %v1648_v35 = vrot.slane %v1646_v26, 4  ;;  %v1444_v37 = vshll.u32 %v3730_v11, 16  ;;  %v4010_v14 = vld [vmem:[%s4383_s5 + $0x78] sm:$0xe]  ;;  %v4011_v20 = vld [vmem:[%s4383_s5 + $0x7c] sm:$0xf] }
  0x2f   : > { %v1654_v36 = vrot.slane %v1652_v27, 5  ;;  %v608_v39 = vsel %vm4426_vm5, %v603_v30, %v607_v17  ;;  %v1443_v40 = vrot.slane %v1441_v33, 4  ;;  %v1450_v41 = vshll.u32 %v3731_v28, 16  ;;  %v4182_v16 = vld [vmem:[%s4383_s5 + $0x78] sm:$0xff]   ;;  %v4012_v25 = vld [vmem:[%s4383_s5 + $0x80] sm:$0x1] }
  0x30   : > { %v1454_v42 = vshrl.u32 %v3731_v28, 16  ;;  %v3642_v43 = vcombine.low %v598_v29, %v608_v39  ;;  %v1640_v44 = vrot.slane %v1639_v34, 4  ;;  %v1649_v45 = vor.u32 %v1648_v35, %v1644_v31  ;;  %v3986_v26 = vld [vmem:[%s4383_s5 + $0x18] sm:$0xe] }
  0x31   : > { %v1446_v46 = vrot.slane %v1444_v37, 5  ;;  %v1452_v48 = vrot.slane %v1450_v41, 5  ;;  %v1460_v50 = vshll.u32 %v3732_v32, 16  ;;  %v2677_v51 = vshrl.u32 %v3946_v38, 16  ;;  %v4183_v32 = vld [vmem:[%s4383_s5 + $0x18] sm:$0xff]  }
  0x32   : > { %v1456_v49 = vrot.slane %v1454_v42, 4  ;;  %841 = vrot.lane.b32.xlu0 %v3642_v43, %s4297_s9  ;;  %v1645_v52 = vsel %vm4426_vm5, %v1640_v44, %v1644_v31  ;;  %v1650_v54 = vrot.slane %v1649_v45, 4  ;;  %v2680_v57 = vshll.u32 %v3946_v38, 16  ;;  %v3987_v31 = vld [vmem:[%s4383_s5 + $0x1c] sm:$0xf] }
  0x33   : > { %v1447_v55 = vor.u32 %v1446_v46, %v1443_v40  ;;  %v1462_v59 = vrot.slane %v1460_v50, 5  ;;  %v2679_v60 = vrot.slane %v2677_v51, 4  ;;  %v2686_v61 = vshll.u32 %v3947_v47, 16  ;;  %v3988_v37 = vld [vmem:[%s4383_s5 + $0x20] sm:$0x1] }
  0x34   : > { %v1457_v58 = vor.u32 %v1456_v49, %v1452_v48  ;;  %v1655_v63 = vsel %vm4426_vm5, %v1650_v54, %v1654_v36  ;;  %v2682_v2 = vrot.slane %v2680_v57, 5  ;;  %v2690_v3 = vshrl.u32 %v3947_v47, 16  ;;  %v369_v42 = vld [vmem:[%s4383_s5 + $0x6c] sm:$0xf]  ;;  %v370_v47 = vld [vmem:[%s4383_s5 + $0x70] sm:$0xf] }
  0x35   : > { %v1448_v1 = vrot.slane %v1447_v55, 4  ;;  %v3786_v5 = vcombine.low %v1645_v52, %v1655_v63  ;;  %v2688_v7 = vrot.slane %v2686_v61, 5  ;;  %v2696_v8 = vshll.u32 %v3948_v56, 16  ;;  %v345_v54 = vld [vmem:[%s4383_s5 + $0xc] sm:$0xf] }
  0x36   : > { %v1458_v6 = vrot.slane %v1457_v58, 4  ;;  %v2683_v10 = vor.u32 %v2682_v2, %v2679_v60  ;;  %v2692_v11 = vrot.slane %v2690_v3, 4  ;;  %v2485_v13 = vshrl.u32 %v3922_v62, 16 }
  0x37   : > { %v1453_v9 = vsel %vm4426_vm5, %v1448_v1, %v1452_v48  ;;  %1888 = vrot.lane.b32.xlu1 %v3786_v5, %s4298_s10  ;;  %v2698_v17 = vrot.slane %v2696_v8, 5  ;;  %v2488_v18 = vshll.u32 %v3922_v62, 16  ;;  %v2494_v19 = vshll.u32 %v3923_v4, 16  ;;  %v371_v48 = vld [vmem:[%s4383_s5 + $0x74] sm:$0x1] }
  0x38   : > { %v1463_v15 = vsel %vm4426_vm5, %v1458_v6, %v1462_v59  ;;  %v2684_v22 = vrot.slane %v2683_v10, 4  ;;  %v2693_v23 = vor.u32 %v2692_v11, %v2688_v7  ;;  %v2487_v24 = vrot.slane %v2485_v13, 4  ;;  %v347_v8 = vld [vmem:[%s4383_s5 + $0x14] sm:$0x1] }
  0x39   : > { %v3778_v21 = vcombine.low %v1453_v9, %v1463_v15  ;;  %v2490_v27 = vrot.slane %v2488_v18, 5  ;;  %v2496_v28 = vrot.slane %v2494_v19, 5  ;;  %v2498_v29 = vshrl.u32 %v3923_v4, 16  ;;  %v346_v4 = vld [vmem:[%s4383_s5 + $0x10] sm:$0xf] }
  0x3a   : > { %v2504_v30 = vshll.u32 %v3924_v12, 16  ;;  %v2689_v33 = vsel %vm4426_vm5, %v2684_v22, %v2688_v7  ;;  %v2694_v34 = vrot.slane %v2693_v23, 4  ;;  %v4042_v35 = vrot.slane %v4010_v14, 9  ;;  %v917_v14 = vld [vmem:[%s4383_s5 + $0x6c] sm:$0xe] }
  0x3b   : > { %1872 = vrot.lane.b32.xlu0 %v3778_v21, %s4298_s10  ;;  %v3135_v36 = vrot.slane %v4011_v20, 5  ;;  %2387 = vrot.lane.b32.xlu1 %v4182_v16, %s4299_s11  ;;  %v2491_v38 = vor.u32 %v2490_v27, %v2487_v24  ;;  %v2500_v39 = vrot.slane %v2498_v29, 4  ;;  %v3138_v41 = vrot.slane %v4012_v25, 5  ;;  %v918_v15 = vld [vmem:[%s4383_s5 + $0x70] sm:$0xf] }
  0x3c   : > { %v2506_v40 = vrot.slane %v2504_v30, 5  ;;  %v2699_v43 = vsel %vm4426_vm5, %v2694_v34, %v2698_v17  ;;  %v4034_v46 = vrot.slane %v3986_v26, 9  ;;  %v3079_v52 = vrot.slane %v3987_v31, 5  ;;  %v919_v20 = vld [vmem:[%s4383_s5 + $0x74] sm:$0x1] }
  0x3d   : > { %v3136_v44 = vsel %vm4385_vm2, %v4042_v35, %v3135_v36  ;;  %v3137_v45 = vrot.slane %v3135_v36, 4  ;;  %v3978_v49 = vcombine.low %v2689_v33, %v2699_v43  ;;  %v2492_v50 = vrot.slane %v2491_v38, 4  ;;  %v893_v21 = vld [vmem:[%s4383_s5 + $0xc] sm:$0xe]  ;;  %v894_v26 = vld [vmem:[%s4383_s5 + $0x10] sm:$0xf] }
  0x3e   : > { %v2501_v51 = vor.u32 %v2500_v39, %v2496_v28  ;;  %v3082_v56 = vrot.slane %v3988_v37, 5  ;;  %v610_v57 = vshrl.u32 %v369_v42, 16  ;;  %v613_v58 = vshll.u32 %v369_v42, 16  ;;  %v895_v31 = vld [vmem:[%s4383_s5 + $0x14] sm:$0x1] }
  0x3f   : > { %2371 = vrot.lane.b32.xlu0 %v4183_v32, %s4299_s11  ;;  %v3139_v55 = vsel %vm4385_vm2, %v3137_v45, %v3138_v41  ;;  %2932 = vrot.lane.b32.xlu1 %v3978_v49, %s4300_s12  ;;  %v2497_v59 = vsel %vm4426_vm5, %v2492_v50, %v2496_v28  ;;  %v3080_v62 = vsel %vm4385_vm2, %v4034_v46, %v3079_v52  ;;  %v3081_v63 = vrot.slane %v3079_v52, 4  ;;  %v3757_v36 = vld [vmem:[%s4383_s5 + $0x78] sm:$0xf]  ;;  %v3758_v45 = vld [vmem:[%s4383_s5 + $0x7c] sm:$0xf] }
  0x40   : > { %v2502_v60 = vrot.slane %v2501_v51, 4  ;;  %v4058_v61 = vcombine.low %v3136_v44, %v3139_v55  ;;  %v612_v1 = vrot.slane %v610_v57, 4  ;;  %v615_v2 = vrot.slane %v613_v58, 5  ;;  %v3759_v46 = vld [vmem:[%s4383_s5 + $0x80] sm:$0x1] }
  0x41   : > { %v619_v3 = vshll.u32 %v370_v47, 16  ;;  %v623_v6 = vshrl.u32 %v370_v47, 16  ;;  %v629_v7 = vshll.u32 %v371_v48, 16  ;;  %v418_v9 = vshrl.u32 %v345_v54, 16  ;;  %v3733_v51 = vld [vmem:[%s4383_s5 + $0x18] sm:$0xf] }
  0x42   : > { %v2507_v5 = vsel %vm4426_vm5, %v2502_v60, %v2506_v40  ;;  %v3083_v11 = vsel %vm4385_vm2, %v3081_v63, %v3082_v56  ;;  %v616_v12 = vor.u32 %v615_v2, %v612_v1  ;;  %v421_v23 = vshll.u32 %v345_v54, 16  ;;  %v3734_v2 = vld [vmem:[%s4383_s5 + $0x1c] sm:$0xf] }
  0x43   : > { %v3970_v10 = vcombine.low %v2497_v59, %v2507_v5  ;;  %v621_v13 = vrot.slane %v619_v3, 5  ;;  %3253 = vrot.lane.b32.xlu1 %v4058_v61, %s4301_s13  ;;  %v4050_v16 = vcombine.low %v3080_v62, %v3083_v11  ;;  %v625_v17 = vrot.slane %v623_v6, 4 }
  0x44   : > { %v631_v18 = vrot.slane %v629_v7, 5  ;;  %v420_v19 = vrot.slane %v418_v9, 4  ;;  %v617_v22 = vrot.slane %v616_v12, 4  ;;  %v427_v24 = vshll.u32 %v346_v4, 16  ;;  %v3735_v7 = vld [vmem:[%s4383_s5 + $0x20] sm:$0x1] }
  0x45   : > { %2916 = vrot.lane.b32.xlu0 %v3970_v10, %s4300_s12  ;;  %v431_v25 = vshrl.u32 %v346_v4, 16  ;;  %v626_v27 = vor.u32 %v625_v17, %v621_v13  ;;  %v437_v28 = vshll.u32 %v347_v8, 16  ;;  %v3659_v29 = vrot.slane %v917_v14, 9  ;;  %v3821_v8 = vld [vmem:[%s4383_s5 + $0x78] sm:$0xe] }
  0x46   : > { %v1054_v30 = vrot.slane %v918_v15, 5  ;;  %v622_v32 = vsel %vm4426_vm5, %v617_v22, %v621_v13  ;;  %v423_v33 = vrot.slane %v421_v23, 5  ;;  %v429_v34 = vrot.slane %v427_v24, 5  ;;  %v3822_v13 = vld [vmem:[%s4383_s5 + $0x7c] sm:$0xf] }
  0x47   : > { %v433_v35 = vrot.slane %v431_v25, 4  ;;  %v627_v37 = vrot.slane %v626_v27, 4  ;;  %v439_v38 = vrot.slane %v437_v28, 5  ;;  %v1057_v43 = vrot.slane %v919_v20, 5  ;;  %v3797_v24 = vld [vmem:[%s4383_s5 + $0x18] sm:$0xe] }
  0x48   : > { %v1055_v39 = vsel %vm4385_vm2, %v3659_v29, %v1054_v30  ;;  %v1056_v40 = vrot.slane %v1054_v30, 4  ;;  %v424_v41 = vor.u32 %v423_v33, %v420_v19  ;;  %v3651_v44 = vrot.slane %v893_v21, 9  ;;  %v4184_v19 = vld [vmem:[%s4383_s5 + $0x78] sm:$0xff]  }
  0x49   : > { %3237 = vrot.lane.b32.xlu0 %v4050_v16, %s4301_s13  ;;  %v434_v42 = vor.u32 %v433_v35, %v429_v34  ;;  %v632_v47 = vsel %vm4426_vm5, %v627_v37, %v631_v18  ;;  %v998_v48 = vrot.slane %v894_v26, 5  ;;  %v1001_v49 = vrot.slane %v895_v31, 5  ;;  %v3823_v18 = vld [vmem:[%s4383_s5 + $0x80] sm:$0x1]  ;;  %v3798_v29 = vld [vmem:[%s4383_s5 + $0x1c] sm:$0xf] }
  0x4a   : > { %v1657_v50 = vshrl.u32 %v3757_v36, 16  ;;  %v3643_v52 = vcombine.low %v622_v32, %v632_v47  ;;  %v425_v54 = vrot.slane %v424_v41, 4  ;;  %v1058_v56 = vsel %vm4385_vm2, %v1056_v40, %v1057_v43  ;;  %v4185_v35 = vld [vmem:[%s4383_s5 + $0x18] sm:$0xff]   ;;  %v3949_v40 = vld [vmem:[%s4383_s5 + $0x84] sm:$0xf] }
  0x4b   : > { %v435_v55 = vrot.slane %v434_v42, 4  ;;  %v3675_v57 = vcombine.low %v1055_v39, %v1058_v56  ;;  %v999_v58 = vsel %vm4385_vm2, %v3651_v44, %v998_v48  ;;  %v1000_v59 = vrot.slane %v998_v48, 4 }
  0x4c   : > { %v1659_v60 = vrot.slane %v1657_v50, 4  ;;  %843 = vrot.lane.b32.xlu1 %v3643_v52, %s4297_s9  ;;  %v430_v61 = vsel %vm4426_vm5, %v425_v54, %v429_v34  ;;  %v1660_v63 = vshll.u32 %v3757_v36, 16  ;;  %v1666_v1 = vshll.u32 %v3758_v45, 16  ;;  %v3799_v34 = vld [vmem:[%s4383_s5 + $0x20] sm:$0x1] }
  0x4d   : > { %v440_v62 = vsel %vm4426_vm5, %v435_v55, %v439_v38  ;;  %v1002_v4 = vsel %vm4385_vm2, %v1000_v59, %v1001_v49  ;;  %v1670_v5 = vshrl.u32 %v3758_v45, 16  ;;  %v1676_v6 = vshll.u32 %v3759_v46, 16  ;;  %v3950_v49 = vld [vmem:[%s4383_s5 + $0x88] sm:$0xf]  ;;  %v3951_v54 = vld [vmem:[%s4383_s5 + $0x8c] sm:$0x1] }
  0x4e   : > { %v3635_v3 = vcombine.low %v430_v61, %v440_v62  ;;  %v3667_v9 = vcombine.low %v999_v58, %v1002_v4  ;;  %v1662_v10 = vrot.slane %v1660_v63, 5  ;;  %v1668_v11 = vrot.slane %v1666_v1, 5  ;;  %v3926_v61 = vld [vmem:[%s4383_s5 + $0x28] sm:$0xf] }
  0x4f   : > { %v1465_v12 = vshrl.u32 %v3733_v51, 16  ;;  %v1672_v14 = vrot.slane %v1670_v5, 4  ;;  %v1678_v15 = vrot.slane %v1676_v6, 5  ;;  %v1468_v16 = vshll.u32 %v3733_v51, 16 }
  0x50   : > { %827 = vrot.lane.b32.xlu0 %v3635_v3, %s4297_s9  ;;  %v1474_v17 = vshll.u32 %v3734_v2, 16  ;;  %1167 = vrot.lane.b32.xlu1 %v3675_v57, %s4296_s8  ;;  %v1663_v20 = vor.u32 %v1662_v10, %v1659_v60  ;;  %v1478_v22 = vshrl.u32 %v3734_v2, 16  ;;  %v1484_v23 = vshll.u32 %v3735_v7, 16  ;;  %v3925_v60 = vld [vmem:[%s4383_s5 + $0x24] sm:$0xf] }
  0x51   : > { %v1467_v21 = vrot.slane %v1465_v12, 4  ;;  %v1673_v25 = vor.u32 %v1672_v14, %v1668_v11  ;;  %v1470_v26 = vrot.slane %v1468_v16, 5  ;;  %v3851_v28 = vrot.slane %v3821_v8, 9  ;;  %v3927_v3 = vld [vmem:[%s4383_s5 + $0x2c] sm:$0x1] }
  0x52   : > { %v1476_v27 = vrot.slane %v1474_v17, 5  ;;  %v1664_v30 = vrot.slane %v1663_v20, 4  ;;  %v1480_v31 = vrot.slane %v1478_v22, 4  ;;  %v1486_v32 = vrot.slane %v1484_v23, 5  ;;  %v4013_v8 = vld [vmem:[%s4383_s5 + $0x84] sm:$0xe] }
  0x53   : > { %v2098_v33 = vrot.slane %v3822_v13, 5  ;;  %v1674_v36 = vrot.slane %v1673_v25, 4  ;;  %v1471_v37 = vor.u32 %v1470_v26, %v1467_v21  ;;  %v2101_v38 = vrot.slane %v3823_v18, 5  ;;  %v4015_v14 = vld [vmem:[%s4383_s5 + $0x8c] sm:$0x1]  ;;  %v4186_v20 = vld [vmem:[%s4383_s5 + $0x84] sm:$0xff]  }
  0x54   : > { %1151 = vrot.lane.b32.xlu0 %v3667_v9, %s4296_s8  ;;  %v3843_v39 = vrot.slane %v3797_v24, 9  ;;  %1345 = vrot.lane.b32.xlu1 %v4184_v19, %s4294_s6  ;;  %v1669_v41 = vsel %vm4426_vm5, %v1664_v30, %v1668_v11  ;;  %v1481_v42 = vor.u32 %v1480_v31, %v1476_v27  ;;  %v2042_v47 = vrot.slane %v3798_v29, 5  ;;  %v4014_v9 = vld [vmem:[%s4383_s5 + $0x88] sm:$0xf]  ;;  %v3989_v19 = vld [vmem:[%s4383_s5 + $0x24] sm:$0xe] }
  0x55   : > { %v2099_v43 = vsel %vm4385_vm2, %v3851_v28, %v2098_v33  ;;  %v2100_v44 = vrot.slane %v2098_v33, 4  ;;  %v1679_v45 = vsel %vm4426_vm5, %v1674_v36, %v1678_v15  ;;  %v1472_v46 = vrot.slane %v1471_v37, 4  ;;  %v3990_v25 = vld [vmem:[%s4383_s5 + $0x28] sm:$0xf]  ;;  %v3991_v26 = vld [vmem:[%s4383_s5 + $0x2c] sm:$0x1] }
  0x56   : > { %v2045_v48 = vrot.slane %v3799_v34, 5  ;;  %v3787_v50 = vcombine.low %v1669_v41, %v1679_v45  ;;  %v1482_v51 = vrot.slane %v1481_v42, 4  ;;  %v2701_v55 = vshrl.u32 %v3949_v40, 16  ;;  %v372_v31 = vld [vmem:[%s4383_s5 + $0x78] sm:$0xf]  ;;  %v4187_v36 = vld [vmem:[%s4383_s5 + $0x24] sm:$0xff]  }
  0x57   : > { %v2102_v52 = vsel %vm4385_vm2, %v2100_v44, %v2101_v38  ;;  %v1477_v56 = vsel %vm4426_vm5, %v1472_v46, %v1476_v27  ;;  %v2043_v58 = vsel %vm4385_vm2, %v3843_v39, %v2042_v47  ;;  %v2044_v59 = vrot.slane %v2042_v47, 4 }
  0x58   : > { %1329 = vrot.lane.b32.xlu0 %v4185_v35, %s4294_s6  ;;  %v3867_v57 = vcombine.low %v2099_v43, %v2102_v52  ;;  %1890 = vrot.lane.b32.xlu1 %v3787_v50, %s4298_s10  ;;  %v1487_v62 = vsel %vm4426_vm5, %v1482_v51, %v1486_v32  ;;  %v2703_v63 = vrot.slane %v2701_v55, 4  ;;  %v2704_v1 = vshll.u32 %v3949_v40, 16 }
  0x59   : > { %v2710_v2 = vshll.u32 %v3950_v49, 16  ;;  %v3779_v4 = vcombine.low %v1477_v56, %v1487_v62  ;;  %v2046_v5 = vsel %vm4385_vm2, %v2044_v59, %v2045_v48  ;;  %v2714_v6 = vshrl.u32 %v3950_v49, 16  ;;  %v373_v49 = vld [vmem:[%s4383_s5 + $0x7c] sm:$0xf] }
  0x5a   : > { %v2720_v7 = vshll.u32 %v3951_v54, 16  ;;  %v3859_v10 = vcombine.low %v2043_v58, %v2046_v5  ;;  %v2706_v11 = vrot.slane %v2704_v1, 5  ;;  %v2509_v13 = vshrl.u32 %v3925_v60, 16  ;;  %v374_v54 = vld [vmem:[%s4383_s5 + $0x80] sm:$0x1] }
  0x5b   : > { %v2712_v12 = vrot.slane %v2710_v2, 5  ;;  %v2716_v15 = vrot.slane %v2714_v6, 4  ;;  %v2512_v17 = vshll.u32 %v3925_v60, 16  ;;  %v2518_v18 = vshll.u32 %v3926_v61, 16  ;;  %v348_v60 = vld [vmem:[%s4383_s5 + $0x18] sm:$0xf] }
  0x5c   : > { %1874 = vrot.lane.b32.xlu0 %v3779_v4, %s4298_s10  ;;  %v2722_v16 = vrot.slane %v2720_v7, 5  ;;  %2211 = vrot.lane.b32.xlu1 %v3867_v57, %s4295_s7  ;;  %v2707_v21 = vor.u32 %v2706_v11, %v2703_v63  ;;  %v2511_v22 = vrot.slane %v2509_v13, 4  ;;  %v2522_v23 = vshrl.u32 %v3926_v61, 16  ;;  %v349_v61 = vld [vmem:[%s4383_s5 + $0x1c] sm:$0xf] }
  0x5d   : > { %v2528_v24 = vshll.u32 %v3927_v3, 16  ;;  %v2717_v27 = vor.u32 %v2716_v15, %v2712_v12  ;;  %v2514_v28 = vrot.slane %v2512_v17, 5  ;;  %v2520_v29 = vrot.slane %v2518_v18, 5  ;;  %v350_v3 = vld [vmem:[%s4383_s5 + $0x20] sm:$0x1] }
  0x5e   : > { %v4043_v30 = vrot.slane %v4013_v8, 9  ;;  %v2708_v32 = vrot.slane %v2707_v21, 4  ;;  %v2524_v33 = vrot.slane %v2522_v23, 4  ;;  %v3142_v35 = vrot.slane %v4014_v9, 5  ;;  %v920_v8 = vld [vmem:[%s4383_s5 + $0x78] sm:$0xe] }
  0x5f   : > { %v2530_v34 = vrot.slane %v2528_v24, 5  ;;  %v2718_v37 = vrot.slane %v2717_v27, 4  ;;  %v2515_v38 = vor.u32 %v2514_v28, %v2511_v22  ;;  %v3145_v39 = vrot.slane %v4015_v14, 5  ;;  %v921_v9 = vld [vmem:[%s4383_s5 + $0x7c] sm:$0xf] }
  0x60   : > { %2195 = vrot.lane.b32.xlu0 %v3859_v10, %s4295_s7  ;;  %v4035_v40 = vrot.slane %v3989_v19, 9  ;;  %2389 = vrot.lane.b32.xlu1 %v4186_v20, %s4299_s11  ;;  %v2713_v41 = vsel %vm4426_vm5, %v2708_v32, %v2712_v12  ;;  %v2525_v42 = vor.u32 %v2524_v33, %v2520_v29  ;;  %v3143_v43 = vsel %vm4385_vm2, %v4043_v30, %v3142_v35  ;;  %v922_v14 = vld [vmem:[%s4383_s5 + $0x80] sm:$0x1]  ;;  %v896_v19 = vld [vmem:[%s4383_s5 + $0x18] sm:$0xe] }
  0x61   : > { %v3144_v44 = vrot.slane %v3142_v35, 4  ;;  %v2723_v45 = vsel %vm4426_vm5, %v2718_v37, %v2722_v16  ;;  %v2516_v46 = vrot.slane %v2515_v38, 4  ;;  %v3086_v47 = vrot.slane %v3990_v25, 5  ;;  %v897_v24 = vld [vmem:[%s4383_s5 + $0x1c] sm:$0xf] }
  0x62   : > { %v3089_v48 = vrot.slane %v3991_v26, 5  ;;  %v3979_v50 = vcombine.low %v2713_v41, %v2723_v45  ;;  %v2526_v51 = vrot.slane %v2525_v42, 4  ;;  %v634_v55 = vshrl.u32 %v372_v31, 16  ;;  %v898_v25 = vld [vmem:[%s4383_s5 + $0x20] sm:$0x1] }
  0x63   : > { %v3146_v52 = vsel %vm4385_vm2, %v3144_v44, %v3145_v39  ;;  %v2521_v56 = vsel %vm4426_vm5, %v2516_v46, %v2520_v29  ;;  %v3087_v58 = vsel %vm4385_vm2, %v4035_v40, %v3086_v47  ;;  %v3088_v59 = vrot.slane %v3086_v47, 4  ;;  %v3760_v30 = vld [vmem:[%s4383_s5 + $0x84] sm:$0xf]  ;;  %v3761_v47 = vld [vmem:[%s4383_s5 + $0x88] sm:$0xf] }
  0x64   : > { %2373 = vrot.lane.b32.xlu0 %v4187_v36, %s4299_s11  ;;  %v4059_v57 = vcombine.low %v3143_v43, %v3146_v52  ;;  %2934 = vrot.lane.b32.xlu1 %v3979_v50, %s4300_s12  ;;  %v2531_v62 = vsel %vm4426_vm5, %v2526_v51, %v2530_v34  ;;  %v636_v63 = vrot.slane %v634_v55, 4  ;;  %v637_v1 = vshll.u32 %v372_v31, 16  ;;  %v3762_v51 = vld [vmem:[%s4383_s5 + $0x8c] sm:$0x1] }
  0x65   : > { %v643_v2 = vshll.u32 %v373_v49, 16  ;;  %v3971_v4 = vcombine.low %v2521_v56, %v2531_v62  ;;  %v3090_v5 = vsel %vm4385_vm2, %v3088_v59, %v3089_v48  ;;  %v647_v6 = vshrl.u32 %v373_v49, 16 }
  0x66   : > { %v653_v7 = vshll.u32 %v374_v54, 16  ;;  %v4051_v10 = vcombine.low %v3087_v58, %v3090_v5  ;;  %v639_v11 = vrot.slane %v637_v1, 5  ;;  %v442_v13 = vshrl.u32 %v348_v60, 16  ;;  %v3736_v58 = vld [vmem:[%s4383_s5 + $0x24] sm:$0xf] }
  0x67   : > { %v645_v12 = vrot.slane %v643_v2, 5  ;;  %v649_v15 = vrot.slane %v647_v6, 4  ;;  %v445_v17 = vshll.u32 %v348_v60, 16  ;;  %v451_v18 = vshll.u32 %v349_v61, 16  ;;  %v3738_v5 = vld [vmem:[%s4383_s5 + $0x2c] sm:$0x1] }
  0x68   : > { %2918 = vrot.lane.b32.xlu0 %v3971_v4, %s4300_s12  ;;  %v655_v16 = vrot.slane %v653_v7, 5  ;;  %3255 = vrot.lane.b32.xlu1 %v4059_v57, %s4301_s13  ;;  %v640_v20 = vor.u32 %v639_v11, %v636_v63  ;;  %v444_v21 = vrot.slane %v442_v13, 4  ;;  %v455_v22 = vshrl.u32 %v349_v61, 16  ;;  %v3737_v63 = vld [vmem:[%s4383_s5 + $0x28] sm:$0xf] }
  0x69   : > { %v461_v23 = vshll.u32 %v350_v3, 16  ;;  %v650_v26 = vor.u32 %v649_v15, %v645_v12  ;;  %v447_v27 = vrot.slane %v445_v17, 5  ;;  %v453_v28 = vrot.slane %v451_v18, 5  ;;  %v3824_v6 = vld [vmem:[%s4383_s5 + $0x84] sm:$0xe] }
  0x6a   : > { %v3660_v29 = vrot.slane %v920_v8, 9  ;;  %v641_v31 = vrot.slane %v640_v20, 4  ;;  %v457_v32 = vrot.slane %v455_v22, 4  ;;  %v1061_v34 = vrot.slane %v921_v9, 5  ;;  %v3825_v11 = vld [vmem:[%s4383_s5 + $0x88] sm:$0xf] }
  0x6b   : > { %v463_v33 = vrot.slane %v461_v23, 5  ;;  %v651_v35 = vrot.slane %v650_v26, 4  ;;  %v448_v36 = vor.u32 %v447_v27, %v444_v21  ;;  %v1064_v37 = vrot.slane %v922_v14, 5  ;;  %v4188_v17 = vld [vmem:[%s4383_s5 + $0x84] sm:$0xff]  }
  0x6c   : > { %3239 = vrot.lane.b32.xlu0 %v4051_v10, %s4301_s13  ;;  %v3652_v38 = vrot.slane %v896_v19, 9  ;;  %v646_v39 = vsel %vm4426_vm5, %v641_v31, %v645_v12  ;;  %v458_v40 = vor.u32 %v457_v32, %v453_v28  ;;  %v1062_v41 = vsel %vm4385_vm2, %v3660_v29, %v1061_v34  ;;  %v3800_v22 = vld [vmem:[%s4383_s5 + $0x24] sm:$0xe]  ;;  %v3801_v27 = vld [vmem:[%s4383_s5 + $0x28] sm:$0xf] }
  0x6d   : > { %v1063_v42 = vrot.slane %v1061_v34, 4  ;;  %v656_v43 = vsel %vm4426_vm5, %v651_v35, %v655_v16  ;;  %v449_v44 = vrot.slane %v448_v36, 4  ;;  %v1005_v45 = vrot.slane %v897_v24, 5  ;;  %v3826_v16 = vld [vmem:[%s4383_s5 + $0x8c] sm:$0x1] }
  0x6e   : > { %v1008_v46 = vrot.slane %v898_v25, 5  ;;  %v3644_v48 = vcombine.low %v646_v39, %v656_v43  ;;  %v459_v49 = vrot.slane %v458_v40, 4  ;;  %v1681_v52 = vshrl.u32 %v3760_v30, 16  ;;  %v3802_v32 = vld [vmem:[%s4383_s5 + $0x2c] sm:$0x1] }
  0x6f   : > { %v1065_v50 = vsel %vm4385_vm2, %v1063_v42, %v1064_v37  ;;  %v454_v54 = vsel %vm4426_vm5, %v449_v44, %v453_v28  ;;  %v1006_v56 = vsel %vm4385_vm2, %v3652_v38, %v1005_v45  ;;  %v1007_v57 = vrot.slane %v1005_v45, 4  ;;  %v3952_v38 = vld [vmem:[%s4383_s5 + $0x90] sm:$0xf] }
  0x70   : > { %v3676_v55 = vcombine.low %v1062_v41, %v1065_v50  ;;  %845 = vrot.lane.b32.xlu1 %v3644_v48, %s4297_s9  ;;  %v464_v59 = vsel %vm4426_vm5, %v459_v49, %v463_v33  ;;  %v1683_v60 = vrot.slane %v1681_v52, 4  ;;  %v1684_v61 = vshll.u32 %v3760_v30, 16  ;;  %v4189_v33 = vld [vmem:[%s4383_s5 + $0x24] sm:$0xff]  }
  0x71   : > { %v1690_v62 = vshll.u32 %v3761_v47, 16  ;;  %v3636_v1 = vcombine.low %v454_v54, %v464_v59  ;;  %v1009_v2 = vsel %vm4385_vm2, %v1007_v57, %v1008_v46  ;;  %v1694_v3 = vshrl.u32 %v3761_v47, 16  ;;  %v3953_v47 = vld [vmem:[%s4383_s5 + $0x94] sm:$0xf] }
  0x72   : > { %v1700_v4 = vshll.u32 %v3762_v51, 16  ;;  %v3668_v7 = vcombine.low %v1006_v56, %v1009_v2  ;;  %v1686_v8 = vrot.slane %v1684_v61, 5  ;;  %v1489_v10 = vshrl.u32 %v3736_v58, 16  ;;  %v3954_v51 = vld [vmem:[%s4383_s5 + $0x98] sm:$0x1] }
  0x73   : > { %v1692_v9 = vrot.slane %v1690_v62, 5  ;;  %829 = vrot.lane.b32.xlu0 %v3636_v1, %s4297_s9  ;;  %v1696_v12 = vrot.slane %v1694_v3, 4  ;;  %v1492_v14 = vshll.u32 %v3736_v58, 16  ;;  %v1498_v15 = vshll.u32 %v3737_v63, 16  ;;  %v3928_v58 = vld [vmem:[%s4383_s5 + $0x30] sm:$0xf] }
  0x74   : > { %v1702_v13 = vrot.slane %v1700_v4, 5  ;;  %1169 = vrot.lane.b32.xlu1 %v3676_v55, %s4296_s8  ;;  %v1687_v18 = vor.u32 %v1686_v8, %v1683_v60  ;;  %v1491_v19 = vrot.slane %v1489_v10, 4  ;;  %v1502_v20 = vshrl.u32 %v3737_v63, 16  ;;  %v3929_v59 = vld [vmem:[%s4383_s5 + $0x34] sm:$0xf] }
  0x75   : > { %v1508_v21 = vshll.u32 %v3738_v5, 16  ;;  %v1697_v23 = vor.u32 %v1696_v12, %v1692_v9  ;;  %v1494_v24 = vrot.slane %v1492_v14, 5  ;;  %v1500_v25 = vrot.slane %v1498_v15, 5  ;;  %v3930_v1 = vld [vmem:[%s4383_s5 + $0x38] sm:$0x1] }
  0x76   : > { %v3852_v26 = vrot.slane %v3824_v6, 9  ;;  %v1688_v28 = vrot.slane %v1687_v18, 4  ;;  %v1504_v29 = vrot.slane %v1502_v20, 4  ;;  %v2105_v31 = vrot.slane %v3825_v11, 5  ;;  %v4016_v6 = vld [vmem:[%s4383_s5 + $0x90] sm:$0xe] }
  0x77   : > { %v1510_v30 = vrot.slane %v1508_v21, 5  ;;  %1153 = vrot.lane.b32.xlu0 %v3668_v7, %s4296_s8  ;;  %v1698_v34 = vrot.slane %v1697_v23, 4  ;;  %v1495_v35 = vor.u32 %v1494_v24, %v1491_v19  ;;  %v2108_v36 = vrot.slane %v3826_v16, 5  ;;  %v4017_v7 = vld [vmem:[%s4383_s5 + $0x94] sm:$0xf] }
  0x78   : > { %v3844_v37 = vrot.slane %v3800_v22, 9  ;;  %1347 = vrot.lane.b32.xlu1 %v4188_v17, %s4294_s6  ;;  %v1693_v39 = vsel %vm4426_vm5, %v1688_v28, %v1692_v9  ;;  %v1505_v40 = vor.u32 %v1504_v29, %v1500_v25  ;;  %v2106_v41 = vsel %vm4385_vm2, %v3852_v26, %v2105_v31  ;;  %v4018_v12 = vld [vmem:[%s4383_s5 + $0x98] sm:$0x1]  ;;  %v4190_v18 = vld [vmem:[%s4383_s5 + $0x90] sm:$0xff]  }
  0x79   : > { %v2107_v42 = vrot.slane %v2105_v31, 4  ;;  %v1703_v43 = vsel %vm4426_vm5, %v1698_v34, %v1702_v13  ;;  %v1496_v44 = vrot.slane %v1495_v35, 4  ;;  %v2049_v45 = vrot.slane %v3801_v27, 5  ;;  %v3992_v13 = vld [vmem:[%s4383_s5 + $0x30] sm:$0xe] }
  0x7a   : > { %v2052_v46 = vrot.slane %v3802_v32, 5  ;;  %v3788_v48 = vcombine.low %v1693_v39, %v1703_v43  ;;  %v1506_v49 = vrot.slane %v1505_v40, 4  ;;  %v2725_v52 = vshrl.u32 %v3952_v38, 16  ;;  %v3993_v23 = vld [vmem:[%s4383_s5 + $0x34] sm:$0xf] }
  0x7b   : > { %v2109_v50 = vsel %vm4385_vm2, %v2107_v42, %v2108_v36  ;;  %1331 = vrot.lane.b32.xlu0 %v4189_v33, %s4294_s6  ;;  %v1501_v54 = vsel %vm4426_vm5, %v1496_v44, %v1500_v25  ;;  %v2050_v56 = vsel %vm4385_vm2, %v3844_v37, %v2049_v45  ;;  %v2051_v57 = vrot.slane %v2049_v45, 4  ;;  %v3994_v32 = vld [vmem:[%s4383_s5 + $0x38] sm:$0x1]  ;;  %v4191_v33 = vld [vmem:[%s4383_s5 + $0x30] sm:$0xff]  }
  0x7c   : > { %v3868_v55 = vcombine.low %v2106_v41, %v2109_v50  ;;  %1892 = vrot.lane.b32.xlu1 %v3788_v48, %s4298_s10  ;;  %v1511_v60 = vsel %vm4426_vm5, %v1506_v49, %v1510_v30  ;;  %v2727_v61 = vrot.slane %v2725_v52, 4  ;;  %v2728_v62 = vshll.u32 %v3952_v38, 16  ;;  %v375_v38 = vld [vmem:[%s4383_s5 + $0x84] sm:$0xf] }
  0x7d   : > { %v2734_v63 = vshll.u32 %v3953_v47, 16  ;;  %v3780_v2 = vcombine.low %v1501_v54, %v1511_v60  ;;  %v2053_v3 = vsel %vm4385_vm2, %v2051_v57, %v2052_v46  ;;  %v2738_v4 = vshrl.u32 %v3953_v47, 16  ;;  %v376_v47 = vld [vmem:[%s4383_s5 + $0x88] sm:$0xf] }
  0x7e   : > { %v2744_v5 = vshll.u32 %v3954_v51, 16  ;;  %v3860_v8 = vcombine.low %v2050_v56, %v2053_v3  ;;  %v2730_v9 = vrot.slane %v2728_v62, 5  ;;  %v2533_v11 = vshrl.u32 %v3928_v58, 16  ;;  %v377_v51 = vld [vmem:[%s4383_s5 + $0x8c] sm:$0x1] }
  0x7f   : > { %v2736_v10 = vrot.slane %v2734_v63, 5  ;;  %1876 = vrot.lane.b32.xlu0 %v3780_v2, %s4298_s10  ;;  %v2740_v14 = vrot.slane %v2738_v4, 4  ;;  %v2536_v16 = vshll.u32 %v3928_v58, 16  ;;  %v2542_v17 = vshll.u32 %v3929_v59, 16  ;;  %v351_v58 = vld [vmem:[%s4383_s5 + $0x24] sm:$0xf] }
  0x80   : > { %v2746_v15 = vrot.slane %v2744_v5, 5  ;;  %2213 = vrot.lane.b32.xlu1 %v3868_v55, %s4295_s7  ;;  %v2731_v19 = vor.u32 %v2730_v9, %v2727_v61  ;;  %v2535_v20 = vrot.slane %v2533_v11, 4  ;;  %v2546_v21 = vshrl.u32 %v3929_v59, 16  ;;  %v352_v59 = vld [vmem:[%s4383_s5 + $0x28] sm:$0xf] }
  0x81   : > { %v2552_v22 = vshll.u32 %v3930_v1, 16  ;;  %v2741_v24 = vor.u32 %v2740_v14, %v2736_v10  ;;  %v2538_v25 = vrot.slane %v2536_v16, 5  ;;  %v2544_v26 = vrot.slane %v2542_v17, 5  ;;  %v353_v1 = vld [vmem:[%s4383_s5 + $0x2c] sm:$0x1] }
  0x82   : > { %v4044_v27 = vrot.slane %v4016_v6, 9  ;;  %v2732_v28 = vrot.slane %v2731_v19, 4  ;;  %v2548_v29 = vrot.slane %v2546_v21, 4  ;;  %v3149_v31 = vrot.slane %v4017_v7, 5  ;;  %v923_v6 = vld [vmem:[%s4383_s5 + $0x84] sm:$0xe] }
  0x83   : > { %v2554_v30 = vrot.slane %v2552_v22, 5  ;;  %2197 = vrot.lane.b32.xlu0 %v3860_v8, %s4295_s7  ;;  %v2742_v34 = vrot.slane %v2741_v24, 4  ;;  %v2539_v35 = vor.u32 %v2538_v25, %v2535_v20  ;;  %v3152_v36 = vrot.slane %v4018_v12, 5  ;;  %v924_v7 = vld [vmem:[%s4383_s5 + $0x88] sm:$0xf] }
  0x84   : > { %v4036_v37 = vrot.slane %v3992_v13, 9  ;;  %2391 = vrot.lane.b32.xlu1 %v4190_v18, %s4299_s11  ;;  %v2737_v39 = vsel %vm4426_vm5, %v2732_v28, %v2736_v10  ;;  %v2549_v40 = vor.u32 %v2548_v29, %v2544_v26  ;;  %v3150_v41 = vsel %vm4385_vm2, %v4044_v27, %v3149_v31  ;;  %v925_v12 = vld [vmem:[%s4383_s5 + $0x8c] sm:$0x1]  ;;  %v899_v13 = vld [vmem:[%s4383_s5 + $0x24] sm:$0xe] }
  0x85   : > { %v3151_v42 = vrot.slane %v3149_v31, 4  ;;  %v2747_v43 = vsel %vm4426_vm5, %v2742_v34, %v2746_v15  ;;  %v2540_v44 = vrot.slane %v2539_v35, 4  ;;  %v3093_v45 = vrot.slane %v3993_v23, 5  ;;  %v900_v22 = vld [vmem:[%s4383_s5 + $0x28] sm:$0xf] }
  0x86   : > { %v3096_v46 = vrot.slane %v3994_v32, 5  ;;  %v3980_v48 = vcombine.low %v2737_v39, %v2747_v43  ;;  %v2550_v49 = vrot.slane %v2549_v40, 4  ;;  %v658_v52 = vshrl.u32 %v375_v38, 16  ;;  %v901_v31 = vld [vmem:[%s4383_s5 + $0x2c] sm:$0x1] }
  0x87   : > { %v3153_v50 = vsel %vm4385_vm2, %v3151_v42, %v3152_v36  ;;  %2375 = vrot.lane.b32.xlu0 %v4191_v33, %s4299_s11  ;;  %v2545_v54 = vsel %vm4426_vm5, %v2540_v44, %v2544_v26  ;;  %v3094_v56 = vsel %vm4385_vm2, %v4036_v37, %v3093_v45  ;;  %v3095_v57 = vrot.slane %v3093_v45, 4  ;;  %v3763_v36 = vld [vmem:[%s4383_s5 + $0x90] sm:$0xf] }
  0x88   : > { %v4060_v55 = vcombine.low %v3150_v41, %v3153_v50  ;;  %2936 = vrot.lane.b32.xlu1 %v3980_v48, %s4300_s12  ;;  %v2555_v60 = vsel %vm4426_vm5, %v2550_v49, %v2554_v30  ;;  %v660_v61 = vrot.slane %v658_v52, 4  ;;  %v661_v62 = vshll.u32 %v375_v38, 16  ;;  %v3764_v41 = vld [vmem:[%s4383_s5 + $0x94] sm:$0xf]  ;;  %v3739_v52 = vld [vmem:[%s4383_s5 + $0x30] sm:$0xf] }
  0x89   : > { %v667_v63 = vshll.u32 %v376_v47, 16  ;;  %v3972_v2 = vcombine.low %v2545_v54, %v2555_v60  ;;  %v3097_v3 = vsel %vm4385_vm2, %v3095_v57, %v3096_v46  ;;  %v671_v4 = vshrl.u32 %v376_v47, 16  ;;  %v3765_v46 = vld [vmem:[%s4383_s5 + $0x98] sm:$0x1] }
  0x8a   : > { %v677_v5 = vshll.u32 %v377_v51, 16  ;;  %v4052_v8 = vcombine.low %v3094_v56, %v3097_v3  ;;  %v663_v9 = vrot.slane %v661_v62, 5  ;;  %v466_v11 = vshrl.u32 %v351_v58, 16 }
  0x8b   : > { %v669_v10 = vrot.slane %v667_v63, 5  ;;  %2920 = vrot.lane.b32.xlu0 %v3972_v2, %s4300_s12  ;;  %v673_v14 = vrot.slane %v671_v4, 4  ;;  %v469_v16 = vshll.u32 %v351_v58, 16  ;;  %v475_v17 = vshll.u32 %v352_v59, 16  ;;  %v3740_v58 = vld [vmem:[%s4383_s5 + $0x34] sm:$0xf] }
  0x8c   : > { %v679_v15 = vrot.slane %v677_v5, 5  ;;  %3257 = vrot.lane.b32.xlu1 %v4060_v55, %s4301_s13  ;;  %v664_v18 = vor.u32 %v663_v9, %v660_v61  ;;  %v468_v19 = vrot.slane %v466_v11, 4  ;;  %v479_v20 = vshrl.u32 %v352_v59, 16 }
  0x8d   : > { %v485_v21 = vshll.u32 %v353_v1, 16  ;;  %v674_v23 = vor.u32 %v673_v14, %v669_v10  ;;  %v471_v24 = vrot.slane %v469_v16, 5  ;;  %v477_v25 = vrot.slane %v475_v17, 5  ;;  %v4728_v47 = vpop.permute.xlu1 %1343  ;;  %v3741_v1 = vld [vmem:[%s4383_s5 + $0x38] sm:$0x1] }
  0x8e   : > { %v3661_v26 = vrot.slane %v923_v6, 9  ;;  %v665_v27 = vrot.slane %v664_v18, 4  ;;  %v481_v28 = vrot.slane %v479_v20, 4  ;;  %v1068_v30 = vrot.slane %v924_v7, 5  ;;  %v4738_v59 = vpop.permute.xlu0 %1327  ;;  %v3827_v6 = vld [vmem:[%s4383_s5 + $0x90] sm:$0xe] }
  0x8f   : > { %v487_v29 = vrot.slane %v485_v21, 5  ;;  %3241 = vrot.lane.b32.xlu0 %v4052_v8, %s4301_s13  ;;  %v675_v32 = vrot.slane %v674_v23, 4  ;;  %v472_v33 = vor.u32 %v471_v24, %v468_v19  ;;  %v1071_v34 = vrot.slane %v925_v12, 5  ;;  %v3828_v7 = vld [vmem:[%s4383_s5 + $0x94] sm:$0xf] }
  0x90   : > { %v3653_v35 = vrot.slane %v899_v13, 9  ;;  %v670_v37 = vsel %vm4426_vm5, %v665_v27, %v669_v10  ;;  %v482_v38 = vor.u32 %v481_v28, %v477_v25  ;;  %v1069_v39 = vsel %vm4385_vm2, %v3661_v26, %v1068_v30  ;;  %v3829_v12 = vld [vmem:[%s4383_s5 + $0x98] sm:$0x1]  ;;  %v3803_v17 = vld [vmem:[%s4383_s5 + $0x30] sm:$0xe] }
  0x91   : > { %v1070_v40 = vrot.slane %v1068_v30, 4  ;;  %v680_v42 = vsel %vm4426_vm5, %v675_v32, %v679_v15  ;;  %v473_v43 = vrot.slane %v472_v33, 4  ;;  %v1012_v44 = vrot.slane %v900_v22, 5  ;;  %v4192_v19 = vld [vmem:[%s4383_s5 + $0x90] sm:$0xff]  }
  0x92   : > { %v1015_v45 = vrot.slane %v901_v31, 5  ;;  %v3645_v48 = vcombine.low %v670_v37, %v680_v42  ;;  %v483_v49 = vrot.slane %v482_v38, 4  ;;  %v1705_v51 = vshrl.u32 %v3763_v36, 16  ;;  %v3804_v24 = vld [vmem:[%s4383_s5 + $0x34] sm:$0xf] }
  0x93   : > { %v1072_v50 = vsel %vm4385_vm2, %v1070_v40, %v1071_v34  ;;  %v478_v54 = vsel %vm4426_vm5, %v473_v43, %v477_v25  ;;  %v1013_v56 = vsel %vm4385_vm2, %v3653_v35, %v1012_v44  ;;  %v1014_v57 = vrot.slane %v1012_v44, 4  ;;  %v3805_v34 = vld [vmem:[%s4383_s5 + $0x38] sm:$0x1]  ;;  %v4193_v35 = vld [vmem:[%s4383_s5 + $0x30] sm:$0xff]   ;;  %v3955_v40 = vld [vmem:[%s4383_s5 + $0x9c] sm:$0xf] }
  0x94   : > { %v3677_v55 = vcombine.low %v1069_v39, %v1072_v50  ;;  %847 = vrot.lane.b32.xlu1 %v3645_v48, %s4297_s9  ;;  %v488_v60 = vsel %vm4426_vm5, %v483_v49, %v487_v29  ;;  %v1707_v61 = vrot.slane %v1705_v51, 4  ;;  %v1708_v62 = vshll.u32 %v3763_v36, 16  ;;  %v3956_v50 = vld [vmem:[%s4383_s5 + $0xa0] sm:$0xf] }
  0x95   : > { %v1714_v63 = vshll.u32 %v3764_v41, 16  ;;  %v3637_v2 = vcombine.low %v478_v54, %v488_v60  ;;  %v1016_v3 = vsel %vm4385_vm2, %v1014_v57, %v1015_v45  ;;  %v1718_v4 = vshrl.u32 %v3764_v41, 16 }
  0x96   : > { %v1724_v5 = vshll.u32 %v3765_v46, 16  ;;  %v3669_v8 = vcombine.low %v1013_v56, %v1016_v3  ;;  %v1710_v9 = vrot.slane %v1708_v62, 5  ;;  %v1513_v11 = vshrl.u32 %v3739_v52, 16  ;;  %v4751_v18 = vpop.permute.xlu1 %1149  ;;  %v4756_v29 = vpop.permute.xlu0 %2193  ;;  %v3957_v56 = vld [vmem:[%s4383_s5 + $0xa4] sm:$0x1] }
  0x97   : > { %v1716_v10 = vrot.slane %v1714_v63, 5  ;;  %831 = vrot.lane.b32.xlu0 %v3637_v2, %s4297_s9  ;;  %v1720_v13 = vrot.slane %v1718_v4, 4  ;;  %v1516_v15 = vshll.u32 %v3739_v52, 16  ;;  %v1522_v16 = vshll.u32 %v3740_v58, 16  ;;  %v3931_v63 = vld [vmem:[%s4383_s5 + $0x3c] sm:$0xf] }
  0x98   : > { %v1726_v14 = vrot.slane %v1724_v5, 5  ;;  %1171 = vrot.lane.b32.xlu1 %v3677_v55, %s4296_s8  ;;  %v1711_v20 = vor.u32 %v1710_v9, %v1707_v61  ;;  %v1515_v21 = vrot.slane %v1513_v11, 4  ;;  %v1526_v22 = vshrl.u32 %v3740_v58, 16  ;;  %v4200_v9 = vld [vmem:[%s4383_s5 + $0x6c] sm:$0xff]   ;;  %v4206_v11 = vld [vmem:[%s4383_s5 + $0x78] sm:$0xff]  }
  0x99   : > { %v1532_v23 = vshll.u32 %v3741_v1, 16  ;;  %v1721_v25 = vor.u32 %v1720_v13, %v1716_v10  ;;  %v1518_v26 = vrot.slane %v1516_v15, 5  ;;  %v1524_v27 = vrot.slane %v1522_v16, 5  ;;  %v3933_v16 = vld [vmem:[%s4383_s5 + $0x44] sm:$0x1]  ;;  %335 = vst.msk [vmem:[#allocation2 + $0x48] sm:$0xff] %vm325_vm6, %v4200_v9 }
  0x9a   : > { %v3853_v28 = vrot.slane %v3827_v6, 9  ;;  %v1712_v30 = vrot.slane %v1711_v20, 4  ;;  %v1528_v31 = vrot.slane %v1526_v22, 4  ;;  %v2112_v33 = vrot.slane %v3828_v7, 5  ;;  %v4770_v51 = vpop.permute.xlu1 %1165  ;;  %v3932_v6 = vld [vmem:[%s4383_s5 + $0x40] sm:$0xf] }
  0x9b   : > { %v1534_v32 = vrot.slane %v1532_v23, 5  ;;  %1155 = vrot.lane.b32.xlu0 %v3669_v8, %s4296_s8  ;;  %v1722_v36 = vrot.slane %v1721_v25, 4  ;;  %v1519_v37 = vor.u32 %v1518_v26, %v1515_v21  ;;  %v2115_v38 = vrot.slane %v3829_v12, 5  ;;  %v4196_v7 = vld [vmem:[%s4383_s5] sm:$0xff]   ;;  %336 = vst.msk [vmem:[#allocation2 + $0x50] sm:$0xff] %vm325_vm6, %v4206_v11 }
  0x9c   : > { %v3845_v39 = vrot.slane %v3803_v17, 9  ;;  %1349 = vrot.lane.b32.xlu1 %v4192_v19, %s4294_s6  ;;  %v1717_v41 = vsel %vm4426_vm5, %v1712_v30, %v1716_v10  ;;  %v1529_v42 = vor.u32 %v1528_v31, %v1524_v27  ;;  %v2113_v43 = vsel %vm4385_vm2, %v3853_v28, %v2112_v33  ;;  %v4197_v8 = vld [vmem:[%s4383_s5 + $0x60] sm:$0xff]   ;;  %v4201_v10 = vld [vmem:[%s4383_s5 + $0xc] sm:$0xff]   ;;  %v4207_v17 = vld [vmem:[%s4383_s5 + $0x18] sm:$0xff]   ;;  %326 = vst.msk [vmem:[#allocation2] sm:$0xff] %vm325_vm6, %v4196_v7 }
  0x9d   : > { %v2114_v44 = vrot.slane %v2112_v33, 4  ;;  %v1727_v45 = vsel %vm4426_vm5, %v1722_v36, %v1726_v14  ;;  %v1520_v46 = vrot.slane %v1519_v37, 4  ;;  %v2056_v48 = vrot.slane %v3804_v24, 5  ;;  %v4212_v19 = vld [vmem:[%s4383_s5 + $0x84] sm:$0xff]   ;;  %v4019_v24 = vld [vmem:[%s4383_s5 + $0x9c] sm:$0xe] }
  0x9e   : > { %v2059_v49 = vrot.slane %v3805_v34, 5  ;;  %v3789_v52 = vcombine.low %v1717_v41, %v1727_v45  ;;  %v1530_v54 = vrot.slane %v1529_v42, 4  ;;  %v2749_v57 = vshrl.u32 %v3955_v40, 16  ;;  %v4213_v25 = vld [vmem:[%s4383_s5 + $0x24] sm:$0xff]   ;;  %v4020_v31 = vld [vmem:[%s4383_s5 + $0xa0] sm:$0xf]  ;;  %v4804_v33 = vpop.permute.xlu1 %2209 }
  0x9f   : > { %v2116_v55 = vsel %vm4385_vm2, %v2114_v44, %v2115_v38  ;;  %1333 = vrot.lane.b32.xlu0 %v4193_v35, %s4294_s6  ;;  %v1525_v58 = vsel %vm4426_vm5, %v1520_v46, %v1524_v27  ;;  %v2057_v61 = vsel %vm4385_vm2, %v3845_v39, %v2056_v48  ;;  %v2058_v62 = vrot.slane %v2056_v48, 4  ;;  %v4194_v34 = vld [vmem:[%s4383_s5 + $0x9c] sm:$0xff]   ;;  %334 = vst.msk [vmem:[#allocation2 + $0x40] sm:$0xff] %vm325_vm6, %v4197_v8  ;;  %v379_v7 = vld [vmem:[%s4383_s5 + $0x94] sm:$0xf] }
  0xa0   : > { %v3869_v60 = vcombine.low %v2113_v43, %v2116_v55  ;;  %v4781_v1 = vpop.permute.xlu0 %825  ;;  %1894 = vrot.lane.b32.xlu1 %v3789_v52, %s4298_s10  ;;  %v1535_v2 = vsel %vm4426_vm5, %v1530_v54, %v1534_v32  ;;  %v2751_v3 = vrot.slane %v2749_v57, 4  ;;  %v2752_v4 = vshll.u32 %v3955_v40, 16  ;;  %v4802_v32 = vld [vmem:[%s4383_s5 + $0xa4] sm:$0x1]  ;;  %v3995_v39 = vld [vmem:[%s4383_s5 + $0x3c] sm:$0xe] }
  0xa1   : > { %v2758_v5 = vshll.u32 %v3956_v50, 16  ;;  %v3781_v12 = vcombine.low %v1525_v58, %v1535_v2  ;;  %v2060_v13 = vsel %vm4385_vm2, %v2058_v62, %v2059_v49  ;;  %v2762_v14 = vshrl.u32 %v3956_v50, 16  ;;  %v3996_v48 = vld [vmem:[%s4383_s5 + $0x40] sm:$0xf]  ;;  %327 = vst.msk [vmem:[#allocation2 + $0x8] sm:$0xff] %vm325_vm6, %v4201_v10  ;;  %328 = vst.msk [vmem:[#allocation2 + $0x10] sm:$0xff] %vm325_vm6, %v4207_v17 }
  0xa2   : > { %v2768_v15 = vshll.u32 %v3957_v56, 16  ;;  %v3861_v20 = vcombine.low %v2057_v61, %v2060_v13  ;;  %v2754_v21 = vrot.slane %v2752_v4, 5  ;;  %v2557_v23 = vshrl.u32 %v3931_v63, 16  ;;  %337 = vst.msk [vmem:[#allocation2 + $0x58] sm:$0xff] %vm325_vm6, %v4212_v19  ;;  %329 = vst.msk [vmem:[#allocation2 + $0x18] sm:$0xff] %vm325_vm6, %v4213_v25  ;;  %v4195_v49 = vld [vmem:[%s4383_s5 + $0x3c] sm:$0xff]  }
  0xa3   : > { %v2760_v22 = vrot.slane %v2758_v5, 5  ;;  %1878 = vrot.lane.b32.xlu0 %v3781_v12, %s4298_s10  ;;  %v2764_v26 = vrot.slane %v2762_v14, 4  ;;  %v2560_v28 = vshll.u32 %v3931_v63, 16  ;;  %v2566_v30 = vshll.u32 %v3932_v6, 16  ;;  %874 = vst.msk [vmem:[#allocation2] sm:$0xff] %vm873_vm7, %v4781_v1 }
  0xa4   : > { %v2770_v27 = vrot.slane %v2768_v15, 5  ;;  %2215 = vrot.lane.b32.xlu1 %v3869_v60, %s4295_s7  ;;  %v2755_v35 = vor.u32 %v2754_v21, %v2751_v3  ;;  %v2559_v36 = vrot.slane %v2557_v23, 4  ;;  %v2570_v37 = vshrl.u32 %v3932_v6, 16  ;;  %v842_v40 = vpop.permute.xlu0 %841  ;;  %1198 = vst.msk [vmem:[#allocation2] sm:$0xff] %vm1197_vm8, %v4751_v18  ;;  %v3997_v60 = vld [vmem:[%s4383_s5 + $0x44] sm:$0x1] }
  0xa5   : > { %v2576_v38 = vshll.u32 %v3933_v16, 16  ;;  %v2765_v41 = vor.u32 %v2764_v26, %v2760_v22  ;;  %v2562_v42 = vrot.slane %v2560_v28, 5  ;;  %v2568_v43 = vrot.slane %v2566_v30, 5  ;;  %882 = vst.msk [vmem:[#allocation2 + $0x40] sm:$0xff] %vm873_vm7, %v842_v40  ;;  %v378_v2 = vld [vmem:[%s4383_s5 + $0x90] sm:$0xf] }
  0xa6   : > { %v2756_v44 = vrot.slane %v2755_v35, 4  ;;  %v2572_v45 = vrot.slane %v2570_v37, 4  ;;  %v4045_v54 = vrot.slane %v4019_v24, 9  ;;  %v3156_v57 = vrot.slane %v4020_v31, 5  ;;  %1206 = vst.msk [vmem:[#allocation2 + $0x40] sm:$0xff] %vm1197_vm8, %v4770_v51 }
  0xa7   : > { %v2578_v46 = vrot.slane %v2576_v38, 5  ;;  %2199 = vrot.lane.b32.xlu0 %v3861_v20, %s4295_s7  ;;  %v2766_v50 = vrot.slane %v2765_v41, 4  ;;  %v2563_v52 = vor.u32 %v2562_v42, %v2559_v36  ;;  %v3159_v58 = vrot.slane %v4802_v32, 5  ;;  %v380_v11 = vld [vmem:[%s4383_s5 + $0x98] sm:$0x1]  ;;  %1384 = vst.msk [vmem:[#allocation2 + $0x40] sm:$0xff] %vm1375_vm9, %v4728_v47 }
  0xa8   : > { %2393 = vrot.lane.b32.xlu1 %v4194_v34, %s4299_s11  ;;  %v2761_v55 = vsel %vm4426_vm5, %v2756_v44, %v2760_v22  ;;  %v2573_v56 = vor.u32 %v2572_v45, %v2568_v43  ;;  %v4037_v63 = vrot.slane %v3995_v39, 9  ;;  %v3100_v1 = vrot.slane %v3996_v48, 5  ;;  %v354_v16 = vld [vmem:[%s4383_s5 + $0x30] sm:$0xf]  ;;  %v355_v17 = vld [vmem:[%s4383_s5 + $0x34] sm:$0xf] }
  0xa9   : > { %v2771_v61 = vsel %vm4426_vm5, %v2766_v50, %v2770_v27  ;;  %v2564_v62 = vrot.slane %v2563_v52, 4  ;;  %v4835_v3 = vpop.permute.xlu1 %1888  ;;  %v3157_v5 = vsel %vm4385_vm2, %v4045_v54, %v3156_v57  ;;  %v3158_v6 = vrot.slane %v3156_v57, 4  ;;  %v356_v24 = vld [vmem:[%s4383_s5 + $0x38] sm:$0x1]  ;;  %v926_v36 = vld [vmem:[%s4383_s5 + $0x90] sm:$0xe] }
  0xaa   : > { %v3981_v4 = vcombine.low %v2761_v55, %v2771_v61  ;;  %v2574_v18 = vrot.slane %v2573_v56, 4  ;;  %v3101_v8 = vsel %vm4385_vm2, %v4037_v63, %v3100_v1  ;;  %v3102_v9 = vrot.slane %v3100_v1, 4  ;;  %v927_v41 = vld [vmem:[%s4383_s5 + $0x94] sm:$0xf]  ;;  %v928_v42 = vld [vmem:[%s4383_s5 + $0x98] sm:$0x1] }
  0xab   : > { %2377 = vrot.lane.b32.xlu0 %v4195_v49, %s4299_s11  ;;  %v2569_v51 = vsel %vm4426_vm5, %v2564_v62, %v2568_v43  ;;  %v3103_v10 = vrot.slane %v3997_v60, 5  ;;  %v3160_v13 = vsel %vm4385_vm2, %v3158_v6, %v3159_v58  ;;  %v682_v14 = vshrl.u32 %v378_v2, 16  ;;  %v902_v43 = vld [vmem:[%s4383_s5 + $0x30] sm:$0xe]  ;;  %v903_v50 = vld [vmem:[%s4383_s5 + $0x34] sm:$0xf] }
  0xac   : > { %2938 = vrot.lane.b32.xlu1 %v3981_v4, %s4300_s12  ;;  %v2579_v12 = vsel %vm4426_vm5, %v2574_v18, %v2578_v46  ;;  %v685_v15 = vshll.u32 %v378_v2, 16  ;;  %v4061_v21 = vcombine.low %v3157_v5, %v3160_v13  ;;  %v691_v23 = vshll.u32 %v379_v7, 16  ;;  %v904_v52 = vld [vmem:[%s4383_s5 + $0x38] sm:$0x1]  ;;  %1376 = vst.msk [vmem:[#allocation2] sm:$0xff] %vm1375_vm9, %v4738_v59 }
  0xad   : > { %v1873_v19 = vpop.permute.xlu0 %1872  ;;  %v3973_v20 = vcombine.low %v2569_v51, %v2579_v12  ;;  %v3104_v22 = vsel %vm4385_vm2, %v3102_v9, %v3103_v10  ;;  %v4856_v25 = vpop.permute.xlu1 %2387  ;;  %v684_v27 = vrot.slane %v682_v14, 4  ;;  %v695_v30 = vshrl.u32 %v379_v7, 16  ;;  %1929 = vst.msk [vmem:[#allocation2 + $0x40] sm:$0xff] %vm1920_vm10, %v4835_v3  ;;  %v3766_v12 = vld [vmem:[%s4383_s5 + $0x9c] sm:$0xf] }
  0xae   : > { %v4053_v26 = vcombine.low %v3101_v8, %v3104_v22  ;;  %v687_v28 = vrot.slane %v685_v15, 5  ;;  %v693_v31 = vrot.slane %v691_v23, 5  ;;  %v701_v32 = vshll.u32 %v380_v11, 16  ;;  %1921 = vst.msk [vmem:[#allocation2] sm:$0xff] %vm1920_vm10, %v1873_v19  ;;  %v3742_v22 = vld [vmem:[%s4383_s5 + $0x3c] sm:$0xf] }
  0xaf   : > { %2922 = vrot.lane.b32.xlu0 %v3973_v20, %s4300_s12  ;;  %v490_v34 = vshrl.u32 %v354_v16, 16  ;;  %v493_v35 = vshll.u32 %v354_v16, 16  ;;  %v697_v38 = vrot.slane %v695_v30, 4  ;;  %v499_v39 = vshll.u32 %v355_v17, 16  ;;  %v3767_v16 = vld [vmem:[%s4383_s5 + $0xa0] sm:$0xf] }
  0xb0   : > { %3259 = vrot.lane.b32.xlu1 %v4061_v21, %s4301_s13  ;;  %v688_v37 = vor.u32 %v687_v28, %v684_v27  ;;  %v503_v40 = vshrl.u32 %v355_v17, 16  ;;  %v703_v45 = vrot.slane %v701_v32, 5  ;;  %v509_v49 = vshll.u32 %v356_v24, 16  ;;  %v3768_v17 = vld [vmem:[%s4383_s5 + $0xa4] sm:$0x1]  ;;  %2250 = vst.msk [vmem:[#allocation2 + $0x40] sm:$0xff] %vm2241_vm11, %v4804_v33 }
  0xb1   : > { %v2372_v44 = vpop.permute.xlu0 %2371  ;;  %v492_v46 = vrot.slane %v490_v34, 4  ;;  %v495_v48 = vrot.slane %v493_v35, 5  ;;  %v698_v55 = vor.u32 %v697_v38, %v693_v31  ;;  %v501_v56 = vrot.slane %v499_v39, 5  ;;  %v2933_v58 = vpop.permute.xlu1 %2932  ;;  %2242 = vst.msk [vmem:[#allocation2] sm:$0xff] %vm2241_vm11, %v4756_v29  ;;  %v3743_v28 = vld [vmem:[%s4383_s5 + $0x40] sm:$0xf] }
  0xb2   : > { %v689_v54 = vrot.slane %v688_v37, 4  ;;  %v505_v57 = vrot.slane %v503_v40, 4  ;;  %v511_v61 = vrot.slane %v509_v49, 5  ;;  %v3662_v2 = vrot.slane %v926_v36, 9  ;;  %2428 = vst.msk [vmem:[#allocation2 + $0x40] sm:$0xff] %vm2419_vm12, %v4856_v25  ;;  %2420 = vst.msk [vmem:[#allocation2] sm:$0xff] %vm2419_vm12, %v2372_v44 }
  0xb3   : > { %3243 = vrot.lane.b32.xlu0 %v4053_v26, %s4301_s13  ;;  %v496_v60 = vor.u32 %v495_v48, %v492_v46  ;;  %v699_v63 = vrot.slane %v698_v55, 4  ;;  %v1075_v18 = vrot.slane %v927_v41, 5  ;;  %v1078_v5 = vrot.slane %v928_v42, 5  ;;  %v4198_v33 = vld [vmem:[%s4383_s5 + $0x9c] sm:$0xff]   ;;  %2973 = vst.msk [vmem:[#allocation2 + $0x40] sm:$0xff] %vm2964_vm13, %v2933_v58  ;;  %v4218_v35 = vld [vmem:[%s4383_s5 + $0x90] sm:$0xff]  }
  0xb4   : > { %v694_v62 = vsel %vm4426_vm5, %v689_v54, %v693_v31  ;;  %v506_v1 = vor.u32 %v505_v57, %v501_v56  ;;  %v3654_v6 = vrot.slane %v902_v43, 9  ;;  %v1019_v51 = vrot.slane %v903_v50, 5  ;;  %v3744_v34 = vld [vmem:[%s4383_s5 + $0x44] sm:$0x1]  ;;  %v3830_v40 = vld [vmem:[%s4383_s5 + $0x9c] sm:$0xe] }
  0xb5   : > { %v497_v4 = vrot.slane %v496_v60, 4  ;;  %v704_v7 = vsel %vm4426_vm5, %v699_v63, %v703_v45  ;;  %v1022_v8 = vrot.slane %v904_v52, 5  ;;  %v1076_v3 = vsel %vm4385_vm2, %v3662_v2, %v1075_v18  ;;  %v3254_v19 = vpop.permute.xlu1 %3253  ;;  %v3831_v45 = vld [vmem:[%s4383_s5 + $0xa0] sm:$0xf]  ;;  %338 = vst.msk [vmem:[#allocation2 + $0x60] sm:$0xff] %vm325_vm6, %v4218_v35  ;;  %v4219_v55 = vld [vmem:[%s4383_s5 + $0x30] sm:$0xff]  }
  0xb6   : > { %v507_v47 = vrot.slane %v506_v1, 4  ;;  %v3646_v9 = vcombine.low %v694_v62, %v704_v7  ;;  %v1077_v11 = vrot.slane %v1075_v18, 4  ;;  %v1020_v14 = vsel %vm4385_vm2, %v3654_v6, %v1019_v51  ;;  %v3832_v52 = vld [vmem:[%s4383_s5 + $0xa4] sm:$0x1]  ;;  %3294 = vst.msk [vmem:[#allocation2 + $0x40] sm:$0xff] %vm3285_vm14, %v3254_v19 }
  0xb7   : > { %v2917_v59 = vpop.permute.xlu0 %2916  ;;  %v502_v10 = vsel %vm4426_vm5, %v497_v4, %v501_v56  ;;  %v1021_v15 = vrot.slane %v1019_v51, 4  ;;  %v1729_v26 = vshrl.u32 %v3766_v12, 16  ;;  %v1732_v27 = vshll.u32 %v3766_v12, 16  ;;  %v4199_v56 = vld [vmem:[%s4383_s5 + $0x3c] sm:$0xff]   ;;  %330 = vst.msk [vmem:[#allocation2 + $0x20] sm:$0xff] %vm325_vm6, %v4219_v55  ;;  %v4202_v55 = vld [vmem:[%s4383_s5 + $0xa8] sm:$0xff]  }
  0xb8   : > { %v512_v13 = vsel %vm4426_vm5, %v507_v47, %v511_v61  ;;  %849 = vrot.lane.b32.xlu1 %v3646_v9, %s4297_s9  ;;  %v1079_v21 = vsel %vm4385_vm2, %v1077_v11, %v1078_v5  ;;  %2965 = vst.msk [vmem:[#allocation2] sm:$0xff] %vm2964_vm13, %v2917_v59  ;;  %v1738_v30 = vshll.u32 %v3767_v16, 16  ;;  %v1742_v31 = vshrl.u32 %v3767_v16, 16  ;;  %v3806_v61 = vld [vmem:[%s4383_s5 + $0x3c] sm:$0xe] }
  0xb9   : > { %v3638_v20 = vcombine.low %v502_v10, %v512_v13  ;;  %v3678_v23 = vcombine.low %v1076_v3, %v1079_v21  ;;  %v1023_v24 = vsel %vm4385_vm2, %v1021_v15, %v1022_v8  ;;  %v1748_v32 = vshll.u32 %v3768_v17, 16  ;;  %v3807_v4 = vld [vmem:[%s4383_s5 + $0x40] sm:$0xf]  ;;  %v3808_v47 = vld [vmem:[%s4383_s5 + $0x44] sm:$0x1] }
  0xba   : > { %v3670_v29 = vcombine.low %v1020_v14, %v1023_v24  ;;  %v1731_v36 = vrot.slane %v1729_v26, 4  ;;  %v1734_v37 = vrot.slane %v1732_v27, 5  ;;  %v1537_v38 = vshrl.u32 %v3742_v22, 16  ;;  %v3958_v15 = vld [vmem:[%s4383_s5 + $0xa8] sm:$0xf] }
  0xbb   : > { %833 = vrot.lane.b32.xlu0 %v3638_v20, %s4297_s9  ;;  %v3238_v25 = vpop.permute.xlu0 %3237  ;;  %v1540_v39 = vshll.u32 %v3742_v22, 16  ;;  %v1740_v41 = vrot.slane %v1738_v30, 5  ;;  %v1744_v42 = vrot.slane %v1742_v31, 4  ;;  %v1750_v43 = vrot.slane %v1748_v32, 5  ;;  %v3959_v16 = vld [vmem:[%s4383_s5 + $0xac] sm:$0xf] }
  0xbc   : > { %1173 = vrot.lane.b32.xlu1 %v3678_v23, %s4296_s8  ;;  %v1546_v44 = vshll.u32 %v3743_v28, 16  ;;  %v1735_v46 = vor.u32 %v1734_v37, %v1731_v36  ;;  %v1539_v48 = vrot.slane %v1537_v38, 4  ;;  %v1550_v50 = vshrl.u32 %v3743_v28, 16  ;;  %3286 = vst.msk [vmem:[#allocation2] sm:$0xff] %vm3285_vm14, %v3238_v25  ;;  %v3960_v22 = vld [vmem:[%s4383_s5 + $0xb0] sm:$0x1] }
  0xbd   : > { %v1542_v49 = vrot.slane %v1540_v39, 5  ;;  %v1745_v57 = vor.u32 %v1744_v42, %v1740_v41  ;;  %v1556_v60 = vshll.u32 %v3744_v34, 16  ;;  %v3854_v2 = vrot.slane %v3830_v40, 9  ;;  %v3934_v23 = vld [vmem:[%s4383_s5 + $0x48] sm:$0xf]  ;;  %v3314_v36 = vld [vmem:[#allocation2 + $0x40] sm:$0xff] }
  0xbe   : > { %v844_v54 = vpop.permute.xlu1 %843  ;;  %v1548_v58 = vrot.slane %v1546_v44, 5  ;;  %v1736_v62 = vrot.slane %v1735_v46, 4  ;;  %v1552_v1 = vrot.slane %v1550_v50, 4  ;;  %v2119_v6 = vrot.slane %v3831_v45, 5  ;;  %v3936_v39 = vld [vmem:[%s4383_s5 + $0x50] sm:$0x1]  ;;  %4112 = vmatprep.subr.msk.bf16.mxu0 %vm3332_vm15, %v3314_v36  ;;  %4113 = vmatprep.subr.msk.bf16.mxu1 %vm3332_vm15, %v3314_v36 }
  0xbf   : > { %1157 = vrot.lane.b32.xlu0 %v3670_v29, %s4296_s8  ;;  %883 = vst.msk [vmem:[#allocation2 + $0x48] sm:$0xff] %vm873_vm7, %v844_v54  ;;  %v1543_v63 = vor.u32 %v1542_v49, %v1539_v48  ;;  %v1746_v18 = vrot.slane %v1745_v57, 4  ;;  %v1558_v5 = vrot.slane %v1556_v60, 5  ;;  %v2122_v7 = vrot.slane %v3832_v52, 5  ;;  %v3935_v29 = vld [vmem:[%s4383_s5 + $0x4c] sm:$0xf] }
  0xc0   : > { %1351 = vrot.lane.b32.xlu1 %v4198_v33, %s4294_s6  ;;  %v1741_v8 = vsel %vm4426_vm5, %v1736_v62, %v1740_v41  ;;  %v1553_v9 = vor.u32 %v1552_v1, %v1548_v58  ;;  %v3846_v10 = vrot.slane %v3806_v61, 9  ;;  %v2120_v12 = vsel %vm4385_vm2, %v3854_v2, %v2119_v6  ;;  %v4022_v44 = vld [vmem:[%s4383_s5 + $0xa8] sm:$0xe]  ;;  %v4023_v54 = vld [vmem:[%s4383_s5 + $0xac] sm:$0xf] }
  0xc1   : > { %v1544_v59 = vrot.slane %v1543_v63, 4  ;;  %v1751_v11 = vsel %vm4426_vm5, %v1746_v18, %v1750_v43  ;;  %v2121_v13 = vrot.slane %v2119_v6, 4  ;;  %v2063_v14 = vrot.slane %v3807_v4, 5  ;;  %v4024_v61 = vld [vmem:[%s4383_s5 + $0xb0] sm:$0x1] }
  0xc2   : > { %v828_v51 = vpop.permute.xlu0 %827  ;;  %v1168_v3 = vpop.permute.xlu1 %1167  ;;  %v3790_v17 = vcombine.low %v1741_v8, %v1751_v11  ;;  %v1554_v20 = vrot.slane %v1553_v9, 4  ;;  %v2066_v21 = vrot.slane %v3808_v47, 5  ;;  %v2773_v31 = vshrl.u32 %v3958_v15, 16  ;;  %v3998_v18 = vld [vmem:[%s4383_s5 + $0x48] sm:$0xe] }
  0xc3   : > { %875 = vst.msk [vmem:[#allocation2 + $0x8] sm:$0xff] %vm873_vm7, %v828_v51  ;;  %1335 = vrot.lane.b32.xlu0 %v4199_v56, %s4294_s6  ;;  %v1549_v19 = vsel %vm4426_vm5, %v1544_v59, %v1548_v58  ;;  %v2123_v24 = vsel %vm4385_vm2, %v2121_v13, %v2122_v7  ;;  %v2064_v26 = vsel %vm4385_vm2, %v3846_v10, %v2063_v14  ;;  %v2065_v27 = vrot.slane %v2063_v14, 4  ;;  %v3306_v50 = vld [vmem:[#allocation2] sm:$0xff]  ;;  %v3999_v51 = vld [vmem:[%s4383_s5 + $0x4c] sm:$0xf] }
  0xc4   : > { %1207 = vst.msk [vmem:[#allocation2 + $0x48] sm:$0xff] %vm1197_vm8, %v1168_v3  ;;  %1896 = vrot.lane.b32.xlu1 %v3790_v17, %s4298_s10  ;;  %v1559_v33 = vsel %vm4426_vm5, %v1554_v20, %v1558_v5  ;;  %v3870_v30 = vcombine.low %v2120_v12, %v2123_v24  ;;  %v2776_v32 = vshll.u32 %v3958_v15, 16  ;;  %v2782_v37 = vshll.u32 %v3959_v16, 16  ;;  %v4203_v8 = vld [vmem:[%s4383_s5 + $0x48] sm:$0xff]   ;;  %v381_v17 = vld [vmem:[%s4383_s5 + $0x9c] sm:$0xf] }
  0xc5   : > { %v3782_v25 = vcombine.low %v1549_v19, %v1559_v33  ;;  %v2067_v35 = vsel %vm4385_vm2, %v2065_v27, %v2066_v21  ;;  %v2786_v38 = vshrl.u32 %v3959_v16, 16  ;;  %v2775_v41 = vrot.slane %v2773_v31, 4  ;;  %v4000_v16 = vld [vmem:[%s4383_s5 + $0x50] sm:$0x1]  ;;  %v382_v24 = vld [vmem:[%s4383_s5 + $0xa0] sm:$0xf] }
  0xc6   : > { %v1152_v28 = vpop.permute.xlu0 %1151  ;;  %v1346_v34 = vpop.permute.xlu1 %1345  ;;  %v3862_v40 = vcombine.low %v2064_v26, %v2067_v35  ;;  %v2778_v42 = vrot.slane %v2776_v32, 5  ;;  %v2792_v43 = vshll.u32 %v3960_v22, 16  ;;  %v2784_v45 = vrot.slane %v2782_v37, 5  ;;  %v383_v33 = vld [vmem:[%s4383_s5 + $0xa4] sm:$0x1] }
  0xc7   : > { %1199 = vst.msk [vmem:[#allocation2 + $0x8] sm:$0xff] %vm1197_vm8, %v1152_v28  ;;  %1880 = vrot.lane.b32.xlu0 %v3782_v25, %s4298_s10  ;;  %v2788_v46 = vrot.slane %v2786_v38, 4  ;;  %v2581_v48 = vshrl.u32 %v3934_v23, 16  ;;  %v2584_v49 = vshll.u32 %v3934_v23, 16  ;;  %v2590_v58 = vshll.u32 %v3935_v29, 16 }
  0xc8   : > { %1385 = vst.msk [vmem:[#allocation2 + $0x48] sm:$0xff] %vm1375_vm9, %v1346_v34  ;;  %2217 = vrot.lane.b32.xlu1 %v3870_v30, %s4295_s7  ;;  %v2779_v56 = vor.u32 %v2778_v42, %v2775_v41  ;;  %v2794_v57 = vrot.slane %v2792_v43, 5  ;;  %v2594_v60 = vshrl.u32 %v3935_v29, 16  ;;  %v2600_v4 = vshll.u32 %v3936_v39, 16  ;;  %v357_v30 = vld [vmem:[%s4383_s5 + $0x3c] sm:$0xf] }
  0xc9   : > { %v2789_v63 = vor.u32 %v2788_v46, %v2784_v45  ;;  %v2583_v1 = vrot.slane %v2581_v48, 4  ;;  %v2586_v2 = vrot.slane %v2584_v49, 5  ;;  %v2592_v6 = vrot.slane %v2590_v58, 5  ;;  %v358_v35 = vld [vmem:[%s4383_s5 + $0x40] sm:$0xf] }
  0xca   : > { %v1330_v52 = vpop.permute.xlu0 %1329  ;;  %v1891_v62 = vpop.permute.xlu1 %1890  ;;  %v2780_v5 = vrot.slane %v2779_v56, 4  ;;  %v2596_v7 = vrot.slane %v2594_v60, 4  ;;  %v3340_v47 = vsel %vm3332_vm15, %v3306_v50, 0  ;;  %v2602_v10 = vrot.slane %v2600_v4, 5  ;;  %v359_v41 = vld [vmem:[%s4383_s5 + $0x44] sm:$0x1] }
  0xcb   : > { %1377 = vst.msk [vmem:[#allocation2 + $0x8] sm:$0xff] %vm1375_vm9, %v1330_v52  ;;  %2201 = vrot.lane.b32.xlu0 %v3862_v40, %s4295_s7  ;;  %v2790_v59 = vrot.slane %v2789_v63, 4  ;;  %v2587_v9 = vor.u32 %v2586_v2, %v2583_v1  ;;  %4077 = vmatpush3.bf16.xpose.msra.mxu0 %v3340_v47  ;;  %v4046_v3 = vrot.slane %v4022_v44, 9  ;;  %v3163_v14 = vrot.slane %v4023_v54, 5  ;;  %v4222_v48 = vld [vmem:[%s4383_s5 + $0x9c] sm:$0xff]  }
  0xcc   : > { %1930 = vst.msk [vmem:[#allocation2 + $0x48] sm:$0xff] %vm1920_vm10, %v1891_v62  ;;  %2395 = vrot.lane.b32.xlu1 %v4202_v55, %s4299_s11  ;;  %v2785_v12 = vsel %vm4426_vm5, %v2780_v5, %v2784_v45  ;;  %v2597_v13 = vor.u32 %v2596_v7, %v2592_v6  ;;  %4104 = vmatpush3.bf16.xpose.msra.mxu1 %v3340_v47  ;;  %v3166_v15 = vrot.slane %v4024_v61, 5  ;;  %v4038_v22 = vrot.slane %v3998_v18, 9  ;;  %v929_v55 = vld [vmem:[%s4383_s5 + $0x9c] sm:$0xe] }
  0xcd   : > { %v2795_v20 = vsel %vm4426_vm5, %v2790_v59, %v2794_v57  ;;  %v2588_v21 = vrot.slane %v2587_v9, 4  ;;  %v3107_v23 = vrot.slane %v3999_v51, 5  ;;  %v3164_v28 = vsel %vm4385_vm2, %v4046_v3, %v3163_v14  ;;  %v930_v56 = vld [vmem:[%s4383_s5 + $0xa0] sm:$0xf]  ;;  %339 = vst.msk [vmem:[#allocation2 + $0x68] sm:$0xff] %vm325_vm6, %v4222_v48 }
  0xce   : > { %v1875_v11 = vpop.permute.xlu0 %1874  ;;  %v2212_v19 = vpop.permute.xlu1 %2211  ;;  %v3982_v26 = vcombine.low %v2785_v12, %v2795_v20  ;;  %v2598_v27 = vrot.slane %v2597_v13, 4  ;;  %v3165_v29 = vrot.slane %v3163_v14, 4  ;;  %v3110_v25 = vrot.slane %v4000_v16, 5  ;;  %v4223_v57 = vld [vmem:[%s4383_s5 + $0x3c] sm:$0xff]   ;;  %v931_v5 = vld [vmem:[%s4383_s5 + $0xa4] sm:$0x1] }
  0xcf   : > { %1922 = vst.msk [vmem:[#allocation2 + $0x8] sm:$0xff] %vm1920_vm10, %v1875_v11  ;;  %2379 = vrot.lane.b32.xlu0 %v4203_v8, %s4299_s11  ;;  %v2593_v31 = vsel %vm4426_vm5, %v2588_v21, %v2592_v6  ;;  %v3108_v32 = vsel %vm4385_vm2, %v4038_v22, %v3107_v23  ;;  %v3109_v34 = vrot.slane %v3107_v23, 4  ;;  %v706_v39 = vshrl.u32 %v381_v17, 16  ;;  %v905_v59 = vld [vmem:[%s4383_s5 + $0x3c] sm:$0xe] }
  0xd0   : > { %2251 = vst.msk [vmem:[#allocation2 + $0x48] sm:$0xff] %vm2241_vm11, %v2212_v19  ;;  %2940 = vrot.lane.b32.xlu1 %v3982_v26, %s4300_s12  ;;  %v2603_v37 = vsel %vm4426_vm5, %v2598_v27, %v2602_v10  ;;  %v3167_v38 = vsel %vm4385_vm2, %v3165_v29, %v3166_v15  ;;  %v709_v40 = vshll.u32 %v381_v17, 16  ;;  %v715_v46 = vshll.u32 %v382_v24, 16  ;;  %v906_v12 = vld [vmem:[%s4383_s5 + $0x40] sm:$0xf] }
  0xd1   : > { %v3974_v43 = vcombine.low %v2593_v31, %v2603_v37  ;;  %v4062_v44 = vcombine.low %v3164_v28, %v3167_v38  ;;  %v3111_v45 = vsel %vm4385_vm2, %v3109_v34, %v3110_v25  ;;  %v708_v50 = vrot.slane %v706_v39, 4  ;;  %331 = vst.msk [vmem:[#allocation2 + $0x28] sm:$0xff] %vm325_vm6, %v4223_v57  ;;  %v907_v17 = vld [vmem:[%s4383_s5 + $0x44] sm:$0x1]  ;;  %v3770_v25 = vld [vmem:[%s4383_s5 + $0xac] sm:$0xf] }
  0xd2   : > { %v2196_v36 = vpop.permute.xlu0 %2195  ;;  %v2390_v42 = vpop.permute.xlu1 %2389  ;;  %v4054_v49 = vcombine.low %v3108_v32, %v3111_v45  ;;  %v711_v52 = vrot.slane %v709_v40, 5  ;;  %v719_v54 = vshrl.u32 %v382_v24, 16  ;;  %v717_v58 = vrot.slane %v715_v46, 5  ;;  %v3769_v24 = vld [vmem:[%s4383_s5 + $0xa8] sm:$0xf] }
  0xd3   : > { %2243 = vst.msk [vmem:[#allocation2 + $0x8] sm:$0xff] %vm2241_vm11, %v2196_v36  ;;  %2924 = vrot.lane.b32.xlu0 %v3974_v43, %s4300_s12  ;;  %v725_v60 = vshll.u32 %v383_v33, 16  ;;  %v514_v61 = vshrl.u32 %v357_v30, 16  ;;  %v517_v62 = vshll.u32 %v357_v30, 16  ;;  %v523_v4 = vshll.u32 %v358_v35, 16 }
  0xd4   : > { %2429 = vst.msk [vmem:[#allocation2 + $0x48] sm:$0xff] %vm2419_vm12, %v2390_v42  ;;  %3261 = vrot.lane.b32.xlu1 %v4062_v44, %s4301_s13  ;;  %v712_v1 = vor.u32 %v711_v52, %v708_v50  ;;  %v721_v2 = vrot.slane %v719_v54, 4  ;;  %v527_v18 = vshrl.u32 %v358_v35, 16  ;;  %v533_v8 = vshll.u32 %v359_v41, 16  ;;  %v3771_v38 = vld [vmem:[%s4383_s5 + $0xb0] sm:$0x1] }
  0xd5   : > { %v727_v7 = vrot.slane %v725_v60, 5  ;;  %v516_v47 = vrot.slane %v514_v61, 4  ;;  %v519_v51 = vrot.slane %v517_v62, 5  ;;  %v525_v3 = vrot.slane %v523_v4, 5  ;;  %v3745_v40 = vld [vmem:[%s4383_s5 + $0x48] sm:$0xf] }
  0xd6   : > { %v2374_v63 = vpop.permute.xlu0 %2373  ;;  %v2935_v6 = vpop.permute.xlu1 %2934  ;;  %v713_v9 = vrot.slane %v712_v1, 4  ;;  %v722_v10 = vor.u32 %v721_v2, %v717_v58  ;;  %v529_v11 = vrot.slane %v527_v18, 4  ;;  %v535_v14 = vrot.slane %v533_v8, 5  ;;  %v3746_v46 = vld [vmem:[%s4383_s5 + $0x4c] sm:$0xf] }
  0xd7   : > { %2421 = vst.msk [vmem:[#allocation2 + $0x8] sm:$0xff] %vm2419_vm12, %v2374_v63  ;;  %3245 = vrot.lane.b32.xlu0 %v4054_v49, %s4301_s13  ;;  %v520_v13 = vor.u32 %v519_v51, %v516_v47  ;;  %v3663_v15 = vrot.slane %v929_v55, 9  ;;  %v1082_v16 = vrot.slane %v930_v56, 5  ;;  %v1085_v23 = vrot.slane %v931_v5, 5  ;;  %v3747_v48 = vld [vmem:[%s4383_s5 + $0x50] sm:$0x1] }
  0xd8   : > { %2974 = vst.msk [vmem:[#allocation2 + $0x48] sm:$0xff] %vm2964_vm13, %v2935_v6  ;;  %v718_v20 = vsel %vm4426_vm5, %v713_v9, %v717_v58  ;;  %v723_v21 = vrot.slane %v722_v10, 4  ;;  %v530_v22 = vor.u32 %v529_v11, %v525_v3  ;;  %v3655_v33 = vrot.slane %v905_v59, 9  ;;  %v3833_v55 = vld [vmem:[%s4383_s5 + $0xa8] sm:$0xe] }
  0xd9   : > { %v521_v27 = vrot.slane %v520_v13, 4  ;;  %v1083_v28 = vsel %vm4385_vm2, %v3663_v15, %v1082_v16  ;;  %v1084_v29 = vrot.slane %v1082_v16, 4  ;;  %v1026_v32 = vrot.slane %v906_v12, 5  ;;  %v3834_v61 = vld [vmem:[%s4383_s5 + $0xac] sm:$0xf] }
  0xda   : > { %v2919_v19 = vpop.permute.xlu0 %2918  ;;  %v3256_v26 = vpop.permute.xlu1 %3255  ;;  %v728_v30 = vsel %vm4426_vm5, %v723_v21, %v727_v7  ;;  %v531_v31 = vrot.slane %v530_v22, 4  ;;  %v1029_v34 = vrot.slane %v907_v17, 5  ;;  %v1753_v39 = vshrl.u32 %v3769_v24, 16  ;;  %v3835_v4 = vld [vmem:[%s4383_s5 + $0xb0] sm:$0x1]  ;;  %v4204_v8 = vld [vmem:[%s4383_s5 + $0xa8] sm:$0xff]  }
  0xdb   : > { %2966 = vst.msk [vmem:[#allocation2 + $0x8] sm:$0xff] %vm2964_vm13, %v2919_v19  ;;  %v3647_v35 = vcombine.low %v718_v20, %v728_v30  ;;  %v526_v36 = vsel %vm4426_vm5, %v521_v27, %v525_v3  ;;  %v1086_v37 = vsel %vm4385_vm2, %v1084_v29, %v1085_v23  ;;  %v1027_v44 = vsel %vm4385_vm2, %v3655_v33, %v1026_v32  ;;  %v3809_v11 = vld [vmem:[%s4383_s5 + $0x48] sm:$0xe]  ;;  %v3810_v16 = vld [vmem:[%s4383_s5 + $0x4c] sm:$0xf] }
  0xdc   : > { %3295 = vst.msk [vmem:[#allocation2 + $0x48] sm:$0xff] %vm3285_vm14, %v3256_v26  ;;  %v536_v42 = vsel %vm4426_vm5, %v531_v31, %v535_v14  ;;  %v3679_v43 = vcombine.low %v1083_v28, %v1086_v37  ;;  %v1028_v45 = vrot.slane %v1026_v32, 4  ;;  %v1755_v50 = vrot.slane %v1753_v39, 4  ;;  %v4205_v17 = vld [vmem:[%s4383_s5 + $0x48] sm:$0xff]   ;;  %v3811_v23 = vld [vmem:[%s4383_s5 + $0x50] sm:$0x1] }
  0xdd   : > { %851 = vrot.lane.b32.xlu1 %v3647_v35, %s4297_s9  ;;  %v3639_v49 = vcombine.low %v526_v36, %v536_v42  ;;  %v1756_v52 = vshll.u32 %v3769_v24, 16  ;;  %v1762_v54 = vshll.u32 %v3770_v25, 16  ;;  %v1766_v57 = vshrl.u32 %v3770_v25, 16  ;;  %v3961_v25 = vld [vmem:[%s4383_s5 + $0xb4] sm:$0xf] }
  0xde   : > { %v3240_v41 = vpop.permute.xlu0 %3239  ;;  %v1030_v56 = vsel %vm4385_vm2, %v1028_v45, %v1029_v34  ;;  %v1772_v58 = vshll.u32 %v3771_v38, 16  ;;  %v1561_v60 = vshrl.u32 %v3745_v40, 16  ;;  %v1564_v2 = vshll.u32 %v3745_v40, 16  ;;  %v3962_v39 = vld [vmem:[%s4383_s5 + $0xb8] sm:$0xf] }
  0xdf   : > { %3287 = vst.msk [vmem:[#allocation2 + $0x8] sm:$0xff] %vm3285_vm14, %v3240_v41  ;;  %835 = vrot.lane.b32.xlu0 %v3639_v49, %s4297_s9  ;;  %v3671_v62 = vcombine.low %v1027_v44, %v1030_v56  ;;  %v1758_v63 = vrot.slane %v1756_v52, 5  ;;  %v1764_v1 = vrot.slane %v1762_v54, 5  ;;  %v1768_v18 = vrot.slane %v1766_v57, 4  ;;  %v3963_v40 = vld [vmem:[%s4383_s5 + $0xbc] sm:$0x1] }
  0xe0   : > { %v1774_v5 = vrot.slane %v1772_v58, 5  ;;  %v1563_v6 = vrot.slane %v1561_v60, 4  ;;  %v1570_v7 = vshll.u32 %v3746_v46, 16  ;;  %v1566_v9 = vrot.slane %v1564_v2, 5 }
  0xe1   : > { %1175 = vrot.lane.b32.xlu1 %v3679_v43, %s4296_s8  ;;  %v1759_v59 = vor.u32 %v1758_v63, %v1755_v50  ;;  %v1574_v10 = vshrl.u32 %v3746_v46, 16  ;;  %v1580_v3 = vshll.u32 %v3747_v48, 16  ;;  %v1769_v12 = vor.u32 %v1768_v18, %v1764_v1  ;;  %v3937_v46 = vld [vmem:[%s4383_s5 + $0x54] sm:$0xf]  ;;  %v3938_v48 = vld [vmem:[%s4383_s5 + $0x58] sm:$0xf] }
  0xe2   : > { %v846_v47 = vpop.permute.xlu1 %845  ;;  %v1572_v13 = vrot.slane %v1570_v7, 5  ;;  %v3855_v14 = vrot.slane %v3833_v55, 9  ;;  %v2126_v15 = vrot.slane %v3834_v61, 5  ;;  %v1567_v20 = vor.u32 %v1566_v9, %v1563_v6  ;;  %v3939_v55 = vld [vmem:[%s4383_s5 + $0x5c] sm:$0x1] }
  0xe3   : > { %v3315_v51 = vld [vmem:[#allocation2 + $0x48] sm:$0xff]  ;;  %884 = vst.msk [vmem:[#allocation2 + $0x50] sm:$0xff] %vm873_vm7, %v846_v47  ;;  %1159 = vrot.lane.b32.xlu0 %v3671_v62, %s4296_s8  ;;  %v1760_v19 = vrot.slane %v1759_v59, 4  ;;  %v1576_v21 = vrot.slane %v1574_v10, 4  ;;  %v1582_v22 = vrot.slane %v1580_v3, 5  ;;  %v1770_v26 = vrot.slane %v1769_v12, 4 }
  0xe4   : > { %4114 = vmatprep.subr.msk.bf16.mxu0 %vm3332_vm15, %v3315_v51  ;;  %4115 = vmatprep.subr.msk.bf16.mxu1 %vm3332_vm15, %v3315_v51  ;;  %v2127_v27 = vsel %vm4385_vm2, %v3855_v14, %v2126_v15  ;;  %v2128_v28 = vrot.slane %v2126_v15, 4  ;;  %v2129_v29 = vrot.slane %v3835_v4, 5  ;;  %v1568_v31 = vrot.slane %v1567_v20, 4  ;;  %v4025_v18 = vld [vmem:[%s4383_s5 + $0xb4] sm:$0xe] }
  0xe5   : > { %v830_v24 = vpop.permute.xlu0 %829  ;;  %1353 = vrot.lane.b32.xlu1 %v4204_v8, %s4294_s6  ;;  %v1765_v30 = vsel %vm4426_vm5, %v1760_v19, %v1764_v1  ;;  %v1577_v32 = vor.u32 %v1576_v21, %v1572_v13  ;;  %v3847_v34 = vrot.slane %v3809_v11, 9  ;;  %v1775_v35 = vsel %vm4426_vm5, %v1770_v26, %v1774_v5  ;;  %v4026_v8 = vld [vmem:[%s4383_s5 + $0xb8] sm:$0xf]  ;;  %v4027_v11 = vld [vmem:[%s4383_s5 + $0xbc] sm:$0x1] }
  0xe6   : > { %876 = vst.msk [vmem:[#allocation2 + $0x10] sm:$0xff] %vm873_vm7, %v830_v24  ;;  %v1170_v33 = vpop.permute.xlu1 %1169  ;;  %v2130_v36 = vsel %vm4385_vm2, %v2128_v28, %v2129_v29  ;;  %v2070_v37 = vrot.slane %v3810_v16, 5  ;;  %v2073_v38 = vrot.slane %v3811_v23, 5  ;;  %v3791_v41 = vcombine.low %v1765_v30, %v1775_v35  ;;  %v3307_v4 = vld [vmem:[#allocation2 + $0x8] sm:$0xff]  ;;  %v4001_v19 = vld [vmem:[%s4383_s5 + $0x54] sm:$0xe] }
  0xe7   : > { %1208 = vst.msk [vmem:[#allocation2 + $0x50] sm:$0xff] %vm1197_vm8, %v1170_v33  ;;  %1337 = vrot.lane.b32.xlu0 %v4205_v17, %s4294_s6  ;;  %v1573_v42 = vsel %vm4426_vm5, %v1568_v31, %v1572_v13  ;;  %v1578_v43 = vrot.slane %v1577_v32, 4  ;;  %v3871_v44 = vcombine.low %v2127_v27, %v2130_v36  ;;  %v2797_v52 = vshrl.u32 %v3961_v25, 16  ;;  %v4208_v13 = vld [vmem:[%s4383_s5 + $0xb4] sm:$0xff]   ;;  %v4003_v35 = vld [vmem:[%s4383_s5 + $0x5c] sm:$0x1] }
  0xe8   : > { %v2071_v49 = vsel %vm4385_vm2, %v3847_v34, %v2070_v37  ;;  %v2072_v50 = vrot.slane %v2070_v37, 4  ;;  %v2800_v54 = vshll.u32 %v3961_v25, 16  ;;  %v2806_v58 = vshll.u32 %v3962_v39, 16  ;;  %v4002_v24 = vld [vmem:[%s4383_s5 + $0x58] sm:$0xf] }
  0xe9   : > { %v1154_v45 = vpop.permute.xlu0 %1153  ;;  %1898 = vrot.lane.b32.xlu1 %v3791_v41, %s4298_s10  ;;  %v1583_v57 = vsel %vm4426_vm5, %v1578_v43, %v1582_v22  ;;  %v2810_v60 = vshrl.u32 %v3962_v39, 16  ;;  %v2816_v61 = vshll.u32 %v3963_v40, 16  ;;  %v2799_v1 = vrot.slane %v2797_v52, 4  ;;  %v4209_v30 = vld [vmem:[%s4383_s5 + $0x54] sm:$0xff]   ;;  %v384_v41 = vld [vmem:[%s4383_s5 + $0xa8] sm:$0xf] }
  0xea   : > { %1200 = vst.msk [vmem:[#allocation2 + $0x10] sm:$0xff] %vm1197_vm8, %v1154_v45  ;;  %v1348_v56 = vpop.permute.xlu1 %1347  ;;  %v3783_v62 = vcombine.low %v1573_v42, %v1583_v57  ;;  %v2074_v63 = vsel %vm4385_vm2, %v2072_v50, %v2073_v38  ;;  %v2802_v2 = vrot.slane %v2800_v54, 5  ;;  %v2808_v6 = vrot.slane %v2806_v58, 5  ;;  %v385_v42 = vld [vmem:[%s4383_s5 + $0xac] sm:$0xf] }
  0xeb   : > { %1386 = vst.msk [vmem:[#allocation2 + $0x50] sm:$0xff] %vm1375_vm9, %v1348_v56  ;;  %v3863_v5 = vcombine.low %v2071_v49, %v2074_v63  ;;  %v2812_v7 = vrot.slane %v2810_v60, 4  ;;  %v2818_v47 = vrot.slane %v2816_v61, 5  ;;  %v2605_v9 = vshrl.u32 %v3937_v46, 16  ;;  %v360_v49 = vld [vmem:[%s4383_s5 + $0x48] sm:$0xf] }
  0xec   : > { %1882 = vrot.lane.b32.xlu0 %v3783_v62, %s4298_s10  ;;  %v2803_v59 = vor.u32 %v2802_v2, %v2799_v1  ;;  %v2608_v10 = vshll.u32 %v3937_v46, 16  ;;  %v2614_v3 = vshll.u32 %v3938_v48, 16  ;;  %v2618_v15 = vshrl.u32 %v3938_v48, 16  ;;  %v386_v48 = vld [vmem:[%s4383_s5 + $0xb0] sm:$0x1] }
  0xed   : > { %v1332_v51 = vpop.permute.xlu0 %1331  ;;  %2219 = vrot.lane.b32.xlu1 %v3871_v44, %s4295_s7  ;;  %v2813_v14 = vor.u32 %v2812_v7, %v2808_v6  ;;  %v2624_v16 = vshll.u32 %v3939_v55, 16  ;;  %v3343_v17 = vsel %vm3332_vm15, %v3307_v4, 0  ;;  %v2607_v21 = vrot.slane %v2605_v9, 4  ;;  %v361_v56 = vld [vmem:[%s4383_s5 + $0x4c] sm:$0xf] }
  0xee   : > { %1378 = vst.msk [vmem:[#allocation2 + $0x10] sm:$0xff] %vm1375_vm9, %v1332_v51  ;;  %v1893_v12 = vpop.permute.xlu1 %1892  ;;  %v2804_v20 = vrot.slane %v2803_v59, 4  ;;  %v2610_v22 = vrot.slane %v2608_v10, 5  ;;  %v2616_v23 = vrot.slane %v2614_v3, 5  ;;  %4079 = vmatpush3.bf16.xpose.msra.mxu0 %v3343_v17  ;;  %4105 = vmatpush3.bf16.xpose.msra.mxu1 %v3343_v17  ;;  %v2620_v27 = vrot.slane %v2618_v15, 4 }
  0xef   : > { %1931 = vst.msk [vmem:[#allocation2 + $0x50] sm:$0xff] %vm1920_vm10, %v1893_v12  ;;  %v2814_v26 = vrot.slane %v2813_v14, 4  ;;  %v2626_v28 = vrot.slane %v2624_v16, 5  ;;  %v4047_v29 = vrot.slane %v4025_v18, 9  ;;  %v3170_v34 = vrot.slane %v4026_v8, 5 }
  0xf0   : > { %2203 = vrot.lane.b32.xlu0 %v3863_v5, %s4295_s7  ;;  %v2809_v31 = vsel %vm4426_vm5, %v2804_v20, %v2808_v6  ;;  %v2611_v32 = vor.u32 %v2610_v22, %v2607_v21  ;;  %v3173_v25 = vrot.slane %v4027_v11, 5  ;;  %v2621_v38 = vor.u32 %v2620_v27, %v2616_v23  ;;  %v362_v63 = vld [vmem:[%s4383_s5 + $0x50] sm:$0x1]  ;;  %v4224_v6 = vld [vmem:[%s4383_s5 + $0xa8] sm:$0xff]  }
  0xf1   : > { %v1877_v33 = vpop.permute.xlu0 %1876  ;;  %2397 = vrot.lane.b32.xlu1 %v4208_v13, %s4299_s11  ;;  %v2819_v37 = vsel %vm4426_vm5, %v2814_v26, %v2818_v47  ;;  %v4039_v39 = vrot.slane %v4001_v19, 9  ;;  %v3114_v40 = vrot.slane %v4002_v24, 5  ;;  %v3171_v45 = vsel %vm4385_vm2, %v4047_v29, %v3170_v34  ;;  %v932_v59 = vld [vmem:[%s4383_s5 + $0xa8] sm:$0xe]  ;;  %v933_v9 = vld [vmem:[%s4383_s5 + $0xac] sm:$0xf] }
  0xf2   : > { %1923 = vst.msk [vmem:[#allocation2 + $0x10] sm:$0xff] %vm1920_vm10, %v1877_v33  ;;  %v2214_v36 = vpop.permute.xlu1 %2213  ;;  %v3983_v43 = vcombine.low %v2809_v31, %v2819_v37  ;;  %v2612_v44 = vrot.slane %v2611_v32, 4  ;;  %v3172_v46 = vrot.slane %v3170_v34, 4  ;;  %v2622_v50 = vrot.slane %v2621_v38, 4  ;;  %v934_v19 = vld [vmem:[%s4383_s5 + $0xb0] sm:$0x1] }
  0xf3   : > { %2252 = vst.msk [vmem:[#allocation2 + $0x50] sm:$0xff] %vm2241_vm11, %v2214_v36  ;;  %v3115_v52 = vsel %vm4385_vm2, %v4039_v39, %v3114_v40  ;;  %v3116_v54 = vrot.slane %v3114_v40, 4  ;;  %v3117_v55 = vrot.slane %v4003_v35, 5  ;;  %v730_v61 = vshrl.u32 %v384_v41, 16  ;;  %v4225_v21 = vld [vmem:[%s4383_s5 + $0x48] sm:$0xff]  }
  0xf4   : > { %2381 = vrot.lane.b32.xlu0 %v4209_v30, %s4299_s11  ;;  %v2617_v58 = vsel %vm4426_vm5, %v2612_v44, %v2616_v23  ;;  %v3174_v60 = vsel %vm4385_vm2, %v3172_v46, %v3173_v25  ;;  %v733_v62 = vshll.u32 %v384_v41, 16  ;;  %v2627_v2 = vsel %vm4426_vm5, %v2622_v50, %v2626_v28  ;;  %340 = vst.msk [vmem:[#allocation2 + $0x70] sm:$0xff] %vm325_vm6, %v4224_v6  ;;  %v908_v27 = vld [vmem:[%s4383_s5 + $0x48] sm:$0xe]  ;;  %v909_v31 = vld [vmem:[%s4383_s5 + $0x4c] sm:$0xf] }
  0xf5   : > { %v2198_v57 = vpop.permute.xlu0 %2197  ;;  %2942 = vrot.lane.b32.xlu1 %v3983_v43, %s4300_s12  ;;  %v4063_v4 = vcombine.low %v3171_v45, %v3174_v60  ;;  %v3118_v18 = vsel %vm4385_vm2, %v3116_v54, %v3117_v55  ;;  %v739_v5 = vshll.u32 %v385_v42, 16  ;;  %v3975_v7 = vcombine.low %v2617_v58, %v2627_v2  ;;  %332 = vst.msk [vmem:[#allocation2 + $0x30] sm:$0xff] %vm325_vm6, %v4225_v21  ;;  %v910_v36 = vld [vmem:[%s4383_s5 + $0x50] sm:$0x1]  ;;  %v3774_v58 = vld [vmem:[%s4383_s5 + $0xbc] sm:$0x1] }
  0xf6   : > { %2244 = vst.msk [vmem:[#allocation2 + $0x10] sm:$0xff] %vm2241_vm11, %v2198_v57  ;;  %v2392_v1 = vpop.permute.xlu1 %2391  ;;  %v4055_v47 = vcombine.low %v3115_v52, %v3118_v18  ;;  %v732_v51 = vrot.slane %v730_v61, 4  ;;  %v735_v8 = vrot.slane %v733_v62, 5  ;;  %v743_v3 = vshrl.u32 %v385_v42, 16  ;;  %v3772_v42 = vld [vmem:[%s4383_s5 + $0xb4] sm:$0xf] }
  0xf7   : > { %2430 = vst.msk [vmem:[#allocation2 + $0x50] sm:$0xff] %vm2419_vm12, %v2392_v1  ;;  %v741_v10 = vrot.slane %v739_v5, 5  ;;  %v749_v11 = vshll.u32 %v386_v48, 16  ;;  %v538_v12 = vshrl.u32 %v360_v49, 16  ;;  %v541_v15 = vshll.u32 %v360_v49, 16 }
  0xf8   : > { %2926 = vrot.lane.b32.xlu0 %v3975_v7, %s4300_s12  ;;  %v736_v14 = vor.u32 %v735_v8, %v732_v51  ;;  %v547_v16 = vshll.u32 %v361_v56, 16  ;;  %v551_v17 = vshrl.u32 %v361_v56, 16  ;;  %v745_v22 = vrot.slane %v743_v3, 4  ;;  %v3773_v57 = vld [vmem:[%s4383_s5 + $0xb8] sm:$0xf] }
  0xf9   : > { %v2376_v13 = vpop.permute.xlu0 %2375  ;;  %3263 = vrot.lane.b32.xlu1 %v4063_v4, %s4301_s13  ;;  %v751_v23 = vrot.slane %v749_v11, 5  ;;  %v540_v24 = vrot.slane %v538_v12, 4  ;;  %v557_v26 = vshll.u32 %v362_v63, 16  ;;  %v543_v29 = vrot.slane %v541_v15, 5  ;;  %v3748_v18 = vld [vmem:[%s4383_s5 + $0x54] sm:$0xf] }
  0xfa   : > { %2422 = vst.msk [vmem:[#allocation2 + $0x10] sm:$0xff] %vm2419_vm12, %v2376_v13  ;;  %v2937_v20 = vpop.permute.xlu1 %2936  ;;  %v737_v28 = vrot.slane %v736_v14, 4  ;;  %v549_v33 = vrot.slane %v547_v16, 5  ;;  %v553_v30 = vrot.slane %v551_v17, 4  ;;  %v746_v32 = vor.u32 %v745_v22, %v741_v10  ;;  %v3749_v5 = vld [vmem:[%s4383_s5 + $0x58] sm:$0xf] }
  0xfb   : > { %2975 = vst.msk [vmem:[#allocation2 + $0x50] sm:$0xff] %vm2964_vm13, %v2937_v20  ;;  %v559_v34 = vrot.slane %v557_v26, 5  ;;  %v3664_v25 = vrot.slane %v932_v59, 9  ;;  %v1089_v35 = vrot.slane %v933_v9, 5  ;;  %v544_v39 = vor.u32 %v543_v29, %v540_v24  ;;  %v3750_v8 = vld [vmem:[%s4383_s5 + $0x5c] sm:$0x1] }
  0xfc   : > { %3247 = vrot.lane.b32.xlu0 %v4055_v47, %s4301_s13  ;;  %v742_v38 = vsel %vm4426_vm5, %v737_v28, %v741_v10  ;;  %v554_v40 = vor.u32 %v553_v30, %v549_v33  ;;  %v1092_v41 = vrot.slane %v934_v19, 5  ;;  %v747_v44 = vrot.slane %v746_v32, 4  ;;  %v3836_v11 = vld [vmem:[%s4383_s5 + $0xb4] sm:$0xe]  ;;  %v3837_v12 = vld [vmem:[%s4383_s5 + $0xb8] sm:$0xf] }
  0xfd   : > { %v2921_v37 = vpop.permute.xlu0 %2920  ;;  %v1090_v45 = vsel %vm4385_vm2, %v3664_v25, %v1089_v35  ;;  %v1091_v46 = vrot.slane %v1089_v35, 4  ;;  %v3656_v48 = vrot.slane %v908_v27, 9  ;;  %v545_v49 = vrot.slane %v544_v39, 4  ;;  %v3838_v17 = vld [vmem:[%s4383_s5 + $0xbc] sm:$0x1] }
  0xfe   : > { %2967 = vst.msk [vmem:[#allocation2 + $0x10] sm:$0xff] %vm2964_vm13, %v2921_v37  ;;  %v3258_v43 = vpop.permute.xlu1 %3257  ;;  %v555_v50 = vrot.slane %v554_v40, 4  ;;  %v1033_v52 = vrot.slane %v909_v31, 5  ;;  %v1036_v54 = vrot.slane %v910_v36, 5  ;;  %v752_v55 = vsel %vm4426_vm5, %v747_v44, %v751_v23  ;;  %v3812_v23 = vld [vmem:[%s4383_s5 + $0x54] sm:$0xe] }
  0xff   : > { %3296 = vst.msk [vmem:[#allocation2 + $0x50] sm:$0xff] %vm3285_vm14, %v3258_v43  ;;  %v1093_v56 = vsel %vm4385_vm2, %v1091_v46, %v1092_v41  ;;  %v1777_v60 = vshrl.u32 %v3772_v42, 16  ;;  %v1780_v61 = vshll.u32 %v3772_v42, 16  ;;  %v3648_v63 = vcombine.low %v742_v38, %v752_v55  ;;  %v3813_v30 = vld [vmem:[%s4383_s5 + $0x58] sm:$0xf] }
 0x100   : > { %v550_v1 = vsel %vm4426_vm5, %v545_v49, %v549_v33  ;;  %v560_v2 = vsel %vm4426_vm5, %v555_v50, %v559_v34  ;;  %v3680_v4 = vcombine.low %v1090_v45, %v1093_v56  ;;  %v1034_v7 = vsel %vm4385_vm2, %v3656_v48, %v1033_v52  ;;  %v4210_v31 = vld [vmem:[%s4383_s5 + $0xb4] sm:$0xff]   ;;  %v3814_v36 = vld [vmem:[%s4383_s5 + $0x5c] sm:$0x1]  ;;  %v3964_v43 = vld [vmem:[%s4383_s5 + $0xc0] sm:$0xf] }
 0x101   : > { %v3242_v62 = vpop.permute.xlu0 %3241  ;;  %v3640_v6 = vcombine.low %v550_v1, %v560_v2  ;;  %v1035_v47 = vrot.slane %v1033_v52, 4  ;;  %v1779_v51 = vrot.slane %v1777_v60, 4  ;;  %853 = vrot.lane.b32.xlu1 %v3648_v63, %s4297_s9  ;;  %v1782_v59 = vrot.slane %v1780_v61, 5  ;;  %v4211_v37 = vld [vmem:[%s4383_s5 + $0x54] sm:$0xff]   ;;  %v3965_v50 = vld [vmem:[%s4383_s5 + $0xc4] sm:$0xf] }
 0x102   : > { %3288 = vst.msk [vmem:[#allocation2 + $0x10] sm:$0xff] %vm3285_vm14, %v3242_v62  ;;  %v1786_v9 = vshll.u32 %v3773_v57, 16  ;;  %v1790_v10 = vshrl.u32 %v3773_v57, 16  ;;  %v1796_v3 = vshll.u32 %v3774_v58, 16  ;;  %v1585_v14 = vshrl.u32 %v3748_v18, 16 }
 0x103   : > { %837 = vrot.lane.b32.xlu0 %v3640_v6, %s4297_s9  ;;  %v1037_v13 = vsel %vm4385_vm2, %v1035_v47, %v1036_v54  ;;  %v1588_v15 = vshll.u32 %v3748_v18, 16  ;;  %v1594_v16 = vshll.u32 %v3749_v5, 16  ;;  %v1783_v20 = vor.u32 %v1782_v59, %v1779_v51  ;;  %v3966_v57 = vld [vmem:[%s4383_s5 + $0xc8] sm:$0x1]  ;;  %v3940_v63 = vld [vmem:[%s4383_s5 + $0x60] sm:$0xf] }
 0x104   : > { %v3672_v19 = vcombine.low %v1034_v7, %v1037_v13  ;;  %v1788_v21 = vrot.slane %v1786_v9, 5  ;;  %v1792_v22 = vrot.slane %v1790_v10, 4  ;;  %v1798_v27 = vrot.slane %v1796_v3, 5 }
 0x105   : > { %v1587_v28 = vrot.slane %v1585_v14, 4  ;;  %v1590_v29 = vrot.slane %v1588_v15, 5  ;;  %v5171_v33 = vrot.slane %v1594_v16, 5  ;;  %1177 = vrot.lane.b32.xlu1 %v3680_v4, %s4296_s8  ;;  %v1784_v32 = vrot.slane %v1783_v20, 4  ;;  %v3942_v15 = vld [vmem:[%s4383_s5 + $0x68] sm:$0x1] }
 0x106   : > { %v848_v24 = vpop.permute.xlu1 %847  ;;  %v3316_v26 = vld [vmem:[#allocation2 + $0x50] sm:$0xff]  ;;  %v1793_v34 = vor.u32 %v1792_v22, %v1788_v21  ;;  %v1598_v25 = vshrl.u32 %v3749_v5, 16  ;;  %v1604_v35 = vshll.u32 %v3750_v8, 16  ;;  %v3856_v39 = vrot.slane %v3836_v11, 9  ;;  %v3941_v11 = vld [vmem:[%s4383_s5 + $0x64] sm:$0xf] }
 0x107   : > { %885 = vst.msk [vmem:[#allocation2 + $0x58] sm:$0xff] %vm873_vm7, %v848_v24  ;;  %4116 = vmatprep.subr.msk.bf16.mxu0 %vm3332_vm15, %v3316_v26  ;;  %4117 = vmatprep.subr.msk.bf16.mxu1 %vm3332_vm15, %v3316_v26  ;;  %v1591_v38 = vor.u32 %v1590_v29, %v1587_v28  ;;  %v2133_v40 = vrot.slane %v3837_v12, 5  ;;  %v2136_v41 = vrot.slane %v3838_v17, 5  ;;  %v1789_v44 = vsel %vm4426_vm5, %v1784_v32, %v1788_v21  ;;  %v4028_v17 = vld [vmem:[%s4383_s5 + $0xc0] sm:$0xe] }
 0x108   : > { %1161 = vrot.lane.b32.xlu0 %v3672_v19, %s4296_s8  ;;  %v1794_v45 = vrot.slane %v1793_v34, 4  ;;  %v1600_v46 = vrot.slane %v1598_v25, 4  ;;  %v1606_v48 = vrot.slane %v1604_v35, 5  ;;  %v3848_v56 = vrot.slane %v3812_v23, 9  ;;  %v4029_v26 = vld [vmem:[%s4383_s5 + $0xc4] sm:$0xf] }
 0x109   : > { %v832_v42 = vpop.permute.xlu0 %831  ;;  %v1592_v52 = vrot.slane %v1591_v38, 4  ;;  %v2134_v54 = vsel %vm4385_vm2, %v3856_v39, %v2133_v40  ;;  %v2135_v55 = vrot.slane %v2133_v40, 4  ;;  %1355 = vrot.lane.b32.xlu1 %v4210_v31, %s4294_s6  ;;  %v2077_v61 = vrot.slane %v3813_v30, 5  ;;  %v3308_v23 = vld [vmem:[#allocation2 + $0x10] sm:$0xff]  ;;  %v4030_v30 = vld [vmem:[%s4383_s5 + $0xc8] sm:$0x1] }
 0x10a   : > { %877 = vst.msk [vmem:[#allocation2 + $0x18] sm:$0xff] %vm873_vm7, %v832_v42  ;;  %v1172_v49 = vpop.permute.xlu1 %1171  ;;  %v1799_v58 = vsel %vm4426_vm5, %v1794_v45, %v1798_v27  ;;  %v1601_v60 = vor.u32 %v1600_v46, %v5171_v33  ;;  %v2080_v62 = vrot.slane %v3814_v36, 5  ;;  %v2821_v5 = vshrl.u32 %v3964_v43, 16  ;;  %v4004_v36 = vld [vmem:[%s4383_s5 + $0x60] sm:$0xe] }
 0x10b   : > { %1209 = vst.msk [vmem:[#allocation2 + $0x58] sm:$0xff] %vm1197_vm8, %v1172_v49  ;;  %v3792_v1 = vcombine.low %v1789_v44, %v1799_v58  ;;  %v1597_v2 = vsel %vm4426_vm5, %v1592_v52, %v5171_v33  ;;  %v2137_v4 = vsel %vm4385_vm2, %v2135_v55, %v2136_v41  ;;  %v2078_v47 = vsel %vm4385_vm2, %v3848_v56, %v2077_v61  ;;  %v4005_v42 = vld [vmem:[%s4383_s5 + $0x64] sm:$0xf] }
 0x10c   : > { %1339 = vrot.lane.b32.xlu0 %v4211_v37, %s4294_s6  ;;  %v1602_v6 = vrot.slane %v1601_v60, 4  ;;  %v3872_v7 = vcombine.low %v2134_v54, %v2137_v4  ;;  %v2079_v51 = vrot.slane %v2077_v61, 4  ;;  %v2823_v59 = vrot.slane %v2821_v5, 4  ;;  %v4214_v37 = vld [vmem:[%s4383_s5 + $0xc0] sm:$0xff]  }
 0x10d   : > { %v1156_v18 = vpop.permute.xlu0 %1155  ;;  %v2824_v9 = vshll.u32 %v3964_v43, 16  ;;  %v2830_v10 = vshll.u32 %v3965_v50, 16  ;;  %v2834_v3 = vshrl.u32 %v3965_v50, 16  ;;  %1900 = vrot.lane.b32.xlu1 %v3792_v1, %s4298_s10  ;;  %v2840_v14 = vshll.u32 %v3966_v57, 16  ;;  %v4215_v50 = vld [vmem:[%s4383_s5 + $0x60] sm:$0xff]  }
 0x10e   : > { %1201 = vst.msk [vmem:[#allocation2 + $0x18] sm:$0xff] %vm1197_vm8, %v1156_v18  ;;  %v1350_v8 = vpop.permute.xlu1 %1349  ;;  %v1607_v12 = vsel %vm4426_vm5, %v1602_v6, %v1606_v48  ;;  %v2081_v13 = vsel %vm4385_vm2, %v2079_v51, %v2080_v62  ;;  %v2629_v16 = vshrl.u32 %v3940_v63, 16  ;;  %v2632_v33 = vshll.u32 %v3940_v63, 16  ;;  %v4006_v48 = vld [vmem:[%s4383_s5 + $0x68] sm:$0x1] }
 0x10f   : > { %1387 = vst.msk [vmem:[#allocation2 + $0x58] sm:$0xff] %vm1375_vm9, %v1350_v8  ;;  %v3784_v19 = vcombine.low %v1597_v2, %v1607_v12  ;;  %v3864_v20 = vcombine.low %v2078_v47, %v2081_v13  ;;  %v2826_v21 = vrot.slane %v2824_v9, 5  ;;  %v2832_v22 = vrot.slane %v2830_v10, 5  ;;  %v387_v57 = vld [vmem:[%s4383_s5 + $0xb4] sm:$0xf] }
 0x110   : > { %v2836_v27 = vrot.slane %v2834_v3, 4  ;;  %v2842_v28 = vrot.slane %v2840_v14, 5  ;;  %v2631_v29 = vrot.slane %v2629_v16, 4  ;;  %v2638_v34 = vshll.u32 %v3941_v11, 16  ;;  %v388_v1 = vld [vmem:[%s4383_s5 + $0xb8] sm:$0xf] }
 0x111   : > { %v1334_v24 = vpop.permute.xlu0 %1333  ;;  %1884 = vrot.lane.b32.xlu0 %v3784_v19, %s4298_s10  ;;  %v2827_v32 = vor.u32 %v2826_v21, %v2823_v59  ;;  %v2642_v25 = vshrl.u32 %v3941_v11, 16  ;;  %v2648_v35 = vshll.u32 %v3942_v15, 16  ;;  %2221 = vrot.lane.b32.xlu1 %v3872_v7, %s4295_s7  ;;  %v2634_v39 = vrot.slane %v2632_v33, 5  ;;  %v389_v6 = vld [vmem:[%s4383_s5 + $0xbc] sm:$0x1] }
 0x112   : > { %1379 = vst.msk [vmem:[#allocation2 + $0x18] sm:$0xff] %vm1375_vm9, %v1334_v24  ;;  %v1895_v31 = vpop.permute.xlu1 %1894  ;;  %v2837_v38 = vor.u32 %v2836_v27, %v2832_v22  ;;  %v3346_v40 = vsel %vm3332_vm15, %v3308_v23, 0  ;;  %v4048_v41 = vrot.slane %v4028_v17, 9  ;;  %v2640_v44 = vrot.slane %v2638_v34, 5  ;;  %v363_v59 = vld [vmem:[%s4383_s5 + $0x54] sm:$0xf] }
 0x113   : > { %1932 = vst.msk [vmem:[#allocation2 + $0x58] sm:$0xff] %vm1920_vm10, %v1895_v31  ;;  %v2828_v43 = vrot.slane %v2827_v32, 4  ;;  %v2644_v45 = vrot.slane %v2642_v25, 4  ;;  %v2650_v46 = vrot.slane %v2648_v35, 5  ;;  %4081 = vmatpush3.bf16.xpose.msra.mxu0 %v3346_v40  ;;  %4106 = vmatpush3.bf16.xpose.msra.mxu1 %v3346_v40  ;;  %v2635_v54 = vor.u32 %v2634_v39, %v2631_v29  ;;  %v364_v19 = vld [vmem:[%s4383_s5 + $0x58] sm:$0xf] }
 0x114   : > { %v2838_v52 = vrot.slane %v2837_v38, 4  ;;  %v3177_v55 = vrot.slane %v4029_v26, 5  ;;  %v3180_v56 = vrot.slane %v4030_v30, 5  ;;  %v4040_v62 = vrot.slane %v4004_v36, 9  ;;  %v365_v24 = vld [vmem:[%s4383_s5 + $0x5c] sm:$0x1] }
 0x115   : > { %v1879_v49 = vpop.permute.xlu0 %1878  ;;  %2205 = vrot.lane.b32.xlu0 %v3864_v20, %s4295_s7  ;;  %v2833_v60 = vsel %vm4426_vm5, %v2828_v43, %v2832_v22  ;;  %v2645_v61 = vor.u32 %v2644_v45, %v2640_v44  ;;  %v3121_v63 = vrot.slane %v4005_v42, 5  ;;  %2399 = vrot.lane.b32.xlu1 %v4214_v37, %s4299_s11  ;;  %v2636_v4 = vrot.slane %v2635_v54, 4  ;;  %v935_v26 = vld [vmem:[%s4383_s5 + $0xb4] sm:$0xe]  ;;  %v936_v30 = vld [vmem:[%s4383_s5 + $0xb8] sm:$0xf] }
 0x116   : > { %1924 = vst.msk [vmem:[#allocation2 + $0x18] sm:$0xff] %vm1920_vm10, %v1879_v49  ;;  %v2216_v58 = vpop.permute.xlu1 %2215  ;;  %v2843_v2 = vsel %vm4426_vm5, %v2838_v52, %v2842_v28  ;;  %v3178_v18 = vsel %vm4385_vm2, %v4048_v41, %v3177_v55  ;;  %v3179_v5 = vrot.slane %v3177_v55, 4  ;;  %v3124_v11 = vrot.slane %v4006_v48, 5  ;;  %v4226_v32 = vld [vmem:[%s4383_s5 + $0xb4] sm:$0xff]   ;;  %v937_v37 = vld [vmem:[%s4383_s5 + $0xbc] sm:$0x1] }
 0x117   : > { %2253 = vst.msk [vmem:[#allocation2 + $0x58] sm:$0xff] %vm2241_vm11, %v2216_v58  ;;  %v3984_v7 = vcombine.low %v2833_v60, %v2843_v2  ;;  %v2646_v47 = vrot.slane %v2645_v61, 4  ;;  %v5241_v51 = vsel %vm4385_vm2, %v4040_v62, %v3121_v63  ;;  %v3123_v8 = vrot.slane %v3121_v63, 4  ;;  %v911_v43 = vld [vmem:[%s4383_s5 + $0x54] sm:$0xe] }
 0x118   : > { %v2641_v10 = vsel %vm4426_vm5, %v2636_v4, %v2640_v44  ;;  %v3181_v3 = vsel %vm4385_vm2, %v3179_v5, %v3180_v56  ;;  %v754_v12 = vshrl.u32 %v387_v57, 16  ;;  %v757_v16 = vshll.u32 %v387_v57, 16  ;;  %341 = vst.msk [vmem:[#allocation2 + $0x78] sm:$0xff] %vm325_vm6, %v4226_v32  ;;  %v4227_v44 = vld [vmem:[%s4383_s5 + $0x54] sm:$0xff]   ;;  %v913_v63 = vld [vmem:[%s4383_s5 + $0x5c] sm:$0x1] }
 0x119   : > { %v2200_v9 = vpop.permute.xlu0 %2199  ;;  %2383 = vrot.lane.b32.xlu0 %v4215_v50, %s4299_s11  ;;  %v2651_v14 = vsel %vm4426_vm5, %v2646_v47, %v2650_v46  ;;  %v4064_v15 = vcombine.low %v3178_v18, %v3181_v3  ;;  %v763_v17 = vshll.u32 %v388_v1, 16  ;;  %2944 = vrot.lane.b32.xlu1 %v3984_v7, %s4300_s12  ;;  %v3125_v21 = vsel %vm4385_vm2, %v3123_v8, %v3124_v11  ;;  %v912_v50 = vld [vmem:[%s4383_s5 + $0x58] sm:$0xf]  ;;  %v3776_v7 = vld [vmem:[%s4383_s5 + $0xc4] sm:$0xf] }
 0x11a   : > { %2245 = vst.msk [vmem:[#allocation2 + $0x18] sm:$0xff] %vm2241_vm11, %v2200_v9  ;;  %v2394_v13 = vpop.permute.xlu1 %2393  ;;  %v3976_v20 = vcombine.low %v2641_v10, %v2651_v14  ;;  %v756_v22 = vrot.slane %v754_v12, 4  ;;  %v767_v23 = vshrl.u32 %v388_v1, 16  ;;  %v4056_v27 = vcombine.low %v5241_v51, %v3125_v21  ;;  %v3777_v9 = vld [vmem:[%s4383_s5 + $0xc8] sm:$0x1] }
 0x11b   : > { %2431 = vst.msk [vmem:[#allocation2 + $0x58] sm:$0xff] %vm2419_vm12, %v2394_v13  ;;  %v759_v28 = vrot.slane %v757_v16, 5  ;;  %v765_v29 = vrot.slane %v763_v17, 5  ;;  %v773_v33 = vshll.u32 %v389_v6, 16  ;;  %v562_v25 = vshrl.u32 %v363_v59, 16 }
 0x11c   : > { %v769_v34 = vrot.slane %v767_v23, 4  ;;  %v565_v35 = vshll.u32 %v363_v59, 16  ;;  %v571_v36 = vshll.u32 %v364_v19, 16  ;;  %v575_v41 = vshrl.u32 %v364_v19, 16  ;;  %333 = vst.msk [vmem:[#allocation2 + $0x38] sm:$0xff] %vm325_vm6, %v4227_v44  ;;  %v4216_v44 = vld [vmem:[%s4383_s5 + $0xc0] sm:$0xff]  }
 0x11d   : > { %v2378_v31 = vpop.permute.xlu0 %2377  ;;  %2928 = vrot.lane.b32.xlu0 %v3976_v20, %s4300_s12  ;;  %v760_v39 = vor.u32 %v759_v28, %v756_v22  ;;  %v775_v40 = vrot.slane %v773_v33, 5  ;;  %v581_v42 = vshll.u32 %v365_v24, 16  ;;  %3265 = vrot.lane.b32.xlu1 %v4064_v15, %s4301_s13  ;;  %v564_v46 = vrot.slane %v562_v25, 4  ;;  %v3775_v6 = vld [vmem:[%s4383_s5 + $0xc0] sm:$0xf] }
 0x11e   : > { %2423 = vst.msk [vmem:[#allocation2 + $0x18] sm:$0xff] %vm2419_vm12, %v2378_v31  ;;  %v2939_v38 = vpop.permute.xlu1 %2938  ;;  %v770_v45 = vor.u32 %v769_v34, %v765_v29  ;;  %v567_v48 = vrot.slane %v565_v35, 5  ;;  %v573_v49 = vrot.slane %v571_v36, 5  ;;  %v577_v54 = vrot.slane %v575_v41, 4  ;;  %v3751_v13 = vld [vmem:[%s4383_s5 + $0x60] sm:$0xf] }
 0x11f   : > { %2976 = vst.msk [vmem:[#allocation2 + $0x58] sm:$0xff] %vm2964_vm13, %v2939_v38  ;;  %v761_v52 = vrot.slane %v760_v39, 4  ;;  %v583_v55 = vrot.slane %v581_v42, 5  ;;  %v3665_v56 = vrot.slane %v935_v26, 9  ;;  %v1096_v61 = vrot.slane %v936_v30, 5 }
 0x120   : > { %v771_v58 = vrot.slane %v770_v45, 4  ;;  %v568_v60 = vor.u32 %v567_v48, %v564_v46  ;;  %v1099_v62 = vrot.slane %v937_v37, 5  ;;  %v578_v4 = vor.u32 %v577_v54, %v573_v49  ;;  %v3752_v14 = vld [vmem:[%s4383_s5 + $0x64] sm:$0xf]  ;;  %v3753_v21 = vld [vmem:[%s4383_s5 + $0x68] sm:$0x1] }
 0x121   : > { %v2923_v57 = vpop.permute.xlu0 %2922  ;;  %3249 = vrot.lane.b32.xlu0 %v4056_v27, %s4301_s13  ;;  %v766_v2 = vsel %vm4426_vm5, %v761_v52, %v765_v29  ;;  %v3657_v18 = vrot.slane %v911_v43, 9  ;;  %v1040_v5 = vrot.slane %v912_v50, 5  ;;  %v1097_v8 = vsel %vm4385_vm2, %v3665_v56, %v1096_v61  ;;  %v3839_v30 = vld [vmem:[%s4383_s5 + $0xc0] sm:$0xe]  ;;  %v3840_v35 = vld [vmem:[%s4383_s5 + $0xc4] sm:$0xf] }
 0x122   : > { %2968 = vst.msk [vmem:[#allocation2 + $0x18] sm:$0xff] %vm2964_vm13, %v2923_v57  ;;  %v3260_v1 = vpop.permute.xlu1 %3259  ;;  %v776_v47 = vsel %vm4426_vm5, %v771_v58, %v775_v40  ;;  %v569_v51 = vrot.slane %v568_v60, 4  ;;  %v1098_v59 = vrot.slane %v1096_v61, 4  ;;  %v579_v3 = vrot.slane %v578_v4, 4  ;;  %v3841_v36 = vld [vmem:[%s4383_s5 + $0xc8] sm:$0x1] }
 0x123   : > { %3297 = vst.msk [vmem:[#allocation2 + $0x58] sm:$0xff] %vm3285_vm14, %v3260_v1  ;;  %v3649_v10 = vcombine.low %v766_v2, %v776_v47  ;;  %v1041_v11 = vsel %vm4385_vm2, %v3657_v18, %v1040_v5  ;;  %v1042_v12 = vrot.slane %v1040_v5, 4  ;;  %v1043_v19 = vrot.slane %v913_v63, 5  ;;  %v3815_v41 = vld [vmem:[%s4383_s5 + $0x60] sm:$0xe] }
 0x124   : > { %v574_v16 = vsel %vm4426_vm5, %v569_v51, %v573_v49  ;;  %v1100_v17 = vsel %vm4385_vm2, %v1098_v59, %v1099_v62  ;;  %v1801_v20 = vshrl.u32 %v3775_v6, 16  ;;  %v584_v22 = vsel %vm4426_vm5, %v579_v3, %v583_v55  ;;  %v3816_v42 = vld [vmem:[%s4383_s5 + $0x64] sm:$0xf]  ;;  %v3967_v59 = vld [vmem:[%s4383_s5 + $0xcc] sm:$0xf] }
 0x125   : > { %v3244_v15 = vpop.permute.xlu0 %3243  ;;  %855 = vrot.lane.b32.xlu1 %v3649_v10, %s4297_s9  ;;  %v3681_v23 = vcombine.low %v1097_v8, %v1100_v17  ;;  %v1804_v24 = vshll.u32 %v3775_v6, 16  ;;  %v1810_v26 = vshll.u32 %v3776_v7, 16  ;;  %v3641_v27 = vcombine.low %v574_v16, %v584_v22  ;;  %v4217_v63 = vld [vmem:[%s4383_s5 + $0x60] sm:$0xff]   ;;  %v3969_v22 = vld [vmem:[%s4383_s5 + $0xd4] sm:$0x1] }
 0x126   : > { %3289 = vst.msk [vmem:[#allocation2 + $0x18] sm:$0xff] %vm3285_vm14, %v3244_v15  ;;  %v1044_v28 = vsel %vm4385_vm2, %v1042_v12, %v1043_v19  ;;  %v1803_v29 = vrot.slane %v1801_v20, 4  ;;  %v1814_v33 = vshrl.u32 %v3776_v7, 16  ;;  %v1820_v25 = vshll.u32 %v3777_v9, 16  ;;  %v3817_v7 = vld [vmem:[%s4383_s5 + $0x68] sm:$0x1] }
 0x127   : > { %v3673_v31 = vcombine.low %v1041_v11, %v1044_v28  ;;  %v1806_v32 = vrot.slane %v1804_v24, 5  ;;  %v1812_v34 = vrot.slane %v1810_v26, 5  ;;  %839 = vrot.lane.b32.xlu0 %v3641_v27, %s4297_s9  ;;  %v1609_v38 = vshrl.u32 %v3751_v13, 16  ;;  %v3968_v12 = vld [vmem:[%s4383_s5 + $0xd0] sm:$0xf] }
 0x128   : > { %v1816_v37 = vrot.slane %v1814_v33, 4  ;;  %v1612_v39 = vshll.u32 %v3751_v13, 16  ;;  %v1618_v40 = vshll.u32 %v3752_v14, 16  ;;  %v1822_v46 = vrot.slane %v1820_v25, 5  ;;  %v3944_v33 = vld [vmem:[%s4383_s5 + $0x70] sm:$0xf] }
 0x129   : > { %1179 = vrot.lane.b32.xlu1 %v3681_v23, %s4296_s8  ;;  %v1807_v45 = vor.u32 %v1806_v32, %v1803_v29  ;;  %v1622_v48 = vshrl.u32 %v3752_v14, 16  ;;  %v1628_v49 = vshll.u32 %v3753_v21, 16  ;;  %v1611_v54 = vrot.slane %v1609_v38, 4  ;;  %v3943_v29 = vld [vmem:[%s4383_s5 + $0x6c] sm:$0xf] }
 0x12a   : > { %v3317_v43 = vld [vmem:[#allocation2 + $0x58] sm:$0xff]  ;;  %v850_v50 = vpop.permute.xlu1 %849  ;;  %v1817_v52 = vor.u32 %v1816_v37, %v1812_v34  ;;  %v1614_v55 = vrot.slane %v1612_v39, 5  ;;  %v1620_v56 = vrot.slane %v1618_v40, 5  ;;  %v3857_v61 = vrot.slane %v3839_v30, 9 }
 0x12b   : > { %4118 = vmatprep.subr.msk.bf16.mxu0 %vm3332_vm15, %v3317_v43  ;;  %886 = vst.msk [vmem:[#allocation2 + $0x60] sm:$0xff] %vm873_vm7, %v850_v50  ;;  %4119 = vmatprep.subr.msk.bf16.mxu1 %vm3332_vm15, %v3317_v43  ;;  %v1808_v57 = vrot.slane %v1807_v45, 4  ;;  %v1624_v58 = vrot.slane %v1622_v48, 4  ;;  %v1630_v60 = vrot.slane %v1628_v49, 5  ;;  %v2140_v4 = vrot.slane %v3840_v35, 5  ;;  %v4220_v49 = vld [vmem:[%s4383_s5 + $0xcc] sm:$0xff]  }
 0x12c   : > { %1163 = vrot.lane.b32.xlu0 %v3673_v31, %s4296_s8  ;;  %v1818_v1 = vrot.slane %v1817_v52, 4  ;;  %v1615_v2 = vor.u32 %v1614_v55, %v1611_v54  ;;  %v2143_v18 = vrot.slane %v3841_v36, 5  ;;  %v3849_v47 = vrot.slane %v3815_v41, 9  ;;  %v3945_v35 = vld [vmem:[%s4383_s5 + $0x74] sm:$0x1]  ;;  %s5506_s8 = scalar_lea.sflag [#allocation4], %s188_s27 }
 0x12d   : > { %v834_v62 = vpop.permute.xlu0 %833  ;;  %1357 = vrot.lane.b32.xlu1 %v4216_v44, %s4294_s6  ;;  %v1813_v5 = vsel %vm4426_vm5, %v1808_v57, %v1812_v34  ;;  %v1625_v6 = vor.u32 %v1624_v58, %v1620_v56  ;;  %v2084_v51 = vrot.slane %v3816_v42, 5  ;;  %v2141_v3 = vsel %vm4385_vm2, %v3857_v61, %v2140_v4  ;;  %v4031_v41 = vld [vmem:[%s4383_s5 + $0xcc] sm:$0xe]  ;;  %v4032_v42 = vld [vmem:[%s4383_s5 + $0xd0] sm:$0xf]  ;;  %v3309_v48 = vld [vmem:[#allocation2 + $0x18] sm:$0xff] }
 0x12e   : > { %878 = vst.msk [vmem:[#allocation2 + $0x20] sm:$0xff] %vm873_vm7, %v834_v62  ;;  %v1174_v8 = vpop.permute.xlu1 %1173  ;;  %v1823_v9 = vsel %vm4426_vm5, %v1818_v1, %v1822_v46  ;;  %v1616_v10 = vrot.slane %v1615_v2, 4  ;;  %v2142_v11 = vrot.slane %v2140_v4, 4  ;;  %v2087_v21 = vrot.slane %v3817_v7, 5  ;;  %v4007_v62 = vld [vmem:[%s4383_s5 + $0x6c] sm:$0xe] }
 0x12f   : > { %1210 = vst.msk [vmem:[#allocation2 + $0x60] sm:$0xff] %vm1197_vm8, %v1174_v8  ;;  %v3793_v13 = vcombine.low %v1813_v5, %v1823_v9  ;;  %v1626_v14 = vrot.slane %v1625_v6, 4  ;;  %v2085_v15 = vsel %vm4385_vm2, %v3849_v47, %v2084_v51  ;;  %v2086_v16 = vrot.slane %v2084_v51, 4  ;;  %v4008_v5 = vld [vmem:[%s4383_s5 + $0x70] sm:$0xf] }
 0x130   : > { %1341 = vrot.lane.b32.xlu0 %v4217_v63, %s4294_s6  ;;  %v1621_v19 = vsel %vm4426_vm5, %v1616_v10, %v1620_v56  ;;  %v2144_v20 = vsel %vm4385_vm2, %v2142_v11, %v2143_v18  ;;  %v2845_v23 = vshrl.u32 %v3967_v59, 16  ;;  %v2848_v27 = vshll.u32 %v3967_v59, 16  ;;  %v4033_v56 = vld [vmem:[%s4383_s5 + $0xd4] sm:$0x1]  ;;  %v4221_v6 = vld [vmem:[%s4383_s5 + $0x6c] sm:$0xff]  }
 0x131   : > { %v1158_v17 = vpop.permute.xlu0 %1157  ;;  %1902 = vrot.lane.b32.xlu1 %v3793_v13, %s4298_s10  ;;  %v1631_v24 = vsel %vm4426_vm5, %v1626_v14, %v1630_v60  ;;  %v3873_v26 = vcombine.low %v2141_v3, %v2144_v20  ;;  %v2854_v28 = vshll.u32 %v3968_v12, 16  ;;  %v2088_v32 = vsel %vm4385_vm2, %v2086_v16, %v2087_v21  ;;  %v4009_v59 = vld [vmem:[%s4383_s5 + $0x74] sm:$0x1]  ;;  %s3550_s5 = sshll.u32 %s190_s30, 4  ;;  %s5502_s5 = int_to_ptr.vmem [resolvable:$true] %s3550_s5 }
 0x132   : > { %1202 = vst.msk [vmem:[#allocation2 + $0x20] sm:$0xff] %vm1197_vm8, %v1158_v17  ;;  %v1352_v30 = vpop.permute.xlu1 %1351  ;;  %v3785_v31 = vcombine.low %v1621_v19, %v1631_v24  ;;  %v2847_v34 = vrot.slane %v2845_v23, 4  ;;  %v2858_v25 = vshrl.u32 %v3968_v12, 16  ;;  %v3865_v36 = vcombine.low %v2085_v15, %v2088_v32  ;;  %s4230_s9 = scalar_lea.vmem %s5502_s5, 1024 }
 0x133   : > { %1388 = vst.msk [vmem:[#allocation2 + $0x60] sm:$0xff] %vm1375_vm9, %v1352_v30  ;;  %v2850_v37 = vrot.slane %v2848_v27, 5  ;;  %v2856_v38 = vrot.slane %v2854_v28, 5  ;;  %v2864_v39 = vshll.u32 %v3969_v22, 16  ;;  %v2653_v44 = vshrl.u32 %v3943_v29, 16  ;;  %p4231_p11 = scmp.ne.s32.totalorder %s5502_s5, %s4230_s9 }
 0x134   : > { %1886 = vrot.lane.b32.xlu0 %v3785_v31, %s4298_s10  ;;  %v2860_v43 = vrot.slane %v2858_v25, 4  ;;  %v2656_v45 = vshll.u32 %v3943_v29, 16  ;;  %v2662_v46 = vshll.u32 %v3944_v33, 16  ;;  %v2666_v54 = vshrl.u32 %v3944_v33, 16  ;;  %v5389_v25 = vld [vmem:[%s5549_s1 + $0x8] sm:$0xff]  }
 0x135   : > { %v1336_v40 = vpop.permute.xlu0 %1335  ;;  %2223 = vrot.lane.b32.xlu1 %v3873_v26, %s4295_s7  ;;  %v2851_v50 = vor.u32 %v2850_v37, %v2847_v34  ;;  %v2866_v52 = vrot.slane %v2864_v39, 5  ;;  %v2672_v55 = vshll.u32 %v3945_v35, 16  ;;  %v2655_v58 = vrot.slane %v2653_v44, 4  ;;  %4094 = vmatprep.mubr.msk.bf16.mxu1 %vm3332_vm15, %v5389_v25  ;;  %v3440_v39 = vld [vmem:[%s5550_s2] sm:$0xff]  ;;  %p4232_p12 = pnand %p4231_p11, %p4368_p5 }
 0x136   : > { %1380 = vst.msk [vmem:[#allocation2 + $0x20] sm:$0xff] %vm1375_vm9, %v1336_v40  ;;  %v2861_v57 = vor.u32 %v2860_v43, %v2856_v38  ;;  %v2658_v60 = vrot.slane %v2656_v45, 5  ;;  %v2664_v61 = vrot.slane %v2662_v46, 5  ;;  %v1897_v63 = vpop.permute.xlu1 %1896  ;;  %v2668_v2 = vrot.slane %v2666_v54, 4  ;;  %v3443_v43 = vld [vmem:[%s5550_s2 + $0x18] sm:$0xff]  ;;  %v3472_v45 = vld [vmem:[%s5551_s3] sm:$0xff] }
 0x137   : > { %v2852_v1 = vrot.slane %v2851_v50, 4  ;;  %v2674_v4 = vrot.slane %v2672_v55, 5  ;;  %v3349_v18 = vsel %vm3332_vm15, %v3309_v48, 0  ;;  %1933 = vst.msk [vmem:[#allocation2 + $0x60] sm:$0xff] %vm1920_vm10, %v1897_v63  ;;  %v4049_v51 = vrot.slane %v4031_v41, 9  ;;  %v3473_v46 = vld [vmem:[%s5551_s3 + $0x8] sm:$0xff]  ;;  %p4233_p13 = pneg %p4232_p12 }
 0x138   : > { %2207 = vrot.lane.b32.xlu0 %v3865_v36, %s4295_s7  ;;  %v2862_v7 = vrot.slane %v2861_v57, 4  ;;  %v2659_v47 = vor.u32 %v2658_v60, %v2655_v58  ;;  %4083 = vmatpush3.bf16.xpose.msra.mxu0 %v3349_v18  ;;  %v3184_v8 = vrot.slane %v4032_v42, 5  ;;  %v2669_v10 = vor.u32 %v2668_v2, %v2664_v61  ;;  %v3442_v42 = vld [vmem:[%s5550_s2 + $0x10] sm:$0xff]  ;;  %v3475_v55 = vld [vmem:[%s5551_s3 + $0x18] sm:$0xff]  ;;  %s5500_s7 = scalar_lea.hbm %s5552_s4, %s4075_s29 }
 0x139   : > { %2401 = vrot.lane.b32.xlu1 %v4220_v49, %s4299_s11  ;;  %v2857_v9 = vsel %vm4426_vm5, %v2852_v1, %v2856_v38  ;;  %4107 = vmatpush3.bf16.xpose.msra.mxu1 %v3349_v18  ;;  %v3187_v3 = vrot.slane %v4033_v56, 5  ;;  %v4041_v11 = vrot.slane %v4007_v62, 9  ;;  %v1881_v12 = vpop.permute.xlu0 %1880  ;;  %v3128_v21 = vrot.slane %v4008_v5, 5  ;;  %v3441_v38 = vld [vmem:[%s5550_s2 + $0x8] sm:$0xff]  ;;  %v3474_v54 = vld [vmem:[%s5551_s3 + $0x10] sm:$0xff] }
 0x13a   : > { %v2867_v13 = vsel %vm4426_vm5, %v2862_v7, %v2866_v52  ;;  %v2660_v14 = vrot.slane %v2659_v47, 4  ;;  %v3185_v15 = vsel %vm4385_vm2, %v4049_v51, %v3184_v8  ;;  %v3186_v16 = vrot.slane %v3184_v8, 4  ;;  %1925 = vst.msk [vmem:[#allocation2 + $0x20] sm:$0xff] %vm1920_vm10, %v1881_v12  ;;  %v2218_v17 = vpop.permute.xlu1 %2217 }
 0x13b   : > { %v3985_v19 = vcombine.low %v2857_v9, %v2867_v13  ;;  %v2670_v20 = vrot.slane %v2669_v10, 4  ;;  %v3131_v22 = vrot.slane %v4009_v59, 5  ;;  %2254 = vst.msk [vmem:[#allocation2 + $0x60] sm:$0xff] %vm2241_vm11, %v2218_v17  ;;  %v3129_v28 = vsel %vm4385_vm2, %v4041_v11, %v3128_v21 }
 0x13c   : > { %2385 = vrot.lane.b32.xlu0 %v4221_v6, %s4299_s11  ;;  %v2665_v23 = vsel %vm4426_vm5, %v2660_v14, %v2664_v61  ;;  %v3188_v24 = vsel %vm4385_vm2, %v3186_v16, %v3187_v3  ;;  %v3130_v29 = vrot.slane %v3128_v21, 4  ;;  %v4302_v40 = vmov 0   ;;  %s4303_s11 = smov [#allocation3]  }
 0x13d   : > { %2946 = vrot.lane.b32.xlu1 %v3985_v19, %s4300_s12  ;;  %v2675_v26 = vsel %vm4426_vm5, %v2670_v20, %v2674_v4  ;;  %v4065_v27 = vcombine.low %v3185_v15, %v3188_v24  ;;  %v2202_v33 = vpop.permute.xlu0 %2201  ;;  %4178 = vset.pattern.permute.xlu0 %v4302_v40 }
 0x13e   : > { %v3977_v30 = vcombine.low %v2665_v23, %v2675_v26  ;;  %2246 = vst.msk [vmem:[#allocation2 + $0x20] sm:$0xff] %vm2241_vm11, %v2202_v33  ;;  %v2396_v31 = vpop.permute.xlu1 %2395  ;;  %v3132_v32 = vsel %vm4385_vm2, %v3130_v29, %v3131_v22  ;;  %4179 = vset.pattern.permute.xlu1 %v4302_v40 }
 0x13f   : > { %2432 = vst.msk [vmem:[#allocation2 + $0x60] sm:$0xff] %vm2419_vm12, %v2396_v31  ;;  %v4057_v34 = vcombine.low %v3129_v28, %v3132_v32 }
 0x140   : > { %2930 = vrot.lane.b32.xlu0 %v3977_v30, %s4300_s12  ;;  %s4234_s12 = sshll.u32 %s4303_s11, 4  ;;  %s4235_s12 = int_to_ptr.vmem [resolvable:$false] %s4234_s12 }
 0x141   : > { %3267 = vrot.lane.b32.xlu1 %v4065_v27, %s4301_s13  ;;  %v2380_v35 = vpop.permute.xlu0 %2379  ;;  %p4237_p0 = scmp.lt.s32.totalorder %s5502_s5, %s4235_s12 }
 0x142   : > { %2424 = vst.msk [vmem:[#allocation2 + $0x20] sm:$0xff] %vm2419_vm12, %v2380_v35  ;;  %v2941_v0 = vpop.permute.xlu1 %2940 }
 0x143   : > { %2977 = vst.msk [vmem:[#allocation2 + $0x60] sm:$0xff] %vm2964_vm13, %v2941_v0 }
 0x144   : > { %3251 = vrot.lane.b32.xlu0 %v4057_v34, %s4301_s13  ;;  %s4236_s13 = scalar_lea.vmem %s4235_s12, 2048 }
 0x145   : > { %v2925_v36 = vpop.permute.xlu0 %2924  ;;  %3451 = vperm.xlu1 %4179, %v3441_v38   ;;  %p4238_p1 = scmp.lt.s32.totalorder %s4236_s13, %s4230_s9 }
 0x146   : > { %2969 = vst.msk [vmem:[#allocation2 + $0x20] sm:$0xff] %vm2964_vm13, %v2925_v36  ;;  %v3262_v37 = vpop.permute.xlu1 %3261 }
 0x147   : > { %3298 = vst.msk [vmem:[#allocation2 + $0x60] sm:$0xff] %vm3285_vm14, %v3262_v37  ;;  %p4239_p2 = por %p4238_p1, %p4237_p0 }
 0x148   : > { %3446 = vperm.xlu0 %4178, %v3440_v39  }
 0x149   : > { %v3246_v41 = vpop.permute.xlu0 %3245  ;;  %3456 = vperm.xlu1 %4179, %v3442_v42   ;;  %p4240_p3 = pnand %p4239_p2, %p4233_p13 }
 0x14a   : > { %3290 = vst.msk [vmem:[#allocation2 + $0x20] sm:$0xff] %vm3285_vm14, %v3246_v41 }
 0x14c   : > { %3461 = vperm.xlu0 %4178, %v3443_v43  }
 0x14d   : > { %3478 = vperm.xlu1 %4179, %v3472_v45  }
 0x14e   : > { %v3318_v44 = vld [vmem:[#allocation2 + $0x60] sm:$0xff] }
 0x14f   : > { %v852_v48 = vpop.permute.xlu1 %851  ;;  %4120 = vmatprep.subr.msk.bf16.mxu0 %vm3332_vm15, %v3318_v44  ;;  %4121 = vmatprep.subr.msk.bf16.mxu1 %vm3332_vm15, %v3318_v44 }
 0x150   : > { %887 = vst.msk [vmem:[#allocation2 + $0x68] sm:$0xff] %vm873_vm7, %v852_v48  ;;  %3483 = vperm.xlu0 %4178, %v3473_v46  }
 0x151   : > { %v836_v49 = vpop.permute.xlu0 %835  ;;  %v3310_v50 = vld [vmem:[#allocation2 + $0x20] sm:$0xff]  ;;  %3488 = vperm.xlu1 %4179, %v3474_v54  }
 0x152   : > { %879 = vst.msk [vmem:[#allocation2 + $0x28] sm:$0xff] %vm873_vm7, %v836_v49  ;;  %v3352_v52 = vsel %vm3332_vm15, %v3310_v50, 0 }
 0x153   : > { %v1176_v56 = vpop.permute.xlu1 %1175  ;;  %4085 = vmatpush3.bf16.xpose.msra.mxu0 %v3352_v52  ;;  %4108 = vmatpush3.bf16.xpose.msra.mxu1 %v3352_v52 }
 0x154   : > { %1211 = vst.msk [vmem:[#allocation2 + $0x68] sm:$0xff] %vm1197_vm8, %v1176_v56  ;;  %3493 = vperm.xlu0 %4178, %v3475_v55  }
 0x155   : > { %v1160_v57 = vpop.permute.xlu0 %1159 }
 0x156   : > { %1203 = vst.msk [vmem:[#allocation2 + $0x28] sm:$0xff] %vm1197_vm8, %v1160_v57 }
 0x157   : > { %v1354_v58 = vpop.permute.xlu1 %1353 }
 0x158   : > { %1389 = vst.msk [vmem:[#allocation2 + $0x68] sm:$0xff] %vm1375_vm9, %v1354_v58 }
 0x159   : > { %v1338_v60 = vpop.permute.xlu0 %1337 }
 0x15a   : > { %1381 = vst.msk [vmem:[#allocation2 + $0x28] sm:$0xff] %vm1375_vm9, %v1338_v60 }
 0x15b   : > { %v1899_v61 = vpop.permute.xlu1 %1898 }
 0x15c   : > { %1934 = vst.msk [vmem:[#allocation2 + $0x68] sm:$0xff] %vm1920_vm10, %v1899_v61 }
 0x15e   : > { %v1883_v62 = vpop.permute.xlu0 %1882 }
 0x15f   : > { %1926 = vst.msk [vmem:[#allocation2 + $0x28] sm:$0xff] %vm1920_vm10, %v1883_v62  ;;  %v2220_v63 = vpop.permute.xlu1 %2219 }
 0x160   : > { %2255 = vst.msk [vmem:[#allocation2 + $0x68] sm:$0xff] %vm2241_vm11, %v2220_v63 }
 0x162   : > { %v2204_v1 = vpop.permute.xlu0 %2203 }
 0x163   : > { %2247 = vst.msk [vmem:[#allocation2 + $0x28] sm:$0xff] %vm2241_vm11, %v2204_v1  ;;  %v2398_v2 = vpop.permute.xlu1 %2397 }
 0x164   : > { %2433 = vst.msk [vmem:[#allocation2 + $0x68] sm:$0xff] %vm2419_vm12, %v2398_v2 }
 0x166   : > { %v2382_v4 = vpop.permute.xlu0 %2381 }
 0x167   : > { %2425 = vst.msk [vmem:[#allocation2 + $0x28] sm:$0xff] %vm2419_vm12, %v2382_v4  ;;  %v2943_v18 = vpop.permute.xlu1 %2942 }
 0x168   : > { %2978 = vst.msk [vmem:[#allocation2 + $0x68] sm:$0xff] %vm2964_vm13, %v2943_v18 }
 0x16a   : > { %v2927_v5 = vpop.permute.xlu0 %2926 }
 0x16b   : > { %2970 = vst.msk [vmem:[#allocation2 + $0x28] sm:$0xff] %vm2964_vm13, %v2927_v5  ;;  %v3264_v6 = vpop.permute.xlu1 %3263 }
 0x16c   : > { %3299 = vst.msk [vmem:[#allocation2 + $0x68] sm:$0xff] %vm3285_vm14, %v3264_v6 }
 0x16e   : > { %v3248_v7 = vpop.permute.xlu0 %3247 }
 0x16f   : > { %3291 = vst.msk [vmem:[#allocation2 + $0x28] sm:$0xff] %vm3285_vm14, %v3248_v7 }
 0x173   : > { %v3319_v47 = vld [vmem:[#allocation2 + $0x68] sm:$0xff]  ;;  %v854_v51 = vpop.permute.xlu1 %853 }
 0x174   : > { %4122 = vmatprep.subr.msk.bf16.mxu0 %vm3332_vm15, %v3319_v47  ;;  %4123 = vmatprep.subr.msk.bf16.mxu1 %vm3332_vm15, %v3319_v47  ;;  %888 = vst.msk [vmem:[#allocation2 + $0x70] sm:$0xff] %vm873_vm7, %v854_v51 }
 0x175   : > { %v838_v8 = vpop.permute.xlu0 %837 }
 0x176   : > { %880 = vst.msk [vmem:[#allocation2 + $0x30] sm:$0xff] %vm873_vm7, %v838_v8  ;;  %v3311_v59 = vld [vmem:[#allocation2 + $0x28] sm:$0xff] }
 0x177   : > { %v3355_v9 = vsel %vm3332_vm15, %v3311_v59, 0  ;;  %v1178_v10 = vpop.permute.xlu1 %1177 }
 0x178   : > { %4087 = vmatpush3.bf16.xpose.msra.mxu0 %v3355_v9  ;;  %4109 = vmatpush3.bf16.xpose.msra.mxu1 %v3355_v9  ;;  %1212 = vst.msk [vmem:[#allocation2 + $0x70] sm:$0xff] %vm1197_vm8, %v1178_v10 }
 0x17a   : > { %v1162_v3 = vpop.permute.xlu0 %1161 }
 0x17b   : > { %1204 = vst.msk [vmem:[#allocation2 + $0x30] sm:$0xff] %vm1197_vm8, %v1162_v3  ;;  %v1356_v11 = vpop.permute.xlu1 %1355 }
 0x17c   : > { %1390 = vst.msk [vmem:[#allocation2 + $0x70] sm:$0xff] %vm1375_vm9, %v1356_v11 }
 0x17e   : > { %v1340_v12 = vpop.permute.xlu0 %1339 }
 0x17f   : > { %1382 = vst.msk [vmem:[#allocation2 + $0x30] sm:$0xff] %vm1375_vm9, %v1340_v12  ;;  %v1901_v13 = vpop.permute.xlu1 %1900 }
 0x180   : > { %1935 = vst.msk [vmem:[#allocation2 + $0x70] sm:$0xff] %vm1920_vm10, %v1901_v13 }
 0x183   : > { %v1885_v14 = vpop.permute.xlu0 %1884  ;;  %v2222_v15 = vpop.permute.xlu1 %2221 }
 0x184   : > { %1927 = vst.msk [vmem:[#allocation2 + $0x30] sm:$0xff] %vm1920_vm10, %v1885_v14 }
 0x185   : > { %2256 = vst.msk [vmem:[#allocation2 + $0x70] sm:$0xff] %vm2241_vm11, %v2222_v15 }
 0x187   : > { %v2206_v16 = vpop.permute.xlu0 %2205  ;;  %v2400_v17 = vpop.permute.xlu1 %2399 }
 0x188   : > { %2248 = vst.msk [vmem:[#allocation2 + $0x30] sm:$0xff] %vm2241_vm11, %v2206_v16 }
 0x189   : > { %2434 = vst.msk [vmem:[#allocation2 + $0x70] sm:$0xff] %vm2419_vm12, %v2400_v17 }
 0x18b   : > { %v2384_v19 = vpop.permute.xlu0 %2383  ;;  %v2945_v20 = vpop.permute.xlu1 %2944 }
 0x18c   : > { %2426 = vst.msk [vmem:[#allocation2 + $0x30] sm:$0xff] %vm2419_vm12, %v2384_v19 }
 0x18d   : > { %2979 = vst.msk [vmem:[#allocation2 + $0x70] sm:$0xff] %vm2964_vm13, %v2945_v20 }
 0x18f   : > { %v2929_v21 = vpop.permute.xlu0 %2928  ;;  %v3266_v22 = vpop.permute.xlu1 %3265 }
 0x190   : > { %2971 = vst.msk [vmem:[#allocation2 + $0x30] sm:$0xff] %vm2964_vm13, %v2929_v21 }
 0x191   : > { %3300 = vst.msk [vmem:[#allocation2 + $0x70] sm:$0xff] %vm3285_vm14, %v3266_v22 }
 0x193   : > { %v3250_v23 = vpop.permute.xlu0 %3249 }
 0x194   : > { %3292 = vst.msk [vmem:[#allocation2 + $0x30] sm:$0xff] %vm3285_vm14, %v3250_v23 }
 0x197   : > { %v856_v24 = vpop.permute.xlu1 %855 }
 0x198   : > { %889 = vst.msk [vmem:[#allocation2 + $0x78] sm:$0xff] %vm873_vm7, %v856_v24  ;;  %v3320_v26 = vld [vmem:[#allocation2 + $0x70] sm:$0xff] }
 0x199   : > { %4124 = vmatprep.subr.msk.bf16.mxu0 %vm3332_vm15, %v3320_v26  ;;  %4125 = vmatprep.subr.msk.bf16.mxu1 %vm3332_vm15, %v3320_v26  ;;  %v840_v27 = vpop.permute.xlu0 %839 }
 0x19a   : > { %881 = vst.msk [vmem:[#allocation2 + $0x38] sm:$0xff] %vm873_vm7, %v840_v27 }
 0x19b   : > { %v1180_v28 = vpop.permute.xlu1 %1179  ;;  %v3312_v29 = vld [vmem:[#allocation2 + $0x30] sm:$0xff] }
 0x19c   : > { %1213 = vst.msk [vmem:[#allocation2 + $0x78] sm:$0xff] %vm1197_vm8, %v1180_v28  ;;  %v3358_v33 = vsel %vm3332_vm15, %v3312_v29, 0 }
 0x19d   : > { %4089 = vmatpush3.bf16.xpose.msra.mxu0 %v3358_v33  ;;  %4110 = vmatpush3.bf16.xpose.msra.mxu1 %v3358_v33 }
 0x19e   : > { %v1164_v30 = vpop.permute.xlu0 %1163 }
 0x19f   : > { %1205 = vst.msk [vmem:[#allocation2 + $0x38] sm:$0xff] %vm1197_vm8, %v1164_v30  ;;  %v1358_v31 = vpop.permute.xlu1 %1357 }
 0x1a0   : > { %1391 = vst.msk [vmem:[#allocation2 + $0x78] sm:$0xff] %vm1375_vm9, %v1358_v31 }
 0x1a2   : > { %v1342_v32 = vpop.permute.xlu0 %1341 }
 0x1a3   : > { %1383 = vst.msk [vmem:[#allocation2 + $0x38] sm:$0xff] %vm1375_vm9, %v1342_v32  ;;  %v1903_v34 = vpop.permute.xlu1 %1902 }
 0x1a4   : > { %1936 = vst.msk [vmem:[#allocation2 + $0x78] sm:$0xff] %vm1920_vm10, %v1903_v34 }
 0x1a6   : > { %v1887_v35 = vpop.permute.xlu0 %1886 }
 0x1a7   : > { %1928 = vst.msk [vmem:[#allocation2 + $0x38] sm:$0xff] %vm1920_vm10, %v1887_v35  ;;  %v2224_v0 = vpop.permute.xlu1 %2223 }
 0x1a8   : > { %2257 = vst.msk [vmem:[#allocation2 + $0x78] sm:$0xff] %vm2241_vm11, %v2224_v0 }
 0x1aa   : > { %v2208_v36 = vpop.permute.xlu0 %2207 }
 0x1ab   : > { %2249 = vst.msk [vmem:[#allocation2 + $0x38] sm:$0xff] %vm2241_vm11, %v2208_v36  ;;  %v2402_v37 = vpop.permute.xlu1 %2401 }
 0x1ac   : > { %2435 = vst.msk [vmem:[#allocation2 + $0x78] sm:$0xff] %vm2419_vm12, %v2402_v37 }
 0x1ae   : > { %v2386_v38 = vpop.permute.xlu0 %2385 }
 0x1af   : > { %2427 = vst.msk [vmem:[#allocation2 + $0x38] sm:$0xff] %vm2419_vm12, %v2386_v38  ;;  %v2947_v39 = vpop.permute.xlu1 %2946 }
 0x1b0   : > { %2980 = vst.msk [vmem:[#allocation2 + $0x78] sm:$0xff] %vm2964_vm13, %v2947_v39 }
 0x1b2   : > { %v2931_v40 = vpop.permute.xlu0 %2930 }
 0x1b3   : > { %2972 = vst.msk [vmem:[#allocation2 + $0x38] sm:$0xff] %vm2964_vm13, %v2931_v40  ;;  %v3268_v41 = vpop.permute.xlu1 %3267 }
 0x1b4   : > { %3301 = vst.msk [vmem:[#allocation2 + $0x78] sm:$0xff] %vm3285_vm14, %v3268_v41 }
 0x1b6   : > { %v3252_v42 = vpop.permute.xlu0 %3251 }
 0x1b7   : > { %3293 = vst.msk [vmem:[#allocation2 + $0x38] sm:$0xff] %vm3285_vm14, %v3252_v42 }
 0x1bb   : > { %v3321_v43 = vld [vmem:[#allocation2 + $0x78] sm:$0xff] }
 0x1bc   : > { %4126 = vmatprep.subr.msk.bf16.mxu0 %vm3332_vm15, %v3321_v43  ;;  %4127 = vmatprep.subr.msk.bf16.mxu1 %vm3332_vm15, %v3321_v43 }
 0x1be   : > { %v3313_v44 = vld [vmem:[#allocation2 + $0x38] sm:$0xff] }
 0x1bf   : > { %v3361_v45 = vsel %vm3332_vm15, %v3313_v44, 0 }
 0x1c0   : > { %4091 = vmatpush3.bf16.xpose.msra.mxu0 %v3361_v45  ;;  %4111 = vmatpush3.bf16.xpose.msra.mxu1 %v3361_v45 }
 0x1c4   : > { %v3452_v46 = vpop.permute.xlu1 %3451 }
 0x1c7   : > { %4093 = vmatmul.mubr.msk.bf16.vlgmr.msra.gmra.mrb[0].mxu0 %vm3332_vm15, %v5384_v53  ;;  %4095 = vmatmul.mubr.msk.bf16.vlgmr.msra.gmra.mrb[0].mxu1 %vm3332_vm15, %v5389_v25  ;;  %v3447_v48 = vpop.permute.xlu0 %3446 }
 0x1c8   : > { %v3457_v49 = vpop.permute.xlu1 %3456 }
 0x1cb   : > { %v3462_v50 = vpop.permute.xlu0 %3461 }
 0x1cc   : > { %v3479_v52 = vpop.permute.xlu1 %3478 }
 0x1cf   : > { %v3484_v54 = vpop.permute.xlu0 %3483 }
 0x1d0   : > { %v3489_v55 = vpop.permute.xlu1 %3488 }
 0x1d3   : > { %v3494_v3 = vpop.permute.xlu0 %3493 }
 0x29a   : > { %v3421_v56 = vpop.f32.mrb[0].mxu0  ;;  %v3431_v57 = vpop.f32.mrb[0].mxu1 }
 0x29b   : > { %v3464_v58 = vmul.f32 %v3447_v48, %v3421_v56  ;;  %v3468_v60 = vmul.f32 %v3457_v49, %v3431_v57  ;;  %v3423_v61 = vpop.f32.mrb[1].mxu0  ;;  %v3433_v53 = vpop.f32.mrb[1].mxu1 }
 0x29c   : > { %v3465_v62 = vmul.f32 %v3447_v48, %v3423_v61  ;;  %v3469_v63 = vmul.f32 %v3457_v49, %v3433_v53  ;;  %v3425_v25 = vpop.f32.mrb[2].mxu0  ;;  %v3435_v1 = vpop.f32.mrb[2].mxu1 }
 0x29d   : > { %v3496_v2 = vadd.f32 %v3479_v52, %v3464_v58  ;;  %v3500_v4 = vadd.f32 %v3489_v55, %v3468_v60  ;;  %v3466_v18 = vmul.f32 %v3452_v46, %v3425_v25  ;;  %v3470_v5 = vmul.f32 %v3462_v50, %v3435_v1  ;;  %v3427_v6 = vpop.f32.mrb[3].mxu0  ;;  %v3437_v7 = vpop.f32.mrb[3].mxu1 }
 0x29e   : > { %v3497_v47 = vadd.f32 %v3479_v52, %v3465_v62  ;;  %v3501_v51 = vadd.f32 %v3489_v55, %v3469_v63  ;;  %v3467_v8 = vmul.f32 %v3452_v46, %v3427_v6  ;;  %v3471_v59 = vmul.f32 %v3462_v50, %v3437_v7 }
 0x29f   : > { %vm3504_vm0 = vcmp.ge.f32.partialorder %v3496_v2, 0.0  ;;  %v3512_v9 = vmul.f32 0.01, %v3496_v2  ;;  %vm3508_vm1 = vcmp.ge.f32.partialorder %v3500_v4, 0.0  ;;  %v3516_v10 = vmul.f32 0.01, %v3500_v4 }
 0x2a0   : > { %vm3505_vm2 = vcmp.ge.f32.partialorder %v3497_v47, 0.0  ;;  %v3513_v11 = vmul.f32 0.01, %v3497_v47  ;;  %vm3509_vm3 = vcmp.ge.f32.partialorder %v3501_v51, 0.0  ;;  %v3517_v12 = vmul.f32 0.01, %v3501_v51 }
 0x2a1   : > { %v3520_v13 = vsel %vm3504_vm0, %v3496_v2, %v3512_v9  ;;  %v3524_v14 = vsel %vm3508_vm1, %v3500_v4, %v3516_v10  ;;  %v3498_v15 = vadd.f32 %v3484_v54, %v3466_v18  ;;  %v3502_v16 = vadd.f32 %v3494_v3, %v3470_v5 }
 0x2a2   : > { %3528 = vst [vmem:[%s190_s30] sm:$0xff] %v3520_v13  ;;  %3532 = vst [vmem:[%s190_s30 + $0x20] sm:$0xff] %v3524_v14  ;;  %v3521_v17 = vsel %vm3505_vm2, %v3497_v47, %v3513_v11  ;;  %v3525_v19 = vsel %vm3509_vm3, %v3501_v51, %v3517_v12  ;;  %v3499_v20 = vadd.f32 %v3484_v54, %v3467_v8 }
 0x2a3   : > { %v3503_v21 = vadd.f32 %v3494_v3, %v3471_v59  ;;  %3529 = vst [vmem:[%s190_s30 + $0x8] sm:$0xff] %v3521_v17  ;;  %3533 = vst [vmem:[%s190_s30 + $0x28] sm:$0xff] %v3525_v19  ;;  %vm3506_vm4 = vcmp.ge.f32.partialorder %v3498_v15, 0.0  ;;  %v3514_v22 = vmul.f32 0.01, %v3498_v15  ;;  %vm3510_vm5 = vcmp.ge.f32.partialorder %v3502_v16, 0.0 }
 0x2a4   : > { %v3518_v23 = vmul.f32 0.01, %v3502_v16  ;;  %vm3507_vm6 = vcmp.ge.f32.partialorder %v3499_v20, 0.0  ;;  %v3515_v24 = vmul.f32 0.01, %v3499_v20 }
 0x2a5   : > { %vm3511_vm7 = vcmp.ge.f32.partialorder %v3503_v21, 0.0  ;;  %v3519_v26 = vmul.f32 0.01, %v3503_v21  ;;  %v3522_v27 = vsel %vm3506_vm4, %v3498_v15, %v3514_v22 }
 0x2a6   : > { %v3526_v28 = vsel %vm3510_vm5, %v3502_v16, %v3518_v23  ;;  %3530 = vst [vmem:[%s190_s30 + $0x10] sm:$0xff] %v3522_v27  ;;  %v3523_v29 = vsel %vm3507_vm6, %v3499_v20, %v3515_v24 }
 0x2a7   : > { %3534 = vst [vmem:[%s190_s30 + $0x30] sm:$0xff] %v3526_v28  ;;  %v3527_v33 = vsel %vm3511_vm7, %v3503_v21, %v3519_v26  ;;  %3531 = vst [vmem:[%s190_s30 + $0x18] sm:$0xff] %v3523_v29 }
 0x2a8   : > { %3535 = vst [vmem:[%s190_s30 + $0x38] sm:$0xff] %v3527_v33 }
 0x2a9   : > { %4243 = shalt.err (!%p4240_p3)
}
 0x2aa   : > { %s4244_s14 = scalar_lea.hbm %s5500_s7, 1024  ;;  %s4248_s23 = scalar_lea.hbm %s5552_s4, 2048 }
 0x2ab   : > { %p4245_p4 = scmp.ne.s32.totalorder %s5500_s7, %s4244_s14  ;;  %p4249_p9 = scmp.lt.u32.totalorder %s5500_s7, %s5552_s4 }
 0x2ac   : > { %p4250_p10 = scmp.lt.u32.totalorder %s4248_s23, %s4244_s14  ;;  %p4252_p12 = scmp.lt.u32.totalorder %s4244_s14, %s5500_s7 }
 0x2ad   : > { %p4246_p7 = pnand %p4245_p4, %p4368_p5 }
 0x2ae   : > { %p4251_p11 = por %p4250_p10, %p4249_p9 }
 0x2af   : > { %p4247_p8 = pneg %p4246_p7 }
 0x2b0   : > { %p4253_p13 = por %p4252_p12, %p4251_p11 }
 0x2b2   : > { %p4254_p0 = pnand %p4253_p13, %p4247_p8 }
 0x2b4   : > { %4257 = shalt.err (!%p4254_p0)
}
 0x2b5   : > { %s4304_s29 = smov 256  }
 0x2b6   : > { %4129 = dma.vmem_to_hbm [thread:$0]  (%p4368_p5), %s5502_s5, 1024, %s5500_s7, %s5506_s8, %s4304_s29, %s4304_s29, %s4298_s10  }
 0x2b7 PF: > { %p4135_p1 = scmp.ge.s32.totalorder %s4292_s18, 2  ;;  %s3565_s30 = sand.u32 1, %s4280_s15  }
 0x2b8   : > { %s3566_s19 = scalar_lea.sflag [#allocation4], %s3565_s30 }
 0x2b9   : > { %p4132_p2 = pnand %p4135_p1, %p4372_p6 }
 0x2bb   : > { %4275 = dma.done.wait (!%p4132_p2), %s3566_s19, 1024  }
 0x2bc   : > { %4277 = vsyncadd (!%p4132_p2), %s3566_s19, 4294966272  ;;  %p14_p3 = scmp.ge.s32.totalorder %s4355_s21, 4   ;;  %s5559_s15 = smov %s4284_s16 }
 0x2bd   : > { %s5560_s16 = smov %s4288_s17  ;;  %s5561_s17 = smov %s4366_s24 }
 0x2be   : > { %s5562_s18 = smov %s4355_s21  ;;  %16 = sbr.rel (!%p14_p3) target bundleno = 3 (0x3), region = 73 }
 0x2c5   :  { %3571 = vsyncpa [#allocation4], 1 }
 0x2c6   :  { %3573 = vsyncpa [#allocation4 + $0x1], 1 }

</bundles_post_ra>
